<compile_context>
chip_gen: v7x
topology: tpu7x:2x2x1
jax: 0.10.0
libtpu: 0.0.40
codegen_flags: <defaults>
</compile_context>

<pallas_src>
import functools

import numpy as np
import jax
import jax.numpy as jnp
from jax import lax
from jax.experimental import pallas as pl
from jax.experimental.pallas import tpu as pltpu

LSNR_MAX = 35.0
LSNR_MIN = -15.0
LSNR_SCALE = LSNR_MAX - LSNR_MIN
LSNR_OFFSET = LSNR_MIN
LSNR_PAD = 128                     # lane-dense lsnr output width (col 0 is the result)
VMEM_LIMIT = 32 * 1024 * 1024      # explicit scoped-VMEM budget (fits v5e/v6e/v7x)


# ---------------------------------------------------------------------------
# In-kernel helpers
# ---------------------------------------------------------------------------
def _bn_relu_matmul(x, w_ref, s_ref, b_ref):
    """x @ W with folded BatchNorm(eval) scale/shift and ReLU."""
    y = jnp.dot(x, w_ref[...], preferred_element_type=jnp.float32)
    return jnp.maximum(y * s_ref[...] + b_ref[...], 0.0)


# ---------------------------------------------------------------------------
# Kernel 1: fused erb branch  (erb_conv0 -> erb_conv1 -> erb_conv2 -> erb_conv3)
#   input : (1, T, kt*F*Cin) time-tap-stacked, channel-merged NHWC tile (one batch elem)
#   output: e0..e3 as (1, T, F_out*C) -- intermediates never touch HBM twice
# ---------------------------------------------------------------------------
def _erb_stack_kernel(x_ref,
                      w0_ref, s0_ref, b0_ref,
                      w1_ref, s1_ref, b1_ref,
                      w2_ref, s2_ref, b2_ref,
                      w3_ref, s3_ref, b3_ref,
                      e0_ref, e1_ref, e2_ref, e3_ref):
    x = x_ref[0]                                          # (T, kt*F*Cin)
    e0 = _bn_relu_matmul(x, w0_ref, s0_ref, b0_ref)       # single matmul, taps in K
    e0_ref[0] = e0
    e1 = _bn_relu_matmul(e0, w1_ref, s1_ref, b1_ref)
    e1_ref[0] = e1
    e2 = _bn_relu_matmul(e1, w2_ref, s2_ref, b2_ref)
    e2_ref[0] = e2
    e3_ref[0] = _bn_relu_matmul(e2, w3_ref, s3_ref, b3_ref)


def erb_conv_stack(x, w):
    # x: (B, T, kt*F) time-tap-stacked NHWC input of the erb branch (Cin = 1).
    B, T, k0 = x.shape
    n0 = w['w0'].shape[1]
    n1 = w['w1'].shape[1]
    n2 = w['w2'].shape[1]
    n3 = w['w3'].shape[1]
    full2d = lambda b: (0, 0)
    return pl.pallas_call(
        _erb_stack_kernel,
        out_shape=(jax.ShapeDtypeStruct((B, T, n0), jnp.float32),
                   jax.ShapeDtypeStruct((B, T, n1), jnp.float32),
                   jax.ShapeDtypeStruct((B, T, n2), jnp.float32),
                   jax.ShapeDtypeStruct((B, T, n3), jnp.float32)),
        grid_spec=pltpu.PrefetchScalarGridSpec(
            num_scalar_prefetch=0,
            grid=(B,),
            in_specs=[
                pl.BlockSpec((1, T, k0), lambda b: (b, 0, 0)),
                pl.BlockSpec((k0, n0), full2d),
                pl.BlockSpec((1, n0), full2d), pl.BlockSpec((1, n0), full2d),
                pl.BlockSpec((n0, n1), full2d),
                pl.BlockSpec((1, n1), full2d), pl.BlockSpec((1, n1), full2d),
                pl.BlockSpec((n1, n2), full2d),
                pl.BlockSpec((1, n2), full2d), pl.BlockSpec((1, n2), full2d),
                pl.BlockSpec((n2, n3), full2d),
                pl.BlockSpec((1, n3), full2d), pl.BlockSpec((1, n3), full2d),
            ],
            out_specs=[
                pl.BlockSpec((1, T, n0), lambda b: (b, 0, 0)),
                pl.BlockSpec((1, T, n1), lambda b: (b, 0, 0)),
                pl.BlockSpec((1, T, n2), lambda b: (b, 0, 0)),
                pl.BlockSpec((1, T, n3), lambda b: (b, 0, 0)),
            ]),
        compiler_params=pltpu.CompilerParams(
            dimension_semantics=("parallel",), vmem_limit_bytes=VMEM_LIMIT),
    )(x, w['w0'], w['s0'], w['b0'], w['w1'], w['s1'], w['b1'],
      w['w2'], w['s2'], w['b2'], w['w3'], w['s3'], w['b3'])


# ---------------------------------------------------------------------------
# Kernel 2: fused df branch  (df_conv0 -> df_conv1 -> df_fc_emb)
#   c1 stays in VMEM only; df_fc_emb is a block-diagonal (grouped) linear.
# ---------------------------------------------------------------------------
def _df_stack_kernel(x_ref,
                     w0_ref, s0_ref, b0_ref,
                     w1_ref, s1_ref, b1_ref,
                     wfc_ref, bfc_ref,
                     c0_ref, cemb_ref):
    x = x_ref[0]                                          # (T, kt*F*Cin)
    c0 = _bn_relu_matmul(x, w0_ref, s0_ref, b0_ref)
    c0_ref[0] = c0
    c1 = _bn_relu_matmul(c0, w1_ref, s1_ref, b1_ref)      # never written to HBM
    cemb_ref[0] = (jnp.dot(c1, wfc_ref[...], preferred_element_type=jnp.float32)
                   + bfc_ref[...])


def df_conv_stack(x, w):
    # x: (B, T, kt*F*2) time-tap-stacked NHWC input of the df branch (Cin = 2).
    B, T, k0 = x.shape
    n0 = w['w0'].shape[1]
    n1 = w['w1'].shape[1]
    nfc = w['wfc'].shape[1]
    full2d = lambda b: (0, 0)
    return pl.pallas_call(
        _df_stack_kernel,
        out_shape=(jax.ShapeDtypeStruct((B, T, n0), jnp.float32),
                   jax.ShapeDtypeStruct((B, T, nfc), jnp.float32)),
        grid_spec=pltpu.PrefetchScalarGridSpec(
            num_scalar_prefetch=0,
            grid=(B,),
            in_specs=[
                pl.BlockSpec((1, T, k0), lambda b: (b, 0, 0)),
                pl.BlockSpec((k0, n0), full2d),
                pl.BlockSpec((1, n0), full2d), pl.BlockSpec((1, n0), full2d),
                pl.BlockSpec((n0, n1), full2d),
                pl.BlockSpec((1, n1), full2d), pl.BlockSpec((1, n1), full2d),
                pl.BlockSpec((n1, nfc), full2d),
                pl.BlockSpec((1, nfc), full2d),
            ],
            out_specs=[
                pl.BlockSpec((1, T, n0), lambda b: (b, 0, 0)),
                pl.BlockSpec((1, T, nfc), lambda b: (b, 0, 0)),
            ]),
        compiler_params=pltpu.CompilerParams(
            dimension_semantics=("parallel",), vmem_limit_bytes=VMEM_LIMIT),
    )(x, w['w0'], w['s0'], w['b0'], w['w1'], w['s1'], w['b1'], w['wfc'], w['bfc'])


# ---------------------------------------------------------------------------
# Kernel 3: GRU (emb_gru) with fused input concat, hoisted input projection and
#           fused lane-dense lsnr head.  Grid over batch ("parallel").
# ---------------------------------------------------------------------------
def _gru_lsnr_kernel(e3_ref, cemb_ref, wih_e_ref, wih_c_ref, whh_ref, bih_ref, bhh_ref,
                     lw_ref, lb_ref, o_ref, lsnr_ref, gi_ref):
    T = o_ref.shape[1]
    H = whh_ref.shape[0]

    # Prologue: hoisted input projection for ALL timesteps; the [e3, cemb] concat is
    # fused as a split matmul (no wrapper-side concat/transpose materialization).
    gi_ref[...] = (
        jnp.dot(e3_ref[0], wih_e_ref[...], preferred_element_type=jnp.float32)
        + jnp.dot(cemb_ref[0], wih_c_ref[...], preferred_element_type=jnp.float32)
        + bih_ref[...])

    whh = whh_ref[...]
    bhh = bhh_ref[...]

    def step(t, h):                                       # h: (1, H) loop-carried value
        gi = gi_ref[pl.ds(t, 1), :]                       # (1, 3H)
        gh = jnp.dot(h, whh, preferred_element_type=jnp.float32) + bhh
        r = jax.nn.sigmoid(gi[:, 0:H] + gh[:, 0:H])
        z = jax.nn.sigmoid(gi[:, H:2 * H] + gh[:, H:2 * H])
        n = jnp.tanh(gi[:, 2 * H:3 * H] + r * gh[:, 2 * H:3 * H])
        h_new = (1.0 - z) * n + z * h
        o_ref[0, pl.ds(t, 1), :] = h_new
        return h_new

    h0 = jnp.zeros((1, H), jnp.float32)
    # Fully unrolled for short T (LLO visibility).  TODO(synk): partial unroll at long T.
    lax.fori_loop(0, T, step, h0, unroll=True)

    # Epilogue: lsnr head on the VMEM-resident GRU outputs.  The (H,1) weight is
    # zero-padded to (H,128) so the store is lane-dense; the wrapper takes column 0.
    y = jnp.dot(o_ref[0], lw_ref[...], preferred_element_type=jnp.float32) + lb_ref[...]
    lsnr_ref[0] = jax.nn.sigmoid(y) * LSNR_SCALE + LSNR_OFFSET


def gru_lsnr(e3, cemb, wih_e, wih_c, whh, bih, bhh, lw_pad, lb_pad):
    B, T, n3 = e3.shape
    nfc = cemb.shape[-1]
    H = whh.shape[0]
    full2d = lambda b: (0, 0)
    return pl.pallas_call(
        _gru_lsnr_kernel,
        out_shape=(jax.ShapeDtypeStruct((B, T, H), jnp.float32),
                   jax.ShapeDtypeStruct((B, T, LSNR_PAD), jnp.float32)),
        grid_spec=pltpu.PrefetchScalarGridSpec(
            num_scalar_prefetch=0,
            grid=(B,),
            in_specs=[
                pl.BlockSpec((1, T, n3), lambda b: (b, 0, 0)),
                pl.BlockSpec((1, T, nfc), lambda b: (b, 0, 0)),
                pl.BlockSpec((n3, 3 * H), full2d),
                pl.BlockSpec((nfc, 3 * H), full2d),
                pl.BlockSpec((H, 3 * H), full2d),
                pl.BlockSpec((1, 3 * H), full2d),
                pl.BlockSpec((1, 3 * H), full2d),
                pl.BlockSpec((H, LSNR_PAD), full2d),
                pl.BlockSpec((1, LSNR_PAD), full2d),
            ],
            out_specs=[
                pl.BlockSpec((1, T, H), lambda b: (b, 0, 0)),
                pl.BlockSpec((1, T, LSNR_PAD), lambda b: (b, 0, 0)),
            ],
            scratch_shapes=[
                pltpu.VMEM((T, 3 * H), jnp.float32),       # hoisted input projections
            ]),
        compiler_params=pltpu.CompilerParams(
            dimension_semantics=("parallel",), vmem_limit_bytes=VMEM_LIMIT),
    )(e3, cemb, wih_e, wih_c, whh, bih, bhh, lw_pad, lb_pad)


# ---------------------------------------------------------------------------
# Parameter construction (deterministic, synthetic)
# ---------------------------------------------------------------------------
def _expand_grouped(w, in_ch, groups):
    out_ch, ing, kt, kf = w.shape
    if groups == 1:
        return w
    opg = out_ch // groups
    wf = jnp.zeros((out_ch, in_ch, kt, kf), w.dtype)
    for g in range(groups):
        wf = wf.at[g * opg:(g + 1) * opg, g * ing:(g + 1) * ing].set(w[g * opg:(g + 1) * opg])
    return wf


def _make_bn(key, ch):
    k1, k2, k3, k4 = jax.random.split(key, 4)
    gamma = 1.0 + 0.1 * jax.random.normal(k1, (ch,))
    beta = 0.1 * jax.random.normal(k2, (ch,))
    mean = 0.1 * jax.random.normal(k3, (ch,))
    var = 1.0 + 0.1 * jnp.abs(jax.random.normal(k4, (ch,)))
    scale = gamma / jnp.sqrt(var + 1e-5)
    shift = beta - mean * scale
    return scale[None, :].astype(jnp.float32), shift[None, :].astype(jnp.float32)


def _make_sep_conv(key, in_ch, out_ch, kt, kf, groups):
    # grouped depthwise conv composed with 1x1 pointwise -> effective full conv weight
    kd, kp = jax.random.split(key)
    gw = 0.1 * jax.random.normal(kd, (out_ch, in_ch // groups, kt, kf))
    gw_full = _expand_grouped(gw, in_ch, groups)
    pw = 0.1 * jax.random.normal(kp, (out_ch, out_ch))
    return jnp.einsum('oc,cikl->oikl', pw, gw_full).astype(jnp.float32)


def init_params(key, conv_ch, nb_erb, nb_df, emb_hidden, groups):
    ks = list(jax.random.split(key, 20))
    p = {}
    p['erb_conv0_w'] = (0.1 * jax.random.normal(ks[0], (conv_ch, 1, 3, 3))).astype(jnp.float32)
    p['erb_conv0_bn'] = _make_bn(ks[1], conv_ch)
    p['erb_conv1_w'] = _make_sep_conv(ks[2], conv_ch, conv_ch, 1, 3, conv_ch)
    p['erb_conv1_bn'] = _make_bn(ks[3], conv_ch)
    p['erb_conv2_w'] = _make_sep_conv(ks[4], conv_ch, conv_ch, 1, 3, conv_ch)
    p['erb_conv2_bn'] = _make_bn(ks[5], conv_ch)
    p['erb_conv3_w'] = _make_sep_conv(ks[6], conv_ch, conv_ch, 1, 3, conv_ch)
    p['erb_conv3_bn'] = _make_bn(ks[7], conv_ch)
    p['df_conv0_w'] = _make_sep_conv(ks[8], 2, conv_ch, 3, 3, 2)
    p['df_conv0_bn'] = _make_bn(ks[9], conv_ch)
    p['df_conv1_w'] = _make_sep_conv(ks[10], conv_ch, conv_ch, 1, 3, conv_ch)
    p['df_conv1_bn'] = _make_bn(ks[11], conv_ch)
    gi = conv_ch * nb_df // 2
    gh = conv_ch * nb_erb // 4
    p['df_fc_w'] = (0.1 * jax.random.normal(ks[12], (groups, gi // groups, gh // groups))).astype(jnp.float32)
    p['df_fc_b'] = (0.1 * jax.random.normal(ks[13], (groups, 1, gh // groups))).astype(jnp.float32)
    emb_in = 2 * gh                      # enc_concat=True
    p['gru_wih'] = (0.1 * jax.random.normal(ks[14], (emb_in, 3 * emb_hidden))).astype(jnp.float32)
    p['gru_whh'] = (0.1 * jax.random.normal(ks[15], (emb_hidden, 3 * emb_hidden))).astype(jnp.float32)
    p['gru_bih'] = (0.1 * jax.random.normal(ks[16], (1, 3 * emb_hidden))).astype(jnp.float32)
    p['gru_bhh'] = (0.1 * jax.random.normal(ks[17], (1, 3 * emb_hidden))).astype(jnp.float32)
    p['lsnr_w'] = (0.1 * jax.random.normal(ks[18], (emb_hidden, 1))).astype(jnp.float32)
    p['lsnr_b'] = (0.1 * jax.random.normal(ks[19], (1, 1))).astype(jnp.float32)
    return p


# ---------------------------------------------------------------------------
# Kernel-ready parameter packing
# ---------------------------------------------------------------------------
def _banded_freq_weight(w_full, f_in, fstride):
    """Conv2d weight (Cout, Cin, kt, kf) -> per-time-tap banded matrix
    (kt, F_in*Cin, F_out*Cout) absorbing 'same' freq padding and the freq stride."""
    w = np.asarray(w_full, np.float32)
    cout, cin, kt, kf = w.shape
    fpad = kf // 2
    f_out = (f_in + 2 * fpad - kf) // fstride + 1
    wb = np.zeros((kt, f_in * cin, f_out * cout), np.float32)
    for fo in range(f_out):
        for df in range(kf):
            fi = fo * fstride + df - fpad
            if 0 <= fi < f_in:
                for dt in range(kt):
                    wb[dt, fi * cin:(fi + 1) * cin, fo * cout:(fo + 1) * cout] = w[:, :, dt, df].T
    return wb, f_out


def _tile_bn(scale, shift, f_out):
    # (1, Cout) -> (1, F_out*Cout) matching the fo*Cout + co column layout
    return jnp.tile(scale, (1, f_out)), jnp.tile(shift, (1, f_out))


def _block_diag_linear(w, b):
    # GroupedLinear -> block-diagonal (G*ig, G*hg) weight + concatenated bias (1, G*hg)
    w = np.asarray(w, np.float32)
    b = np.asarray(b, np.float32)
    g, ig, hg = w.shape
    wbd = np.zeros((g * ig, g * hg), np.float32)
    for gi in range(g):
        wbd[gi * ig:(gi + 1) * ig, gi * hg:(gi + 1) * hg] = w[gi]
    return jnp.asarray(wbd), jnp.asarray(b.reshape(1, g * hg))


def _stack_taps_weight(wb):
    # (kt, K, N) per-tap banded weight -> (kt*K, N) with taps stacked along K
    kt, K, N = wb.shape
    return jnp.asarray(wb.reshape(kt * K, N))


def prepare_encoder_params(raw, nb_erb, nb_df, conv_ch):
    p = {'conv_ch': conv_ch, 'kt': int(raw['erb_conv0_w'].shape[2])}
    # erb branch (fstride 1, 2, 2, 1)
    w0, f0 = _banded_freq_weight(raw['erb_conv0_w'], nb_erb, 1)
    s0, b0 = _tile_bn(*raw['erb_conv0_bn'], f0)
    w1, f1 = _banded_freq_weight(raw['erb_conv1_w'], f0, 2)
    s1, b1 = _tile_bn(*raw['erb_conv1_bn'], f1)
    w2, f2 = _banded_freq_weight(raw['erb_conv2_w'], f1, 2)
    s2, b2 = _tile_bn(*raw['erb_conv2_bn'], f2)
    w3, f3 = _banded_freq_weight(raw['erb_conv3_w'], f2, 1)
    s3, b3 = _tile_bn(*raw['erb_conv3_bn'], f3)
    p['erb'] = dict(w0=_stack_taps_weight(w0), s0=s0, b0=b0,
                    w1=jnp.asarray(w1[0]), s1=s1, b1=b1,
                    w2=jnp.asarray(w2[0]), s2=s2, b2=b2,
                    w3=jnp.asarray(w3[0]), s3=s3, b3=b3)
    # df branch (fstride 1, 2) + grouped linear
    d0, fd0 = _banded_freq_weight(raw['df_conv0_w'], nb_df, 1)
    ds0, db0 = _tile_bn(*raw['df_conv0_bn'], fd0)
    d1, fd1 = _banded_freq_weight(raw['df_conv1_w'], fd0, 2)
    ds1, db1 = _tile_bn(*raw['df_conv1_bn'], fd1)
    wfc, bfc = _block_diag_linear(raw['df_fc_w'], raw['df_fc_b'])
    p['df'] = dict(w0=_stack_taps_weight(d0), s0=ds0, b0=db0,
                   w1=jnp.asarray(d1[0]), s1=ds1, b1=db1, wfc=wfc, bfc=bfc)
    # GRU: split the input-projection weight at the e3/cemb boundary (fused concat).
    n3 = f3 * conv_ch
    p['gru_wih_e'] = raw['gru_wih'][:n3]
    p['gru_wih_c'] = raw['gru_wih'][n3:]
    for k in ('gru_whh', 'gru_bih', 'gru_bhh'):
        p[k] = raw[k]
    # lsnr head padded to 128 lanes (column 0 carries the result).
    H = raw['gru_whh'].shape[0]
    lw = np.zeros((H, LSNR_PAD), np.float32)
    lw[:, 0:1] = np.asarray(raw['lsnr_w'], np.float32)
    lb = np.zeros((1, LSNR_PAD), np.float32)
    lb[0, 0] = float(np.asarray(raw['lsnr_b'])[0, 0])
    p['lsnr_w_pad'] = jnp.asarray(lw)
    p['lsnr_b_pad'] = jnp.asarray(lb)
    return p


# ---------------------------------------------------------------------------
# Encoder forward (3 pallas_calls total)
# ---------------------------------------------------------------------------
def _stack_time_taps(x, kt):
    """(B, T, K) -> (B, T, kt*K): causal time pad + stack kt taps along the K axis."""
    B, T, K = x.shape
    xp = jnp.pad(x, ((0, 0), (kt - 1, 0), (0, 0)))
    return jnp.concatenate([xp[:, dt:dt + T, :] for dt in range(kt)], axis=-1)


def encoder_forward(params, feat_erb, feat_spec):
    p = params
    B, _, T, _ = feat_erb.shape
    conv_ch = p['conv_ch']
    kt = p['kt']

    # Channel-merged NHWC activations (B, T, F*C); C innermost matches the reference's
    # `.permute(0, 2, 3, 1).view(B, T, -1)` flattening exactly.
    x_erb = feat_erb[:, 0, :, :]                                        # Cin = 1
    x_spec = jnp.transpose(feat_spec, (0, 2, 3, 1)).reshape(B, T, -1)   # Cin = 2

    e0, e1, e2, e3 = erb_conv_stack(_stack_time_taps(x_erb, kt), p['erb'])
    c0, cemb = df_conv_stack(_stack_time_taps(x_spec, kt), p['df'])

    # enc_concat=True: the concat + transpose are fused into the GRU kernel.
    emb, lsnr_pad = gru_lsnr(e3, cemb, p['gru_wih_e'], p['gru_wih_c'],
                             p['gru_whh'], p['gru_bih'], p['gru_bhh'],
                             p['lsnr_w_pad'], p['lsnr_b_pad'])
    lsnr = lsnr_pad[:, :, :1]                                           # (B, T, 1)

    def to_nchw(y):                      # only for returned tensors (reference layout)
        bb, tt, fc = y.shape
        return jnp.transpose(y.reshape(bb, tt, fc // conv_ch, conv_ch), (0, 3, 1, 2))

    return to_nchw(e0), to_nchw(e1), to_nchw(e2), to_nchw(e3), emb, to_nchw(c0), lsnr


# ---------------------------------------------------------------------------
# Pure-JAX reference (for numerical validation)
# ---------------------------------------------------------------------------
def _reference_forward(raw, feat_erb, feat_spec):
    def conv_bn_relu(x, w, scale, shift, fstride):
        kt, kf = w.shape[2], w.shape[3]
        fpad = kf // 2
        y = lax.conv_general_dilated(
            x, w, window_strides=(1, fstride),
            padding=((kt - 1, 0), (fpad, fpad)),
            dimension_numbers=('NCHW', 'OIHW', 'NCHW'))
        y = y * scale[0][None, :, None, None] + shift[0][None, :, None, None]
        return jnp.maximum(y, 0.0)

    e0 = conv_bn_relu(feat_erb, raw['erb_conv0_w'], *raw['erb_conv0_bn'], 1)
    e1 = conv_bn_relu(e0, raw['erb_conv1_w'], *raw['erb_conv1_bn'], 2)
    e2 = conv_bn_relu(e1, raw['erb_conv2_w'], *raw['erb_conv2_bn'], 2)
    e3 = conv_bn_relu(e2, raw['erb_conv3_w'], *raw['erb_conv3_bn'], 1)
    c0 = conv_bn_relu(feat_spec, raw['df_conv0_w'], *raw['df_conv0_bn'], 1)
    c1 = conv_bn_relu(c0, raw['df_conv1_w'], *raw['df_conv1_bn'], 2)

    B, C, T, Fd = c1.shape
    cemb_in = jnp.transpose(c1, (0, 2, 3, 1)).reshape(B, T, Fd * C)
    G, ig, hg = raw['df_fc_w'].shape
    xg = cemb_in.reshape(B, T, G, ig)
    cemb = jnp.einsum('btgi,gih->btgh', xg, raw['df_fc_w'])
    cemb = cemb + raw['df_fc_b'][:, 0, :][None, None]
    cemb = cemb.reshape(B, T, G * hg)

    emb_in = jnp.concatenate(
        [jnp.transpose(e3, (0, 2, 3, 1)).reshape(B, T, -1), cemb], axis=-1)

    H = raw['gru_whh'].shape[0]

    def gru_cell(h, x_t):
        gi = x_t @ raw['gru_wih'] + raw['gru_bih']
        gh = h @ raw['gru_whh'] + raw['gru_bhh']
        r = jax.nn.sigmoid(gi[:, :H] + gh[:, :H])
        z = jax.nn.sigmoid(gi[:, H:2 * H] + gh[:, H:2 * H])
        n = jnp.tanh(gi[:, 2 * H:] + r * gh[:, 2 * H:])
        h_new = (1.0 - z) * n + z * h
        return h_new, h_new

    h0 = jnp.zeros((B, H), jnp.float32)
    _, outs = lax.scan(gru_cell, h0, jnp.transpose(emb_in, (1, 0, 2)))
    emb = jnp.transpose(outs, (1, 0, 2))
    lsnr = jax.nn.sigmoid(emb @ raw['lsnr_w'] + raw['lsnr_b'][0]) * LSNR_SCALE + LSNR_OFFSET
    return e0, e1, e2, e3, emb, c0, lsnr


if __name__ == "__main__":
    # Highest matmul precision for the f32 validation path (production would use bf16
    # weights/activations with f32 accumulation instead -- see TODO at the top).
    jax.config.update("jax_default_matmul_precision", "highest")

    B, T = 2, 8
    CONV_CH = 8
    NB_ERB = 16   # divisible by 4
    NB_DF = 16
    EMB_HIDDEN = 32
    GROUPS = 2

    root = jax.random.PRNGKey(0)
    kp, ke, ks = jax.random.split(root, 3)
    raw = init_params(kp, CONV_CH, NB_ERB, NB_DF, EMB_HIDDEN, GROUPS)
    params = prepare_encoder_params(raw, NB_ERB, NB_DF, CONV_CH)
    feat_erb = jax.random.normal(ke, (B, 1, T, NB_ERB), jnp.float32)
    feat_spec = jax.random.normal(ks, (B, 2, T, NB_DF), jnp.float32)

    fwd = jax.jit(functools.partial(encoder_forward, params))
    outs = jax.block_until_ready(fwd(feat_erb, feat_spec))
    e0, e1, e2, e3, emb, c0, lsnr = outs

    # shape sanity (reference NCHW layout for conv activations)
    assert e0.shape == (B, CONV_CH, T, NB_ERB)
    assert e1.shape == (B, CONV_CH, T, NB_ERB // 2)
    assert e2.shape == (B, CONV_CH, T, NB_ERB // 4)
    assert e3.shape == (B, CONV_CH, T, NB_ERB // 4)
    assert c0.shape == (B, CONV_CH, T, NB_DF)
    assert emb.shape == (B, T, EMB_HIDDEN)
    assert lsnr.shape == (B, T, 1)

    # numerical sanity vs. pure-JAX reference
    refs = jax.block_until_ready(
        jax.jit(functools.partial(_reference_forward, raw))(feat_erb, feat_spec))
    names = ("e0", "e1", "e2", "e3", "emb", "c0", "lsnr")
    for name, a, b in zip(names, outs, refs):
        err = float(jnp.linalg.norm(a - b) / (jnp.linalg.norm(b) + 1e-6))
        assert err < 1e-3, f"{name} mismatch: relative error {err}"

    print("KERNEL_OK")
</pallas_src>

<mosaic_0001>
module attributes {stable_mosaic.version = 11 : i64} {
  func.func @_erb_stack_kernel(%arg0: i32, %arg1: memref<1x8x48xf32, #tpu.memory_space<vmem>>, %arg2: memref<48x128xf32, #tpu.memory_space<vmem>>, %arg3: memref<1x128xf32, #tpu.memory_space<vmem>>, %arg4: memref<1x128xf32, #tpu.memory_space<vmem>>, %arg5: memref<128x64xf32, #tpu.memory_space<vmem>>, %arg6: memref<1x64xf32, #tpu.memory_space<vmem>>, %arg7: memref<1x64xf32, #tpu.memory_space<vmem>>, %arg8: memref<64x32xf32, #tpu.memory_space<vmem>>, %arg9: memref<1x32xf32, #tpu.memory_space<vmem>>, %arg10: memref<1x32xf32, #tpu.memory_space<vmem>>, %arg11: memref<32x32xf32, #tpu.memory_space<vmem>>, %arg12: memref<1x32xf32, #tpu.memory_space<vmem>>, %arg13: memref<1x32xf32, #tpu.memory_space<vmem>>, %arg14: memref<1x8x128xf32, #tpu.memory_space<vmem>>, %arg15: memref<1x8x64xf32, #tpu.memory_space<vmem>>, %arg16: memref<1x8x32xf32, #tpu.memory_space<vmem>>, %arg17: memref<1x8x32xf32, #tpu.memory_space<vmem>>) attributes {dimension_semantics = [#tpu.dimension_semantics<parallel>], iteration_bounds = array<i64: 2>, scalar_prefetch = 0 : i64, scratch_operands = 0 : i64, tpu.core_type = #tpu.core_type<tc>, window_params = [{transform_indices = @transform_0, window_bounds = array<i64: 1, 8, 48>}, {pipeline_mode = #tpu.pipeline_mode<synchronous>, transform_indices = @transform_1, window_bounds = array<i64: 48, 128>}, {pipeline_mode = #tpu.pipeline_mode<synchronous>, transform_indices = @transform_2, window_bounds = array<i64: 1, 128>}, {pipeline_mode = #tpu.pipeline_mode<synchronous>, transform_indices = @transform_3, window_bounds = array<i64: 1, 128>}, {pipeline_mode = #tpu.pipeline_mode<synchronous>, transform_indices = @transform_4, window_bounds = array<i64: 128, 64>}, {pipeline_mode = #tpu.pipeline_mode<synchronous>, transform_indices = @transform_5, window_bounds = array<i64: 1, 64>}, {pipeline_mode = #tpu.pipeline_mode<synchronous>, transform_indices = @transform_6, window_bounds = array<i64: 1, 64>}, {pipeline_mode = #tpu.pipeline_mode<synchronous>, transform_indices = @transform_7, window_bounds = array<i64: 64, 32>}, {pipeline_mode = #tpu.pipeline_mode<synchronous>, transform_indices = @transform_8, window_bounds = array<i64: 1, 32>}, {pipeline_mode = #tpu.pipeline_mode<synchronous>, transform_indices = @transform_9, window_bounds = array<i64: 1, 32>}, {pipeline_mode = #tpu.pipeline_mode<synchronous>, transform_indices = @transform_10, window_bounds = array<i64: 32, 32>}, {pipeline_mode = #tpu.pipeline_mode<synchronous>, transform_indices = @transform_11, window_bounds = array<i64: 1, 32>}, {pipeline_mode = #tpu.pipeline_mode<synchronous>, transform_indices = @transform_12, window_bounds = array<i64: 1, 32>}, {transform_indices = @transform_13, window_bounds = array<i64: 1, 8, 128>}, {transform_indices = @transform_14, window_bounds = array<i64: 1, 8, 64>}, {transform_indices = @transform_15, window_bounds = array<i64: 1, 8, 32>}, {transform_indices = @transform_16, window_bounds = array<i64: 1, 8, 32>}]} {
    %c0 = arith.constant 0 : index
    %c0_0 = arith.constant 0 : index
    %c0_1 = arith.constant 0 : index
    %0 = vector.load %arg1[%c0, %c0_0, %c0_1] : memref<1x8x48xf32, #tpu.memory_space<vmem>>, vector<1x8x48xf32>
    %1 = vector.shape_cast %0 : vector<1x8x48xf32> to vector<8x48xf32>
    %c0_2 = arith.constant 0 : index
    %c0_3 = arith.constant 0 : index
    %2 = vector.load %arg2[%c0_2, %c0_3] : memref<48x128xf32, #tpu.memory_space<vmem>>, vector<48x128xf32>
    %cst = arith.constant dense<0.000000e+00> : vector<8x128xf32>
    %3 = tpu.matmul %1, %2, %cst {dimension_numbers = #tpu.dot_dimension_numbers<[1], [0], [0], [1], [0, 0, 1, 1], [], []>, precision = #tpu.contract_precision<fp32>} : vector<8x48xf32>, vector<48x128xf32>, vector<8x128xf32> -> vector<8x128xf32>
    %c0_4 = arith.constant 0 : index
    %c0_5 = arith.constant 0 : index
    %4 = vector.load %arg3[%c0_4, %c0_5] : memref<1x128xf32, #tpu.memory_space<vmem>>, vector<1x128xf32>
    %5 = vector.broadcast %4 : vector<1x128xf32> to vector<8x128xf32>
    %6 = arith.mulf %3, %5 : vector<8x128xf32>
    %c0_6 = arith.constant 0 : index
    %c0_7 = arith.constant 0 : index
    %7 = vector.load %arg4[%c0_6, %c0_7] : memref<1x128xf32, #tpu.memory_space<vmem>>, vector<1x128xf32>
    %8 = vector.broadcast %7 : vector<1x128xf32> to vector<8x128xf32>
    %9 = arith.addf %6, %8 : vector<8x128xf32>
    %cst_8 = arith.constant 0.000000e+00 : f32
    %10 = vector.broadcast %cst_8 : f32 to vector<8x128xf32>
    %11 = arith.maximumf %9, %10 : vector<8x128xf32>
    %c0_9 = arith.constant 0 : index
    %c0_10 = arith.constant 0 : index
    %c0_11 = arith.constant 0 : index
    %12 = vector.load %arg14[%c0_9, %c0_10, %c0_11] : memref<1x8x128xf32, #tpu.memory_space<vmem>>, vector<1x8x128xf32>
    %13 = vector.shape_cast %12 : vector<1x8x128xf32> to vector<8x128xf32>
    %14 = vector.shape_cast %11 : vector<8x128xf32> to vector<1x8x128xf32>
    tpu.vector_store %arg14[%c0_9, %c0_10, %c0_11], %14 {strides = array<i32>} : memref<1x8x128xf32, #tpu.memory_space<vmem>>, vector<1x8x128xf32>,
    %c0_12 = arith.constant 0 : index
    %c0_13 = arith.constant 0 : index
    %15 = vector.load %arg5[%c0_12, %c0_13] : memref<128x64xf32, #tpu.memory_space<vmem>>, vector<128x64xf32>
    %cst_14 = arith.constant dense<0.000000e+00> : vector<8x64xf32>
    %16 = tpu.matmul %11, %15, %cst_14 {dimension_numbers = #tpu.dot_dimension_numbers<[1], [0], [0], [1], [0, 0, 1, 1], [], []>, precision = #tpu.contract_precision<fp32>} : vector<8x128xf32>, vector<128x64xf32>, vector<8x64xf32> -> vector<8x64xf32>
    %c0_15 = arith.constant 0 : index
    %c0_16 = arith.constant 0 : index
    %17 = vector.load %arg6[%c0_15, %c0_16] : memref<1x64xf32, #tpu.memory_space<vmem>>, vector<1x64xf32>
    %18 = vector.broadcast %17 : vector<1x64xf32> to vector<8x64xf32>
    %19 = arith.mulf %16, %18 : vector<8x64xf32>
    %c0_17 = arith.constant 0 : index
    %c0_18 = arith.constant 0 : index
    %20 = vector.load %arg7[%c0_17, %c0_18] : memref<1x64xf32, #tpu.memory_space<vmem>>, vector<1x64xf32>
    %21 = vector.broadcast %20 : vector<1x64xf32> to vector<8x64xf32>
    %22 = arith.addf %19, %21 : vector<8x64xf32>
    %cst_19 = arith.constant 0.000000e+00 : f32
    %23 = vector.broadcast %cst_19 : f32 to vector<8x64xf32>
    %24 = arith.maximumf %22, %23 : vector<8x64xf32>
    %c0_20 = arith.constant 0 : index
    %c0_21 = arith.constant 0 : index
    %c0_22 = arith.constant 0 : index
    %25 = vector.load %arg15[%c0_20, %c0_21, %c0_22] : memref<1x8x64xf32, #tpu.memory_space<vmem>>, vector<1x8x64xf32>
    %26 = vector.shape_cast %25 : vector<1x8x64xf32> to vector<8x64xf32>
    %27 = vector.shape_cast %24 : vector<8x64xf32> to vector<1x8x64xf32>
    tpu.vector_store %arg15[%c0_20, %c0_21, %c0_22], %27 {strides = array<i32>} : memref<1x8x64xf32, #tpu.memory_space<vmem>>, vector<1x8x64xf32>,
    %c0_23 = arith.constant 0 : index
    %c0_24 = arith.constant 0 : index
    %28 = vector.load %arg8[%c0_23, %c0_24] : memref<64x32xf32, #tpu.memory_space<vmem>>, vector<64x32xf32>
    %cst_25 = arith.constant dense<0.000000e+00> : vector<8x32xf32>
    %29 = tpu.matmul %24, %28, %cst_25 {dimension_numbers = #tpu.dot_dimension_numbers<[1], [0], [0], [1], [0, 0, 1, 1], [], []>, precision = #tpu.contract_precision<fp32>} : vector<8x64xf32>, vector<64x32xf32>, vector<8x32xf32> -> vector<8x32xf32>
    %c0_26 = arith.constant 0 : index
    %c0_27 = arith.constant 0 : index
    %30 = vector.load %arg9[%c0_26, %c0_27] : memref<1x32xf32, #tpu.memory_space<vmem>>, vector<1x32xf32>
    %31 = vector.broadcast %30 : vector<1x32xf32> to vector<8x32xf32>
    %32 = arith.mulf %29, %31 : vector<8x32xf32>
    %c0_28 = arith.constant 0 : index
    %c0_29 = arith.constant 0 : index
    %33 = vector.load %arg10[%c0_28, %c0_29] : memref<1x32xf32, #tpu.memory_space<vmem>>, vector<1x32xf32>
    %34 = vector.broadcast %33 : vector<1x32xf32> to vector<8x32xf32>
    %35 = arith.addf %32, %34 : vector<8x32xf32>
    %cst_30 = arith.constant 0.000000e+00 : f32
    %36 = vector.broadcast %cst_30 : f32 to vector<8x32xf32>
    %37 = arith.maximumf %35, %36 : vector<8x32xf32>
    %c0_31 = arith.constant 0 : index
    %c0_32 = arith.constant 0 : index
    %c0_33 = arith.constant 0 : index
    %38 = vector.load %arg16[%c0_31, %c0_32, %c0_33] : memref<1x8x32xf32, #tpu.memory_space<vmem>>, vector<1x8x32xf32>
    %39 = vector.shape_cast %38 : vector<1x8x32xf32> to vector<8x32xf32>
    %40 = vector.shape_cast %37 : vector<8x32xf32> to vector<1x8x32xf32>
    tpu.vector_store %arg16[%c0_31, %c0_32, %c0_33], %40 {strides = array<i32>} : memref<1x8x32xf32, #tpu.memory_space<vmem>>, vector<1x8x32xf32>,
    %c0_34 = arith.constant 0 : index
    %c0_35 = arith.constant 0 : index
    %41 = vector.load %arg11[%c0_34, %c0_35] : memref<32x32xf32, #tpu.memory_space<vmem>>, vector<32x32xf32>
    %cst_36 = arith.constant dense<0.000000e+00> : vector<8x32xf32>
    %42 = tpu.matmul %37, %41, %cst_36 {dimension_numbers = #tpu.dot_dimension_numbers<[1], [0], [0], [1], [0, 0, 1, 1], [], []>, precision = #tpu.contract_precision<fp32>} : vector<8x32xf32>, vector<32x32xf32>, vector<8x32xf32> -> vector<8x32xf32>
    %c0_37 = arith.constant 0 : index
    %c0_38 = arith.constant 0 : index
    %43 = vector.load %arg12[%c0_37, %c0_38] : memref<1x32xf32, #tpu.memory_space<vmem>>, vector<1x32xf32>
    %44 = vector.broadcast %43 : vector<1x32xf32> to vector<8x32xf32>
    %45 = arith.mulf %42, %44 : vector<8x32xf32>
    %c0_39 = arith.constant 0 : index
    %c0_40 = arith.constant 0 : index
    %46 = vector.load %arg13[%c0_39, %c0_40] : memref<1x32xf32, #tpu.memory_space<vmem>>, vector<1x32xf32>
    %47 = vector.broadcast %46 : vector<1x32xf32> to vector<8x32xf32>
    %48 = arith.addf %45, %47 : vector<8x32xf32>
    %cst_41 = arith.constant 0.000000e+00 : f32
    %49 = vector.broadcast %cst_41 : f32 to vector<8x32xf32>
    %50 = arith.maximumf %48, %49 : vector<8x32xf32>
    %c0_42 = arith.constant 0 : index
    %c0_43 = arith.constant 0 : index
    %c0_44 = arith.constant 0 : index
    %51 = vector.load %arg17[%c0_42, %c0_43, %c0_44] : memref<1x8x32xf32, #tpu.memory_space<vmem>>, vector<1x8x32xf32>
    %52 = vector.shape_cast %51 : vector<1x8x32xf32> to vector<8x32xf32>
    %53 = vector.shape_cast %50 : vector<8x32xf32> to vector<1x8x32xf32>
    tpu.vector_store %arg17[%c0_42, %c0_43, %c0_44], %53 {strides = array<i32>} : memref<1x8x32xf32, #tpu.memory_space<vmem>>, vector<1x8x32xf32>,
    return
  }
  func.func @transform_0(%arg0: i32) -> (i32, i32, i32) {
    %c0_i32 = arith.constant 0 : i32
    %c0_i32_0 = arith.constant 0 : i32
    %c0_i32_1 = arith.constant 0 : i32
    return %arg0, %c0_i32, %c0_i32_0 : i32, i32, i32
  }
  func.func @transform_1(%arg0: i32) -> (i32, i32) {
    %c0_i32 = arith.constant 0 : i32
    %c0_i32_0 = arith.constant 0 : i32
    %c0_i32_1 = arith.constant 0 : i32
    return %c0_i32, %c0_i32_0 : i32, i32
  }
  func.func @transform_2(%arg0: i32) -> (i32, i32) {
    %c0_i32 = arith.constant 0 : i32
    %c0_i32_0 = arith.constant 0 : i32
    %c0_i32_1 = arith.constant 0 : i32
    return %c0_i32, %c0_i32_0 : i32, i32
  }
  func.func @transform_3(%arg0: i32) -> (i32, i32) {
    %c0_i32 = arith.constant 0 : i32
    %c0_i32_0 = arith.constant 0 : i32
    %c0_i32_1 = arith.constant 0 : i32
    return %c0_i32, %c0_i32_0 : i32, i32
  }
  func.func @transform_4(%arg0: i32) -> (i32, i32) {
    %c0_i32 = arith.constant 0 : i32
    %c0_i32_0 = arith.constant 0 : i32
    %c0_i32_1 = arith.constant 0 : i32
    return %c0_i32, %c0_i32_0 : i32, i32
  }
  func.func @transform_5(%arg0: i32) -> (i32, i32) {
    %c0_i32 = arith.constant 0 : i32
    %c0_i32_0 = arith.constant 0 : i32
    %c0_i32_1 = arith.constant 0 : i32
    return %c0_i32, %c0_i32_0 : i32, i32
  }
  func.func @transform_6(%arg0: i32) -> (i32, i32) {
    %c0_i32 = arith.constant 0 : i32
    %c0_i32_0 = arith.constant 0 : i32
    %c0_i32_1 = arith.constant 0 : i32
    return %c0_i32, %c0_i32_0 : i32, i32
  }
  func.func @transform_7(%arg0: i32) -> (i32, i32) {
    %c0_i32 = arith.constant 0 : i32
    %c0_i32_0 = arith.constant 0 : i32
    %c0_i32_1 = arith.constant 0 : i32
    return %c0_i32, %c0_i32_0 : i32, i32
  }
  func.func @transform_8(%arg0: i32) -> (i32, i32) {
    %c0_i32 = arith.constant 0 : i32
    %c0_i32_0 = arith.constant 0 : i32
    %c0_i32_1 = arith.constant 0 : i32
    return %c0_i32, %c0_i32_0 : i32, i32
  }
  func.func @transform_9(%arg0: i32) -> (i32, i32) {
    %c0_i32 = arith.constant 0 : i32
    %c0_i32_0 = arith.constant 0 : i32
    %c0_i32_1 = arith.constant 0 : i32
    return %c0_i32, %c0_i32_0 : i32, i32
  }
  func.func @transform_10(%arg0: i32) -> (i32, i32) {
    %c0_i32 = arith.constant 0 : i32
    %c0_i32_0 = arith.constant 0 : i32
    %c0_i32_1 = arith.constant 0 : i32
    return %c0_i32, %c0_i32_0 : i32, i32
  }
  func.func @transform_11(%arg0: i32) -> (i32, i32) {
    %c0_i32 = arith.constant 0 : i32
    %c0_i32_0 = arith.constant 0 : i32
    %c0_i32_1 = arith.constant 0 : i32
    return %c0_i32, %c0_i32_0 : i32, i32
  }
  func.func @transform_12(%arg0: i32) -> (i32, i32) {
    %c0_i32 = arith.constant 0 : i32
    %c0_i32_0 = arith.constant 0 : i32
    %c0_i32_1 = arith.constant 0 : i32
    return %c0_i32, %c0_i32_0 : i32, i32
  }
  func.func @transform_13(%arg0: i32) -> (i32, i32, i32) {
    %c0_i32 = arith.constant 0 : i32
    %c0_i32_0 = arith.constant 0 : i32
    %c0_i32_1 = arith.constant 0 : i32
    return %arg0, %c0_i32, %c0_i32_0 : i32, i32, i32
  }
  func.func @transform_14(%arg0: i32) -> (i32, i32, i32) {
    %c0_i32 = arith.constant 0 : i32
    %c0_i32_0 = arith.constant 0 : i32
    %c0_i32_1 = arith.constant 0 : i32
    return %arg0, %c0_i32, %c0_i32_0 : i32, i32, i32
  }
  func.func @transform_15(%arg0: i32) -> (i32, i32, i32) {
    %c0_i32 = arith.constant 0 : i32
    %c0_i32_0 = arith.constant 0 : i32
    %c0_i32_1 = arith.constant 0 : i32
    return %arg0, %c0_i32, %c0_i32_0 : i32, i32, i32
  }
  func.func @transform_16(%arg0: i32) -> (i32, i32, i32) {
    %c0_i32 = arith.constant 0 : i32
    %c0_i32_0 = arith.constant 0 : i32
    %c0_i32_1 = arith.constant 0 : i32
    return %arg0, %c0_i32, %c0_i32_0 : i32, i32, i32
  }
}

module attributes {stable_mosaic.version = 11 : i64} {
  func.func @_df_stack_kernel(%arg0: i32, %arg1: memref<1x8x96xf32, #tpu.memory_space<vmem>>, %arg2: memref<96x128xf32, #tpu.memory_space<vmem>>, %arg3: memref<1x128xf32, #tpu.memory_space<vmem>>, %arg4: memref<1x128xf32, #tpu.memory_space<vmem>>, %arg5: memref<128x64xf32, #tpu.memory_space<vmem>>, %arg6: memref<1x64xf32, #tpu.memory_space<vmem>>, %arg7: memref<1x64xf32, #tpu.memory_space<vmem>>, %arg8: memref<64x32xf32, #tpu.memory_space<vmem>>, %arg9: memref<1x32xf32, #tpu.memory_space<vmem>>, %arg10: memref<1x8x128xf32, #tpu.memory_space<vmem>>, %arg11: memref<1x8x32xf32, #tpu.memory_space<vmem>>) attributes {dimension_semantics = [#tpu.dimension_semantics<parallel>], iteration_bounds = array<i64: 2>, scalar_prefetch = 0 : i64, scratch_operands = 0 : i64, tpu.core_type = #tpu.core_type<tc>, window_params = [{transform_indices = @transform_0, window_bounds = array<i64: 1, 8, 96>}, {pipeline_mode = #tpu.pipeline_mode<synchronous>, transform_indices = @transform_1, window_bounds = array<i64: 96, 128>}, {pipeline_mode = #tpu.pipeline_mode<synchronous>, transform_indices = @transform_2, window_bounds = array<i64: 1, 128>}, {pipeline_mode = #tpu.pipeline_mode<synchronous>, transform_indices = @transform_3, window_bounds = array<i64: 1, 128>}, {pipeline_mode = #tpu.pipeline_mode<synchronous>, transform_indices = @transform_4, window_bounds = array<i64: 128, 64>}, {pipeline_mode = #tpu.pipeline_mode<synchronous>, transform_indices = @transform_5, window_bounds = array<i64: 1, 64>}, {pipeline_mode = #tpu.pipeline_mode<synchronous>, transform_indices = @transform_6, window_bounds = array<i64: 1, 64>}, {pipeline_mode = #tpu.pipeline_mode<synchronous>, transform_indices = @transform_7, window_bounds = array<i64: 64, 32>}, {pipeline_mode = #tpu.pipeline_mode<synchronous>, transform_indices = @transform_8, window_bounds = array<i64: 1, 32>}, {transform_indices = @transform_9, window_bounds = array<i64: 1, 8, 128>}, {transform_indices = @transform_10, window_bounds = array<i64: 1, 8, 32>}]} {
    %c0 = arith.constant 0 : index
    %c0_0 = arith.constant 0 : index
    %c0_1 = arith.constant 0 : index
    %0 = vector.load %arg1[%c0, %c0_0, %c0_1] : memref<1x8x96xf32, #tpu.memory_space<vmem>>, vector<1x8x96xf32>
    %1 = vector.shape_cast %0 : vector<1x8x96xf32> to vector<8x96xf32>
    %c0_2 = arith.constant 0 : index
    %c0_3 = arith.constant 0 : index
    %2 = vector.load %arg2[%c0_2, %c0_3] : memref<96x128xf32, #tpu.memory_space<vmem>>, vector<96x128xf32>
    %cst = arith.constant dense<0.000000e+00> : vector<8x128xf32>
    %3 = tpu.matmul %1, %2, %cst {dimension_numbers = #tpu.dot_dimension_numbers<[1], [0], [0], [1], [0, 0, 1, 1], [], []>, precision = #tpu.contract_precision<fp32>} : vector<8x96xf32>, vector<96x128xf32>, vector<8x128xf32> -> vector<8x128xf32>
    %c0_4 = arith.constant 0 : index
    %c0_5 = arith.constant 0 : index
    %4 = vector.load %arg3[%c0_4, %c0_5] : memref<1x128xf32, #tpu.memory_space<vmem>>, vector<1x128xf32>
    %5 = vector.broadcast %4 : vector<1x128xf32> to vector<8x128xf32>
    %6 = arith.mulf %3, %5 : vector<8x128xf32>
    %c0_6 = arith.constant 0 : index
    %c0_7 = arith.constant 0 : index
    %7 = vector.load %arg4[%c0_6, %c0_7] : memref<1x128xf32, #tpu.memory_space<vmem>>, vector<1x128xf32>
    %8 = vector.broadcast %7 : vector<1x128xf32> to vector<8x128xf32>
    %9 = arith.addf %6, %8 : vector<8x128xf32>
    %cst_8 = arith.constant 0.000000e+00 : f32
    %10 = vector.broadcast %cst_8 : f32 to vector<8x128xf32>
    %11 = arith.maximumf %9, %10 : vector<8x128xf32>
    %c0_9 = arith.constant 0 : index
    %c0_10 = arith.constant 0 : index
    %c0_11 = arith.constant 0 : index
    %12 = vector.load %arg10[%c0_9, %c0_10, %c0_11] : memref<1x8x128xf32, #tpu.memory_space<vmem>>, vector<1x8x128xf32>
    %13 = vector.shape_cast %12 : vector<1x8x128xf32> to vector<8x128xf32>
    %14 = vector.shape_cast %11 : vector<8x128xf32> to vector<1x8x128xf32>
    tpu.vector_store %arg10[%c0_9, %c0_10, %c0_11], %14 {strides = array<i32>} : memref<1x8x128xf32, #tpu.memory_space<vmem>>, vector<1x8x128xf32>,
    %c0_12 = arith.constant 0 : index
    %c0_13 = arith.constant 0 : index
    %15 = vector.load %arg5[%c0_12, %c0_13] : memref<128x64xf32, #tpu.memory_space<vmem>>, vector<128x64xf32>
    %cst_14 = arith.constant dense<0.000000e+00> : vector<8x64xf32>
    %16 = tpu.matmul %11, %15, %cst_14 {dimension_numbers = #tpu.dot_dimension_numbers<[1], [0], [0], [1], [0, 0, 1, 1], [], []>, precision = #tpu.contract_precision<fp32>} : vector<8x128xf32>, vector<128x64xf32>, vector<8x64xf32> -> vector<8x64xf32>
    %c0_15 = arith.constant 0 : index
    %c0_16 = arith.constant 0 : index
    %17 = vector.load %arg6[%c0_15, %c0_16] : memref<1x64xf32, #tpu.memory_space<vmem>>, vector<1x64xf32>
    %18 = vector.broadcast %17 : vector<1x64xf32> to vector<8x64xf32>
    %19 = arith.mulf %16, %18 : vector<8x64xf32>
    %c0_17 = arith.constant 0 : index
    %c0_18 = arith.constant 0 : index
    %20 = vector.load %arg7[%c0_17, %c0_18] : memref<1x64xf32, #tpu.memory_space<vmem>>, vector<1x64xf32>
    %21 = vector.broadcast %20 : vector<1x64xf32> to vector<8x64xf32>
    %22 = arith.addf %19, %21 : vector<8x64xf32>
    %cst_19 = arith.constant 0.000000e+00 : f32
    %23 = vector.broadcast %cst_19 : f32 to vector<8x64xf32>
    %24 = arith.maximumf %22, %23 : vector<8x64xf32>
    %c0_20 = arith.constant 0 : index
    %c0_21 = arith.constant 0 : index
    %25 = vector.load %arg8[%c0_20, %c0_21] : memref<64x32xf32, #tpu.memory_space<vmem>>, vector<64x32xf32>
    %cst_22 = arith.constant dense<0.000000e+00> : vector<8x32xf32>
    %26 = tpu.matmul %24, %25, %cst_22 {dimension_numbers = #tpu.dot_dimension_numbers<[1], [0], [0], [1], [0, 0, 1, 1], [], []>, precision = #tpu.contract_precision<fp32>} : vector<8x64xf32>, vector<64x32xf32>, vector<8x32xf32> -> vector<8x32xf32>
    %c0_23 = arith.constant 0 : index
    %c0_24 = arith.constant 0 : index
    %27 = vector.load %arg9[%c0_23, %c0_24] : memref<1x32xf32, #tpu.memory_space<vmem>>, vector<1x32xf32>
    %28 = vector.broadcast %27 : vector<1x32xf32> to vector<8x32xf32>
    %29 = arith.addf %26, %28 : vector<8x32xf32>
    %c0_25 = arith.constant 0 : index
    %c0_26 = arith.constant 0 : index
    %c0_27 = arith.constant 0 : index
    %30 = vector.load %arg11[%c0_25, %c0_26, %c0_27] : memref<1x8x32xf32, #tpu.memory_space<vmem>>, vector<1x8x32xf32>
    %31 = vector.shape_cast %30 : vector<1x8x32xf32> to vector<8x32xf32>
    %32 = vector.shape_cast %29 : vector<8x32xf32> to vector<1x8x32xf32>
    tpu.vector_store %arg11[%c0_25, %c0_26, %c0_27], %32 {strides = array<i32>} : memref<1x8x32xf32, #tpu.memory_space<vmem>>, vector<1x8x32xf32>,
    return
  }
  func.func @transform_0(%arg0: i32) -> (i32, i32, i32) {
    %c0_i32 = arith.constant 0 : i32
    %c0_i32_0 = arith.constant 0 : i32
    %c0_i32_1 = arith.constant 0 : i32
    return %arg0, %c0_i32, %c0_i32_0 : i32, i32, i32
  }
  func.func @transform_1(%arg0: i32) -> (i32, i32) {
    %c0_i32 = arith.constant 0 : i32
    %c0_i32_0 = arith.constant 0 : i32
    %c0_i32_1 = arith.constant 0 : i32
    return %c0_i32, %c0_i32_0 : i32, i32
  }
  func.func @transform_2(%arg0: i32) -> (i32, i32) {
    %c0_i32 = arith.constant 0 : i32
    %c0_i32_0 = arith.constant 0 : i32
    %c0_i32_1 = arith.constant 0 : i32
    return %c0_i32, %c0_i32_0 : i32, i32
  }
  func.func @transform_3(%arg0: i32) -> (i32, i32) {
    %c0_i32 = arith.constant 0 : i32
    %c0_i32_0 = arith.constant 0 : i32
    %c0_i32_1 = arith.constant 0 : i32
    return %c0_i32, %c0_i32_0 : i32, i32
  }
  func.func @transform_4(%arg0: i32) -> (i32, i32) {
    %c0_i32 = arith.constant 0 : i32
    %c0_i32_0 = arith.constant 0 : i32
    %c0_i32_1 = arith.constant 0 : i32
    return %c0_i32, %c0_i32_0 : i32, i32
  }
  func.func @transform_5(%arg0: i32) -> (i32, i32) {
    %c0_i32 = arith.constant 0 : i32
    %c0_i32_0 = arith.constant 0 : i32
    %c0_i32_1 = arith.constant 0 : i32
    return %c0_i32, %c0_i32_0 : i32, i32
  }
  func.func @transform_6(%arg0: i32) -> (i32, i32) {
    %c0_i32 = arith.constant 0 : i32
    %c0_i32_0 = arith.constant 0 : i32
    %c0_i32_1 = arith.constant 0 : i32
    return %c0_i32, %c0_i32_0 : i32, i32
  }
  func.func @transform_7(%arg0: i32) -> (i32, i32) {
    %c0_i32 = arith.constant 0 : i32
    %c0_i32_0 = arith.constant 0 : i32
    %c0_i32_1 = arith.constant 0 : i32
    return %c0_i32, %c0_i32_0 : i32, i32
  }
  func.func @transform_8(%arg0: i32) -> (i32, i32) {
    %c0_i32 = arith.constant 0 : i32
    %c0_i32_0 = arith.constant 0 : i32
    %c0_i32_1 = arith.constant 0 : i32
    return %c0_i32, %c0_i32_0 : i32, i32
  }
  func.func @transform_9(%arg0: i32) -> (i32, i32, i32) {
    %c0_i32 = arith.constant 0 : i32
    %c0_i32_0 = arith.constant 0 : i32
    %c0_i32_1 = arith.constant 0 : i32
    return %arg0, %c0_i32, %c0_i32_0 : i32, i32, i32
  }
  func.func @transform_10(%arg0: i32) -> (i32, i32, i32) {
    %c0_i32 = arith.constant 0 : i32
    %c0_i32_0 = arith.constant 0 : i32
    %c0_i32_1 = arith.constant 0 : i32
    return %arg0, %c0_i32, %c0_i32_0 : i32, i32, i32
  }
}

module attributes {stable_mosaic.version = 11 : i64} {
  func.func @_gru_lsnr_kernel(%arg0: i32, %arg1: memref<1x8x32xf32, #tpu.memory_space<vmem>>, %arg2: memref<1x8x32xf32, #tpu.memory_space<vmem>>, %arg3: memref<32x96xf32, #tpu.memory_space<vmem>>, %arg4: memref<32x96xf32, #tpu.memory_space<vmem>>, %arg5: memref<32x96xf32, #tpu.memory_space<vmem>>, %arg6: memref<1x96xf32, #tpu.memory_space<vmem>>, %arg7: memref<1x96xf32, #tpu.memory_space<vmem>>, %arg8: memref<32x128xf32, #tpu.memory_space<vmem>>, %arg9: memref<1x128xf32, #tpu.memory_space<vmem>>, %arg10: memref<1x8x32xf32, #tpu.memory_space<vmem>>, %arg11: memref<1x8x128xf32, #tpu.memory_space<vmem>>, %arg12: memref<8x96xf32, #tpu.memory_space<vmem>>) attributes {dimension_semantics = [#tpu.dimension_semantics<parallel>], iteration_bounds = array<i64: 2>, scalar_prefetch = 0 : i64, scratch_operands = 1 : i64, tpu.core_type = #tpu.core_type<tc>, window_params = [{transform_indices = @transform_0, window_bounds = array<i64: 1, 8, 32>}, {transform_indices = @transform_1, window_bounds = array<i64: 1, 8, 32>}, {pipeline_mode = #tpu.pipeline_mode<synchronous>, transform_indices = @transform_2, window_bounds = array<i64: 32, 96>}, {pipeline_mode = #tpu.pipeline_mode<synchronous>, transform_indices = @transform_3, window_bounds = array<i64: 32, 96>}, {pipeline_mode = #tpu.pipeline_mode<synchronous>, transform_indices = @transform_4, window_bounds = array<i64: 32, 96>}, {pipeline_mode = #tpu.pipeline_mode<synchronous>, transform_indices = @transform_5, window_bounds = array<i64: 1, 96>}, {pipeline_mode = #tpu.pipeline_mode<synchronous>, transform_indices = @transform_6, window_bounds = array<i64: 1, 96>}, {pipeline_mode = #tpu.pipeline_mode<synchronous>, transform_indices = @transform_7, window_bounds = array<i64: 32, 128>}, {pipeline_mode = #tpu.pipeline_mode<synchronous>, transform_indices = @transform_8, window_bounds = array<i64: 1, 128>}, {transform_indices = @transform_9, window_bounds = array<i64: 1, 8, 32>}, {transform_indices = @transform_10, window_bounds = array<i64: 1, 8, 128>}]} {
    %c0 = arith.constant 0 : index
    %c0_0 = arith.constant 0 : index
    %c0_1 = arith.constant 0 : index
    %0 = vector.load %arg1[%c0, %c0_0, %c0_1] : memref<1x8x32xf32, #tpu.memory_space<vmem>>, vector<1x8x32xf32>
    %1 = vector.shape_cast %0 : vector<1x8x32xf32> to vector<8x32xf32>
    %c0_2 = arith.constant 0 : index
    %c0_3 = arith.constant 0 : index
    %2 = vector.load %arg3[%c0_2, %c0_3] : memref<32x96xf32, #tpu.memory_space<vmem>>, vector<32x96xf32>
    %cst = arith.constant dense<0.000000e+00> : vector<8x96xf32>
    %3 = tpu.matmul %1, %2, %cst {dimension_numbers = #tpu.dot_dimension_numbers<[1], [0], [0], [1], [0, 0, 1, 1], [], []>, precision = #tpu.contract_precision<fp32>} : vector<8x32xf32>, vector<32x96xf32>, vector<8x96xf32> -> vector<8x96xf32>
    %c0_4 = arith.constant 0 : index
    %c0_5 = arith.constant 0 : index
    %c0_6 = arith.constant 0 : index
    %4 = vector.load %arg2[%c0_4, %c0_5, %c0_6] : memref<1x8x32xf32, #tpu.memory_space<vmem>>, vector<1x8x32xf32>
    %5 = vector.shape_cast %4 : vector<1x8x32xf32> to vector<8x32xf32>
    %c0_7 = arith.constant 0 : index
    %c0_8 = arith.constant 0 : index
    %6 = vector.load %arg4[%c0_7, %c0_8] : memref<32x96xf32, #tpu.memory_space<vmem>>, vector<32x96xf32>
    %cst_9 = arith.constant dense<0.000000e+00> : vector<8x96xf32>
    %7 = tpu.matmul %5, %6, %cst_9 {dimension_numbers = #tpu.dot_dimension_numbers<[1], [0], [0], [1], [0, 0, 1, 1], [], []>, precision = #tpu.contract_precision<fp32>} : vector<8x32xf32>, vector<32x96xf32>, vector<8x96xf32> -> vector<8x96xf32>
    %8 = arith.addf %3, %7 : vector<8x96xf32>
    %c0_10 = arith.constant 0 : index
    %c0_11 = arith.constant 0 : index
    %9 = vector.load %arg6[%c0_10, %c0_11] : memref<1x96xf32, #tpu.memory_space<vmem>>, vector<1x96xf32>
    %10 = vector.broadcast %9 : vector<1x96xf32> to vector<8x96xf32>
    %11 = arith.addf %8, %10 : vector<8x96xf32>
    %c0_12 = arith.constant 0 : index
    %c0_13 = arith.constant 0 : index
    %12 = vector.load %arg12[%c0_12, %c0_13] : memref<8x96xf32, #tpu.memory_space<vmem>>, vector<8x96xf32>
    tpu.vector_store %arg12[%c0_12, %c0_13], %11 {strides = array<i32>} : memref<8x96xf32, #tpu.memory_space<vmem>>, vector<8x96xf32>,
    %c0_14 = arith.constant 0 : index
    %c0_15 = arith.constant 0 : index
    %13 = vector.load %arg5[%c0_14, %c0_15] : memref<32x96xf32, #tpu.memory_space<vmem>>, vector<32x96xf32>
    %c0_16 = arith.constant 0 : index
    %c0_17 = arith.constant 0 : index
    %14 = vector.load %arg7[%c0_16, %c0_17] : memref<1x96xf32, #tpu.memory_space<vmem>>, vector<1x96xf32>
    %cst_18 = arith.constant 0.000000e+00 : f32
    %15 = vector.broadcast %cst_18 : f32 to vector<1x32xf32>
    %c0_i32 = arith.constant 0 : i32
    %16 = arith.index_cast %c0_i32 : i32 to index
    %c0_19 = arith.constant 0 : index
    %17 = vector.load %arg12[%16, %c0_19] : memref<8x96xf32, #tpu.memory_space<vmem>>, vector<1x96xf32>
    %cst_20 = arith.constant dense<0.000000e+00> : vector<1x96xf32>
    %18 = tpu.matmul %15, %13, %cst_20 {dimension_numbers = #tpu.dot_dimension_numbers<[1], [0], [0], [1], [0, 0, 1, 1], [], []>, precision = #tpu.contract_precision<fp32>} : vector<1x32xf32>, vector<32x96xf32>, vector<1x96xf32> -> vector<1x96xf32>
    %19 = arith.addf %18, %14 : vector<1x96xf32>
    %20 = vector.extract_strided_slice %17 {offsets = [0, 0], sizes = [1, 32], strides = [1, 1]} : vector<1x96xf32> to vector<1x32xf32>
    %21 = vector.extract_strided_slice %19 {offsets = [0, 0], sizes = [1, 32], strides = [1, 1]} : vector<1x96xf32> to vector<1x32xf32>
    %22 = arith.addf %20, %21 : vector<1x32xf32>
    %23 = arith.negf %22 : vector<1x32xf32>
    %24 = math.exp %23 : vector<1x32xf32>
    %cst_21 = arith.constant 1.000000e+00 : f32
    %25 = vector.broadcast %cst_21 : f32 to vector<1x32xf32>
    %26 = arith.addf %25, %24 : vector<1x32xf32>
    %27 = arith.divf %25, %26 : vector<1x32xf32>
    %28 = vector.extract_strided_slice %17 {offsets = [0, 32], sizes = [1, 32], strides = [1, 1]} : vector<1x96xf32> to vector<1x32xf32>
    %29 = vector.extract_strided_slice %19 {offsets = [0, 32], sizes = [1, 32], strides = [1, 1]} : vector<1x96xf32> to vector<1x32xf32>
    %30 = arith.addf %28, %29 : vector<1x32xf32>
    %31 = arith.negf %30 : vector<1x32xf32>
    %32 = math.exp %31 : vector<1x32xf32>
    %cst_22 = arith.constant 1.000000e+00 : f32
    %33 = vector.broadcast %cst_22 : f32 to vector<1x32xf32>
    %34 = arith.addf %33, %32 : vector<1x32xf32>
    %35 = arith.divf %33, %34 : vector<1x32xf32>
    %36 = vector.extract_strided_slice %17 {offsets = [0, 64], sizes = [1, 32], strides = [1, 1]} : vector<1x96xf32> to vector<1x32xf32>
    %37 = vector.extract_strided_slice %19 {offsets = [0, 64], sizes = [1, 32], strides = [1, 1]} : vector<1x96xf32> to vector<1x32xf32>
    %38 = arith.mulf %27, %37 : vector<1x32xf32>
    %39 = arith.addf %36, %38 : vector<1x32xf32>
    %40 = math.tanh %39 : vector<1x32xf32>
    %cst_23 = arith.constant 1.000000e+00 : f32
    %41 = vector.broadcast %cst_23 : f32 to vector<1x32xf32>
    %42 = arith.subf %41, %35 : vector<1x32xf32>
    %43 = arith.mulf %42, %40 : vector<1x32xf32>
    %44 = arith.mulf %35, %15 : vector<1x32xf32>
    %45 = arith.addf %43, %44 : vector<1x32xf32>
    %c0_24 = arith.constant 0 : index
    %46 = arith.index_cast %c0_i32 : i32 to index
    %c0_25 = arith.constant 0 : index
    %47 = vector.load %arg10[%c0_24, %46, %c0_25] : memref<1x8x32xf32, #tpu.memory_space<vmem>>, vector<1x1x32xf32>
    %48 = vector.shape_cast %47 : vector<1x1x32xf32> to vector<1x32xf32>
    %49 = vector.shape_cast %45 : vector<1x32xf32> to vector<1x1x32xf32>
    tpu.vector_store %arg10[%c0_24, %46, %c0_25], %49 {strides = array<i32>} : memref<1x8x32xf32, #tpu.memory_space<vmem>>, vector<1x1x32xf32>,
    %c1_i32 = arith.constant 1 : i32
    %50 = arith.index_cast %c1_i32 : i32 to index
    %c0_26 = arith.constant 0 : index
    %51 = vector.load %arg12[%50, %c0_26] : memref<8x96xf32, #tpu.memory_space<vmem>>, vector<1x96xf32>
    %cst_27 = arith.constant dense<0.000000e+00> : vector<1x96xf32>
    %52 = tpu.matmul %45, %13, %cst_27 {dimension_numbers = #tpu.dot_dimension_numbers<[1], [0], [0], [1], [0, 0, 1, 1], [], []>, precision = #tpu.contract_precision<fp32>} : vector<1x32xf32>, vector<32x96xf32>, vector<1x96xf32> -> vector<1x96xf32>
    %53 = arith.addf %52, %14 : vector<1x96xf32>
    %54 = vector.extract_strided_slice %51 {offsets = [0, 0], sizes = [1, 32], strides = [1, 1]} : vector<1x96xf32> to vector<1x32xf32>
    %55 = vector.extract_strided_slice %53 {offsets = [0, 0], sizes = [1, 32], strides = [1, 1]} : vector<1x96xf32> to vector<1x32xf32>
    %56 = arith.addf %54, %55 : vector<1x32xf32>
    %57 = arith.negf %56 : vector<1x32xf32>
    %58 = math.exp %57 : vector<1x32xf32>
    %cst_28 = arith.constant 1.000000e+00 : f32
    %59 = vector.broadcast %cst_28 : f32 to vector<1x32xf32>
    %60 = arith.addf %59, %58 : vector<1x32xf32>
    %61 = arith.divf %59, %60 : vector<1x32xf32>
    %62 = vector.extract_strided_slice %51 {offsets = [0, 32], sizes = [1, 32], strides = [1, 1]} : vector<1x96xf32> to vector<1x32xf32>
    %63 = vector.extract_strided_slice %53 {offsets = [0, 32], sizes = [1, 32], strides = [1, 1]} : vector<1x96xf32> to vector<1x32xf32>
    %64 = arith.addf %62, %63 : vector<1x32xf32>
    %65 = arith.negf %64 : vector<1x32xf32>
    %66 = math.exp %65 : vector<1x32xf32>
    %cst_29 = arith.constant 1.000000e+00 : f32
    %67 = vector.broadcast %cst_29 : f32 to vector<1x32xf32>
    %68 = arith.addf %67, %66 : vector<1x32xf32>
    %69 = arith.divf %67, %68 : vector<1x32xf32>
    %70 = vector.extract_strided_slice %51 {offsets = [0, 64], sizes = [1, 32], strides = [1, 1]} : vector<1x96xf32> to vector<1x32xf32>
    %71 = vector.extract_strided_slice %53 {offsets = [0, 64], sizes = [1, 32], strides = [1, 1]} : vector<1x96xf32> to vector<1x32xf32>
    %72 = arith.mulf %61, %71 : vector<1x32xf32>
    %73 = arith.addf %70, %72 : vector<1x32xf32>
    %74 = math.tanh %73 : vector<1x32xf32>
    %cst_30 = arith.constant 1.000000e+00 : f32
    %75 = vector.broadcast %cst_30 : f32 to vector<1x32xf32>
    %76 = arith.subf %75, %69 : vector<1x32xf32>
    %77 = arith.mulf %76, %74 : vector<1x32xf32>
    %78 = arith.mulf %69, %45 : vector<1x32xf32>
    %79 = arith.addf %77, %78 : vector<1x32xf32>
    %c0_31 = arith.constant 0 : index
    %80 = arith.index_cast %c1_i32 : i32 to index
    %c0_32 = arith.constant 0 : index
    %81 = vector.load %arg10[%c0_31, %80, %c0_32] : memref<1x8x32xf32, #tpu.memory_space<vmem>>, vector<1x1x32xf32>
    %82 = vector.shape_cast %81 : vector<1x1x32xf32> to vector<1x32xf32>
    %83 = vector.shape_cast %79 : vector<1x32xf32> to vector<1x1x32xf32>
    tpu.vector_store %arg10[%c0_31, %80, %c0_32], %83 {strides = array<i32>} : memref<1x8x32xf32, #tpu.memory_space<vmem>>, vector<1x1x32xf32>,
    %c2_i32 = arith.constant 2 : i32
    %84 = arith.index_cast %c2_i32 : i32 to index
    %c0_33 = arith.constant 0 : index
    %85 = vector.load %arg12[%84, %c0_33] : memref<8x96xf32, #tpu.memory_space<vmem>>, vector<1x96xf32>
    %cst_34 = arith.constant dense<0.000000e+00> : vector<1x96xf32>
    %86 = tpu.matmul %79, %13, %cst_34 {dimension_numbers = #tpu.dot_dimension_numbers<[1], [0], [0], [1], [0, 0, 1, 1], [], []>, precision = #tpu.contract_precision<fp32>} : vector<1x32xf32>, vector<32x96xf32>, vector<1x96xf32> -> vector<1x96xf32>
    %87 = arith.addf %86, %14 : vector<1x96xf32>
    %88 = vector.extract_strided_slice %85 {offsets = [0, 0], sizes = [1, 32], strides = [1, 1]} : vector<1x96xf32> to vector<1x32xf32>
    %89 = vector.extract_strided_slice %87 {offsets = [0, 0], sizes = [1, 32], strides = [1, 1]} : vector<1x96xf32> to vector<1x32xf32>
    %90 = arith.addf %88, %89 : vector<1x32xf32>
    %91 = arith.negf %90 : vector<1x32xf32>
    %92 = math.exp %91 : vector<1x32xf32>
    %cst_35 = arith.constant 1.000000e+00 : f32
    %93 = vector.broadcast %cst_35 : f32 to vector<1x32xf32>
    %94 = arith.addf %93, %92 : vector<1x32xf32>
    %95 = arith.divf %93, %94 : vector<1x32xf32>
    %96 = vector.extract_strided_slice %85 {offsets = [0, 32], sizes = [1, 32], strides = [1, 1]} : vector<1x96xf32> to vector<1x32xf32>
    %97 = vector.extract_strided_slice %87 {offsets = [0, 32], sizes = [1, 32], strides = [1, 1]} : vector<1x96xf32> to vector<1x32xf32>
    %98 = arith.addf %96, %97 : vector<1x32xf32>
    %99 = arith.negf %98 : vector<1x32xf32>
    %100 = math.exp %99 : vector<1x32xf32>
    %cst_36 = arith.constant 1.000000e+00 : f32
    %101 = vector.broadcast %cst_36 : f32 to vector<1x32xf32>
    %102 = arith.addf %101, %100 : vector<1x32xf32>
    %103 = arith.divf %101, %102 : vector<1x32xf32>
    %104 = vector.extract_strided_slice %85 {offsets = [0, 64], sizes = [1, 32], strides = [1, 1]} : vector<1x96xf32> to vector<1x32xf32>
    %105 = vector.extract_strided_slice %87 {offsets = [0, 64], sizes = [1, 32], strides = [1, 1]} : vector<1x96xf32> to vector<1x32xf32>
    %106 = arith.mulf %95, %105 : vector<1x32xf32>
    %107 = arith.addf %104, %106 : vector<1x32xf32>
    %108 = math.tanh %107 : vector<1x32xf32>
    %cst_37 = arith.constant 1.000000e+00 : f32
    %109 = vector.broadcast %cst_37 : f32 to vector<1x32xf32>
    %110 = arith.subf %109, %103 : vector<1x32xf32>
    %111 = arith.mulf %110, %108 : vector<1x32xf32>
    %112 = arith.mulf %103, %79 : vector<1x32xf32>
    %113 = arith.addf %111, %112 : vector<1x32xf32>
    %c0_38 = arith.constant 0 : index
    %114 = arith.index_cast %c2_i32 : i32 to index
    %c0_39 = arith.constant 0 : index
    %115 = vector.load %arg10[%c0_38, %114, %c0_39] : memref<1x8x32xf32, #tpu.memory_space<vmem>>, vector<1x1x32xf32>
    %116 = vector.shape_cast %115 : vector<1x1x32xf32> to vector<1x32xf32>
    %117 = vector.shape_cast %113 : vector<1x32xf32> to vector<1x1x32xf32>
    tpu.vector_store %arg10[%c0_38, %114, %c0_39], %117 {strides = array<i32>} : memref<1x8x32xf32, #tpu.memory_space<vmem>>, vector<1x1x32xf32>,
    %c3_i32 = arith.constant 3 : i32
    %118 = arith.index_cast %c3_i32 : i32 to index
    %c0_40 = arith.constant 0 : index
    %119 = vector.load %arg12[%118, %c0_40] : memref<8x96xf32, #tpu.memory_space<vmem>>, vector<1x96xf32>
    %cst_41 = arith.constant dense<0.000000e+00> : vector<1x96xf32>
    %120 = tpu.matmul %113, %13, %cst_41 {dimension_numbers = #tpu.dot_dimension_numbers<[1], [0], [0], [1], [0, 0, 1, 1], [], []>, precision = #tpu.contract_precision<fp32>} : vector<1x32xf32>, vector<32x96xf32>, vector<1x96xf32> -> vector<1x96xf32>
    %121 = arith.addf %120, %14 : vector<1x96xf32>
    %122 = vector.extract_strided_slice %119 {offsets = [0, 0], sizes = [1, 32], strides = [1, 1]} : vector<1x96xf32> to vector<1x32xf32>
    %123 = vector.extract_strided_slice %121 {offsets = [0, 0], sizes = [1, 32], strides = [1, 1]} : vector<1x96xf32> to vector<1x32xf32>
    %124 = arith.addf %122, %123 : vector<1x32xf32>
    %125 = arith.negf %124 : vector<1x32xf32>
    %126 = math.exp %125 : vector<1x32xf32>
    %cst_42 = arith.constant 1.000000e+00 : f32
    %127 = vector.broadcast %cst_42 : f32 to vector<1x32xf32>
    %128 = arith.addf %127, %126 : vector<1x32xf32>
    %129 = arith.divf %127, %128 : vector<1x32xf32>
    %130 = vector.extract_strided_slice %119 {offsets = [0, 32], sizes = [1, 32], strides = [1, 1]} : vector<1x96xf32> to vector<1x32xf32>
    %131 = vector.extract_strided_slice %121 {offsets = [0, 32], sizes = [1, 32], strides = [1, 1]} : vector<1x96xf32> to vector<1x32xf32>
    %132 = arith.addf %130, %131 : vector<1x32xf32>
    %133 = arith.negf %132 : vector<1x32xf32>
    %134 = math.exp %133 : vector<1x32xf32>
    %cst_43 = arith.constant 1.000000e+00 : f32
    %135 = vector.broadcast %cst_43 : f32 to vector<1x32xf32>
    %136 = arith.addf %135, %134 : vector<1x32xf32>
    %137 = arith.divf %135, %136 : vector<1x32xf32>
    %138 = vector.extract_strided_slice %119 {offsets = [0, 64], sizes = [1, 32], strides = [1, 1]} : vector<1x96xf32> to vector<1x32xf32>
    %139 = vector.extract_strided_slice %121 {offsets = [0, 64], sizes = [1, 32], strides = [1, 1]} : vector<1x96xf32> to vector<1x32xf32>
    %140 = arith.mulf %129, %139 : vector<1x32xf32>
    %141 = arith.addf %138, %140 : vector<1x32xf32>
    %142 = math.tanh %141 : vector<1x32xf32>
    %cst_44 = arith.constant 1.000000e+00 : f32
    %143 = vector.broadcast %cst_44 : f32 to vector<1x32xf32>
    %144 = arith.subf %143, %137 : vector<1x32xf32>
    %145 = arith.mulf %144, %142 : vector<1x32xf32>
    %146 = arith.mulf %137, %113 : vector<1x32xf32>
    %147 = arith.addf %145, %146 : vector<1x32xf32>
    %c0_45 = arith.constant 0 : index
    %148 = arith.index_cast %c3_i32 : i32 to index
    %c0_46 = arith.constant 0 : index
    %149 = vector.load %arg10[%c0_45, %148, %c0_46] : memref<1x8x32xf32, #tpu.memory_space<vmem>>, vector<1x1x32xf32>
    %150 = vector.shape_cast %149 : vector<1x1x32xf32> to vector<1x32xf32>
    %151 = vector.shape_cast %147 : vector<1x32xf32> to vector<1x1x32xf32>
    tpu.vector_store %arg10[%c0_45, %148, %c0_46], %151 {strides = array<i32>} : memref<1x8x32xf32, #tpu.memory_space<vmem>>, vector<1x1x32xf32>,
    %c4_i32 = arith.constant 4 : i32
    %152 = arith.index_cast %c4_i32 : i32 to index
    %c0_47 = arith.constant 0 : index
    %153 = vector.load %arg12[%152, %c0_47] : memref<8x96xf32, #tpu.memory_space<vmem>>, vector<1x96xf32>
    %cst_48 = arith.constant dense<0.000000e+00> : vector<1x96xf32>
    %154 = tpu.matmul %147, %13, %cst_48 {dimension_numbers = #tpu.dot_dimension_numbers<[1], [0], [0], [1], [0, 0, 1, 1], [], []>, precision = #tpu.contract_precision<fp32>} : vector<1x32xf32>, vector<32x96xf32>, vector<1x96xf32> -> vector<1x96xf32>
    %155 = arith.addf %154, %14 : vector<1x96xf32>
    %156 = vector.extract_strided_slice %153 {offsets = [0, 0], sizes = [1, 32], strides = [1, 1]} : vector<1x96xf32> to vector<1x32xf32>
    %157 = vector.extract_strided_slice %155 {offsets = [0, 0], sizes = [1, 32], strides = [1, 1]} : vector<1x96xf32> to vector<1x32xf32>
    %158 = arith.addf %156, %157 : vector<1x32xf32>
    %159 = arith.negf %158 : vector<1x32xf32>
    %160 = math.exp %159 : vector<1x32xf32>
    %cst_49 = arith.constant 1.000000e+00 : f32
    %161 = vector.broadcast %cst_49 : f32 to vector<1x32xf32>
    %162 = arith.addf %161, %160 : vector<1x32xf32>
    %163 = arith.divf %161, %162 : vector<1x32xf32>
    %164 = vector.extract_strided_slice %153 {offsets = [0, 32], sizes = [1, 32], strides = [1, 1]} : vector<1x96xf32> to vector<1x32xf32>
    %165 = vector.extract_strided_slice %155 {offsets = [0, 32], sizes = [1, 32], strides = [1, 1]} : vector<1x96xf32> to vector<1x32xf32>
    %166 = arith.addf %164, %165 : vector<1x32xf32>
    %167 = arith.negf %166 : vector<1x32xf32>
    %168 = math.exp %167 : vector<1x32xf32>
    %cst_50 = arith.constant 1.000000e+00 : f32
    %169 = vector.broadcast %cst_50 : f32 to vector<1x32xf32>
    %170 = arith.addf %169, %168 : vector<1x32xf32>
    %171 = arith.divf %169, %170 : vector<1x32xf32>
    %172 = vector.extract_strided_slice %153 {offsets = [0, 64], sizes = [1, 32], strides = [1, 1]} : vector<1x96xf32> to vector<1x32xf32>
    %173 = vector.extract_strided_slice %155 {offsets = [0, 64], sizes = [1, 32], strides = [1, 1]} : vector<1x96xf32> to vector<1x32xf32>
    %174 = arith.mulf %163, %173 : vector<1x32xf32>
    %175 = arith.addf %172, %174 : vector<1x32xf32>
    %176 = math.tanh %175 : vector<1x32xf32>
    %cst_51 = arith.constant 1.000000e+00 : f32
    %177 = vector.broadcast %cst_51 : f32 to vector<1x32xf32>
    %178 = arith.subf %177, %171 : vector<1x32xf32>
    %179 = arith.mulf %178, %176 : vector<1x32xf32>
    %180 = arith.mulf %171, %147 : vector<1x32xf32>
    %181 = arith.addf %179, %180 : vector<1x32xf32>
    %c0_52 = arith.constant 0 : index
    %182 = arith.index_cast %c4_i32 : i32 to index
    %c0_53 = arith.constant 0 : index
    %183 = vector.load %arg10[%c0_52, %182, %c0_53] : memref<1x8x32xf32, #tpu.memory_space<vmem>>, vector<1x1x32xf32>
    %184 = vector.shape_cast %183 : vector<1x1x32xf32> to vector<1x32xf32>
    %185 = vector.shape_cast %181 : vector<1x32xf32> to vector<1x1x32xf32>
    tpu.vector_store %arg10[%c0_52, %182, %c0_53], %185 {strides = array<i32>} : memref<1x8x32xf32, #tpu.memory_space<vmem>>, vector<1x1x32xf32>,
    %c5_i32 = arith.constant 5 : i32
    %186 = arith.index_cast %c5_i32 : i32 to index
    %c0_54 = arith.constant 0 : index
    %187 = vector.load %arg12[%186, %c0_54] : memref<8x96xf32, #tpu.memory_space<vmem>>, vector<1x96xf32>
    %cst_55 = arith.constant dense<0.000000e+00> : vector<1x96xf32>
    %188 = tpu.matmul %181, %13, %cst_55 {dimension_numbers = #tpu.dot_dimension_numbers<[1], [0], [0], [1], [0, 0, 1, 1], [], []>, precision = #tpu.contract_precision<fp32>} : vector<1x32xf32>, vector<32x96xf32>, vector<1x96xf32> -> vector<1x96xf32>
    %189 = arith.addf %188, %14 : vector<1x96xf32>
    %190 = vector.extract_strided_slice %187 {offsets = [0, 0], sizes = [1, 32], strides = [1, 1]} : vector<1x96xf32> to vector<1x32xf32>
    %191 = vector.extract_strided_slice %189 {offsets = [0, 0], sizes = [1, 32], strides = [1, 1]} : vector<1x96xf32> to vector<1x32xf32>
    %192 = arith.addf %190, %191 : vector<1x32xf32>
    %193 = arith.negf %192 : vector<1x32xf32>
    %194 = math.exp %193 : vector<1x32xf32>
    %cst_56 = arith.constant 1.000000e+00 : f32
    %195 = vector.broadcast %cst_56 : f32 to vector<1x32xf32>
    %196 = arith.addf %195, %194 : vector<1x32xf32>
    %197 = arith.divf %195, %196 : vector<1x32xf32>
    %198 = vector.extract_strided_slice %187 {offsets = [0, 32], sizes = [1, 32], strides = [1, 1]} : vector<1x96xf32> to vector<1x32xf32>
    %199 = vector.extract_strided_slice %189 {offsets = [0, 32], sizes = [1, 32], strides = [1, 1]} : vector<1x96xf32> to vector<1x32xf32>
    %200 = arith.addf %198, %199 : vector<1x32xf32>
    %201 = arith.negf %200 : vector<1x32xf32>
    %202 = math.exp %201 : vector<1x32xf32>
    %cst_57 = arith.constant 1.000000e+00 : f32
    %203 = vector.broadcast %cst_57 : f32 to vector<1x32xf32>
    %204 = arith.addf %203, %202 : vector<1x32xf32>
    %205 = arith.divf %203, %204 : vector<1x32xf32>
    %206 = vector.extract_strided_slice %187 {offsets = [0, 64], sizes = [1, 32], strides = [1, 1]} : vector<1x96xf32> to vector<1x32xf32>
    %207 = vector.extract_strided_slice %189 {offsets = [0, 64], sizes = [1, 32], strides = [1, 1]} : vector<1x96xf32> to vector<1x32xf32>
    %208 = arith.mulf %197, %207 : vector<1x32xf32>
    %209 = arith.addf %206, %208 : vector<1x32xf32>
    %210 = math.tanh %209 : vector<1x32xf32>
    %cst_58 = arith.constant 1.000000e+00 : f32
    %211 = vector.broadcast %cst_58 : f32 to vector<1x32xf32>
    %212 = arith.subf %211, %205 : vector<1x32xf32>
    %213 = arith.mulf %212, %210 : vector<1x32xf32>
    %214 = arith.mulf %205, %181 : vector<1x32xf32>
    %215 = arith.addf %213, %214 : vector<1x32xf32>
    %c0_59 = arith.constant 0 : index
    %216 = arith.index_cast %c5_i32 : i32 to index
    %c0_60 = arith.constant 0 : index
    %217 = vector.load %arg10[%c0_59, %216, %c0_60] : memref<1x8x32xf32, #tpu.memory_space<vmem>>, vector<1x1x32xf32>
    %218 = vector.shape_cast %217 : vector<1x1x32xf32> to vector<1x32xf32>
    %219 = vector.shape_cast %215 : vector<1x32xf32> to vector<1x1x32xf32>
    tpu.vector_store %arg10[%c0_59, %216, %c0_60], %219 {strides = array<i32>} : memref<1x8x32xf32, #tpu.memory_space<vmem>>, vector<1x1x32xf32>,
    %c6_i32 = arith.constant 6 : i32
    %220 = arith.index_cast %c6_i32 : i32 to index
    %c0_61 = arith.constant 0 : index
    %221 = vector.load %arg12[%220, %c0_61] : memref<8x96xf32, #tpu.memory_space<vmem>>, vector<1x96xf32>
    %cst_62 = arith.constant dense<0.000000e+00> : vector<1x96xf32>
    %222 = tpu.matmul %215, %13, %cst_62 {dimension_numbers = #tpu.dot_dimension_numbers<[1], [0], [0], [1], [0, 0, 1, 1], [], []>, precision = #tpu.contract_precision<fp32>} : vector<1x32xf32>, vector<32x96xf32>, vector<1x96xf32> -> vector<1x96xf32>
    %223 = arith.addf %222, %14 : vector<1x96xf32>
    %224 = vector.extract_strided_slice %221 {offsets = [0, 0], sizes = [1, 32], strides = [1, 1]} : vector<1x96xf32> to vector<1x32xf32>
    %225 = vector.extract_strided_slice %223 {offsets = [0, 0], sizes = [1, 32], strides = [1, 1]} : vector<1x96xf32> to vector<1x32xf32>
    %226 = arith.addf %224, %225 : vector<1x32xf32>
    %227 = arith.negf %226 : vector<1x32xf32>
    %228 = math.exp %227 : vector<1x32xf32>
    %cst_63 = arith.constant 1.000000e+00 : f32
    %229 = vector.broadcast %cst_63 : f32 to vector<1x32xf32>
    %230 = arith.addf %229, %228 : vector<1x32xf32>
    %231 = arith.divf %229, %230 : vector<1x32xf32>
    %232 = vector.extract_strided_slice %221 {offsets = [0, 32], sizes = [1, 32], strides = [1, 1]} : vector<1x96xf32> to vector<1x32xf32>
    %233 = vector.extract_strided_slice %223 {offsets = [0, 32], sizes = [1, 32], strides = [1, 1]} : vector<1x96xf32> to vector<1x32xf32>
    %234 = arith.addf %232, %233 : vector<1x32xf32>
    %235 = arith.negf %234 : vector<1x32xf32>
    %236 = math.exp %235 : vector<1x32xf32>
    %cst_64 = arith.constant 1.000000e+00 : f32
    %237 = vector.broadcast %cst_64 : f32 to vector<1x32xf32>
    %238 = arith.addf %237, %236 : vector<1x32xf32>
    %239 = arith.divf %237, %238 : vector<1x32xf32>
    %240 = vector.extract_strided_slice %221 {offsets = [0, 64], sizes = [1, 32], strides = [1, 1]} : vector<1x96xf32> to vector<1x32xf32>
    %241 = vector.extract_strided_slice %223 {offsets = [0, 64], sizes = [1, 32], strides = [1, 1]} : vector<1x96xf32> to vector<1x32xf32>
    %242 = arith.mulf %231, %241 : vector<1x32xf32>
    %243 = arith.addf %240, %242 : vector<1x32xf32>
    %244 = math.tanh %243 : vector<1x32xf32>
    %cst_65 = arith.constant 1.000000e+00 : f32
    %245 = vector.broadcast %cst_65 : f32 to vector<1x32xf32>
    %246 = arith.subf %245, %239 : vector<1x32xf32>
    %247 = arith.mulf %246, %244 : vector<1x32xf32>
    %248 = arith.mulf %239, %215 : vector<1x32xf32>
    %249 = arith.addf %247, %248 : vector<1x32xf32>
    %c0_66 = arith.constant 0 : index
    %250 = arith.index_cast %c6_i32 : i32 to index
    %c0_67 = arith.constant 0 : index
    %251 = vector.load %arg10[%c0_66, %250, %c0_67] : memref<1x8x32xf32, #tpu.memory_space<vmem>>, vector<1x1x32xf32>
    %252 = vector.shape_cast %251 : vector<1x1x32xf32> to vector<1x32xf32>
    %253 = vector.shape_cast %249 : vector<1x32xf32> to vector<1x1x32xf32>
    tpu.vector_store %arg10[%c0_66, %250, %c0_67], %253 {strides = array<i32>} : memref<1x8x32xf32, #tpu.memory_space<vmem>>, vector<1x1x32xf32>,
    %c7_i32 = arith.constant 7 : i32
    %254 = arith.index_cast %c7_i32 : i32 to index
    %c0_68 = arith.constant 0 : index
    %255 = vector.load %arg12[%254, %c0_68] : memref<8x96xf32, #tpu.memory_space<vmem>>, vector<1x96xf32>
    %cst_69 = arith.constant dense<0.000000e+00> : vector<1x96xf32>
    %256 = tpu.matmul %249, %13, %cst_69 {dimension_numbers = #tpu.dot_dimension_numbers<[1], [0], [0], [1], [0, 0, 1, 1], [], []>, precision = #tpu.contract_precision<fp32>} : vector<1x32xf32>, vector<32x96xf32>, vector<1x96xf32> -> vector<1x96xf32>
    %257 = arith.addf %256, %14 : vector<1x96xf32>
    %258 = vector.extract_strided_slice %255 {offsets = [0, 0], sizes = [1, 32], strides = [1, 1]} : vector<1x96xf32> to vector<1x32xf32>
    %259 = vector.extract_strided_slice %257 {offsets = [0, 0], sizes = [1, 32], strides = [1, 1]} : vector<1x96xf32> to vector<1x32xf32>
    %260 = arith.addf %258, %259 : vector<1x32xf32>
    %261 = arith.negf %260 : vector<1x32xf32>
    %262 = math.exp %261 : vector<1x32xf32>
    %cst_70 = arith.constant 1.000000e+00 : f32
    %263 = vector.broadcast %cst_70 : f32 to vector<1x32xf32>
    %264 = arith.addf %263, %262 : vector<1x32xf32>
    %265 = arith.divf %263, %264 : vector<1x32xf32>
    %266 = vector.extract_strided_slice %255 {offsets = [0, 32], sizes = [1, 32], strides = [1, 1]} : vector<1x96xf32> to vector<1x32xf32>
    %267 = vector.extract_strided_slice %257 {offsets = [0, 32], sizes = [1, 32], strides = [1, 1]} : vector<1x96xf32> to vector<1x32xf32>
    %268 = arith.addf %266, %267 : vector<1x32xf32>
    %269 = arith.negf %268 : vector<1x32xf32>
    %270 = math.exp %269 : vector<1x32xf32>
    %cst_71 = arith.constant 1.000000e+00 : f32
    %271 = vector.broadcast %cst_71 : f32 to vector<1x32xf32>
    %272 = arith.addf %271, %270 : vector<1x32xf32>
    %273 = arith.divf %271, %272 : vector<1x32xf32>
    %274 = vector.extract_strided_slice %255 {offsets = [0, 64], sizes = [1, 32], strides = [1, 1]} : vector<1x96xf32> to vector<1x32xf32>
    %275 = vector.extract_strided_slice %257 {offsets = [0, 64], sizes = [1, 32], strides = [1, 1]} : vector<1x96xf32> to vector<1x32xf32>
    %276 = arith.mulf %265, %275 : vector<1x32xf32>
    %277 = arith.addf %274, %276 : vector<1x32xf32>
    %278 = math.tanh %277 : vector<1x32xf32>
    %cst_72 = arith.constant 1.000000e+00 : f32
    %279 = vector.broadcast %cst_72 : f32 to vector<1x32xf32>
    %280 = arith.subf %279, %273 : vector<1x32xf32>
    %281 = arith.mulf %280, %278 : vector<1x32xf32>
    %282 = arith.mulf %273, %249 : vector<1x32xf32>
    %283 = arith.addf %281, %282 : vector<1x32xf32>
    %c0_73 = arith.constant 0 : index
    %284 = arith.index_cast %c7_i32 : i32 to index
    %c0_74 = arith.constant 0 : index
    %285 = vector.load %arg10[%c0_73, %284, %c0_74] : memref<1x8x32xf32, #tpu.memory_space<vmem>>, vector<1x1x32xf32>
    %286 = vector.shape_cast %285 : vector<1x1x32xf32> to vector<1x32xf32>
    %287 = vector.shape_cast %283 : vector<1x32xf32> to vector<1x1x32xf32>
    tpu.vector_store %arg10[%c0_73, %284, %c0_74], %287 {strides = array<i32>} : memref<1x8x32xf32, #tpu.memory_space<vmem>>, vector<1x1x32xf32>,
    %c8_i32 = arith.constant 8 : i32
    %c0_75 = arith.constant 0 : index
    %c0_76 = arith.constant 0 : index
    %c0_77 = arith.constant 0 : index
    %288 = vector.load %arg10[%c0_75, %c0_76, %c0_77] : memref<1x8x32xf32, #tpu.memory_space<vmem>>, vector<1x8x32xf32>
    %289 = vector.shape_cast %288 : vector<1x8x32xf32> to vector<8x32xf32>
    %c0_78 = arith.constant 0 : index
    %c0_79 = arith.constant 0 : index
    %290 = vector.load %arg8[%c0_78, %c0_79] : memref<32x128xf32, #tpu.memory_space<vmem>>, vector<32x128xf32>
    %cst_80 = arith.constant dense<0.000000e+00> : vector<8x128xf32>
    %291 = tpu.matmul %289, %290, %cst_80 {dimension_numbers = #tpu.dot_dimension_numbers<[1], [0], [0], [1], [0, 0, 1, 1], [], []>, precision = #tpu.contract_precision<fp32>} : vector<8x32xf32>, vector<32x128xf32>, vector<8x128xf32> -> vector<8x128xf32>
    %c0_81 = arith.constant 0 : index
    %c0_82 = arith.constant 0 : index
    %292 = vector.load %arg9[%c0_81, %c0_82] : memref<1x128xf32, #tpu.memory_space<vmem>>, vector<1x128xf32>
    %293 = vector.broadcast %292 : vector<1x128xf32> to vector<8x128xf32>
    %294 = arith.addf %291, %293 : vector<8x128xf32>
    %295 = arith.negf %294 : vector<8x128xf32>
    %296 = math.exp %295 : vector<8x128xf32>
    %cst_83 = arith.constant 1.000000e+00 : f32
    %297 = vector.broadcast %cst_83 : f32 to vector<8x128xf32>
    %298 = arith.addf %297, %296 : vector<8x128xf32>
    %299 = arith.divf %297, %298 : vector<8x128xf32>
    %cst_84 = arith.constant 5.000000e+01 : f32
    %300 = vector.broadcast %cst_84 : f32 to vector<8x128xf32>
    %301 = arith.mulf %299, %300 : vector<8x128xf32>
    %cst_85 = arith.constant -1.500000e+01 : f32
    %302 = vector.broadcast %cst_85 : f32 to vector<8x128xf32>
    %303 = arith.addf %301, %302 : vector<8x128xf32>
    %c0_86 = arith.constant 0 : index
    %c0_87 = arith.constant 0 : index
    %c0_88 = arith.constant 0 : index
    %304 = vector.load %arg11[%c0_86, %c0_87, %c0_88] : memref<1x8x128xf32, #tpu.memory_space<vmem>>, vector<1x8x128xf32>
    %305 = vector.shape_cast %304 : vector<1x8x128xf32> to vector<8x128xf32>
    %306 = vector.shape_cast %303 : vector<8x128xf32> to vector<1x8x128xf32>
    tpu.vector_store %arg11[%c0_86, %c0_87, %c0_88], %306 {strides = array<i32>} : memref<1x8x128xf32, #tpu.memory_space<vmem>>, vector<1x8x128xf32>,
    return
  }
  func.func @transform_0(%arg0: i32) -> (i32, i32, i32) {
    %c0_i32 = arith.constant 0 : i32
    %c0_i32_0 = arith.constant 0 : i32
    %c0_i32_1 = arith.constant 0 : i32
    return %arg0, %c0_i32, %c0_i32_0 : i32, i32, i32
  }
  func.func @transform_1(%arg0: i32) -> (i32, i32, i32) {
    %c0_i32 = arith.constant 0 : i32
    %c0_i32_0 = arith.constant 0 : i32
    %c0_i32_1 = arith.constant 0 : i32
    return %arg0, %c0_i32, %c0_i32_0 : i32, i32, i32
  }
  func.func @transform_2(%arg0: i32) -> (i32, i32) {
    %c0_i32 = arith.constant 0 : i32
    %c0_i32_0 = arith.constant 0 : i32
    %c0_i32_1 = arith.constant 0 : i32
    return %c0_i32, %c0_i32_0 : i32, i32
  }
  func.func @transform_3(%arg0: i32) -> (i32, i32) {
    %c0_i32 = arith.constant 0 : i32
    %c0_i32_0 = arith.constant 0 : i32
    %c0_i32_1 = arith.constant 0 : i32
    return %c0_i32, %c0_i32_0 : i32, i32
  }
  func.func @transform_4(%arg0: i32) -> (i32, i32) {
    %c0_i32 = arith.constant 0 : i32
    %c0_i32_0 = arith.constant 0 : i32
    %c0_i32_1 = arith.constant 0 : i32
    return %c0_i32, %c0_i32_0 : i32, i32
  }
  func.func @transform_5(%arg0: i32) -> (i32, i32) {
    %c0_i32 = arith.constant 0 : i32
    %c0_i32_0 = arith.constant 0 : i32
    %c0_i32_1 = arith.constant 0 : i32
    return %c0_i32, %c0_i32_0 : i32, i32
  }
  func.func @transform_6(%arg0: i32) -> (i32, i32) {
    %c0_i32 = arith.constant 0 : i32
    %c0_i32_0 = arith.constant 0 : i32
    %c0_i32_1 = arith.constant 0 : i32
    return %c0_i32, %c0_i32_0 : i32, i32
  }
  func.func @transform_7(%arg0: i32) -> (i32, i32) {
    %c0_i32 = arith.constant 0 : i32
    %c0_i32_0 = arith.constant 0 : i32
    %c0_i32_1 = arith.constant 0 : i32
    return %c0_i32, %c0_i32_0 : i32, i32
  }
  func.func @transform_8(%arg0: i32) -> (i32, i32) {
    %c0_i32 = arith.constant 0 : i32
    %c0_i32_0 = arith.constant 0 : i32
    %c0_i32_1 = arith.constant 0 : i32
    return %c0_i32, %c0_i32_0 : i32, i32
  }
  func.func @transform_9(%arg0: i32) -> (i32, i32, i32) {
    %c0_i32 = arith.constant 0 : i32
    %c0_i32_0 = arith.constant 0 : i32
    %c0_i32_1 = arith.constant 0 : i32
    return %arg0, %c0_i32, %c0_i32_0 : i32, i32, i32
  }
  func.func @transform_10(%arg0: i32) -> (i32, i32, i32) {
    %c0_i32 = arith.constant 0 : i32
    %c0_i32_0 = arith.constant 0 : i32
    %c0_i32_1 = arith.constant 0 : i32
    return %arg0, %c0_i32, %c0_i32_0 : i32, i32, i32
  }
}

</mosaic_0001>

<bundles_post_ra>
// kernel: encoder_forward.3
= control target key start
LH: loop header
LB: loop body
LE: loop exit
PB: predicated region body
PF: predicated region fallthrough
CT: control target
= control target key end

     0   :  { %s5460_s0 = inlined_call_operand.vmem [shape: f32[2,8,48], index: 0, kind: input, shape index: {}]   ;;  %s5461_s1 = inlined_call_operand.hbm [shape: f32[48,128], index: 1, kind: input, shape index: {}]   ;;  %s5462_s2 = inlined_call_operand.hbm [shape: f32[1,128], index: 2, kind: input, shape index: {}]   ;;  %s5463_s3 = inlined_call_operand.hbm [shape: f32[1,128], index: 3, kind: input, shape index: {}]   ;;  %s5464_s4 = inlined_call_operand.vmem [shape: f32[128,64], index: 4, kind: input, shape index: {}]   ;;  %s5465_s5 = inlined_call_operand.hbm [shape: f32[1,64], index: 5, kind: input, shape index: {}]   ;;  %s5466_s6 = inlined_call_operand.hbm [shape: f32[1,64], index: 6, kind: input, shape index: {}]   ;;  %s5467_s7 = inlined_call_operand.vmem [shape: f32[64,32], index: 7, kind: input, shape index: {}]   ;;  %s5468_s8 = inlined_call_operand.hbm [shape: f32[1,32], index: 8, kind: input, shape index: {}]   ;;  %s5469_s9 = inlined_call_operand.hbm [shape: f32[1,32], index: 9, kind: input, shape index: {}]   ;;  %s5470_s10 = inlined_call_operand.vmem [shape: f32[32,32], index: 10, kind: input, shape index: {}]   ;;  %s5471_s11 = inlined_call_operand.vmem [shape: f32[1,32], index: 11, kind: input, shape index: {}]   ;;  %s5472_s12 = inlined_call_operand.vmem [shape: f32[1,32], index: 12, kind: input, shape index: {}]   ;;  %s5473_s13 = inlined_call_operand.vmem [shape: f32[2,8,128], index: 13, kind: output, shape index: {0}]   ;;  %s5474_s14 = inlined_call_operand.vmem [shape: f32[2,8,64], index: 14, kind: output, shape index: {1}]   ;;  %s5475_s15 = inlined_call_operand.vmem [shape: f32[2,8,32], index: 15, kind: output, shape index: {2}]   ;;  %s5476_s16 = inlined_call_operand.vmem [shape: f32[2,8,32], index: 16, kind: output, shape index: {3}]  }
   0x1   :  { %5488 = sst [smem:[#allocation18_spill]] %s5460_s0 }
   0x2   :  { %5489 = sst [smem:[#allocation19_spill]] %s5462_s2 }
   0x3   :  { %5490 = sst [smem:[#allocation20_spill]] %s5465_s5 }
   0x4   :  { %5491 = sst [smem:[#allocation21_spill]] %s5468_s8 }
   0x5   :  { %5492 = sst [smem:[#allocation22_spill]] %s5472_s12 }
   0x6   :  { %5493 = sst [smem:[#allocation23_spill]] %s5476_s16 }
   0x7   :  { %22 = vsyncpa [#allocation3], 0 }
   0x8   :  { %23 = vsyncpa [#allocation5], 0 }
   0x9   :  { %24 = vsyncpa [#allocation8], 0 }
   0xa   :  { %25 = vsyncpa [#allocation11], 0  ;;  %s4634_s21 = smov 0  }
   0xb LB: > { %5494 = sst [smem:[#allocation17_spill]] %s4535_s21  ;;  %s4537_s22 = smov [#allocation4]   ;;  %s4535_s21 = sphi %s4634_s21, %s31_s21  }
   0xc   : > { %s444_s23 = sshll.u32 %s4537_s22, 4  ;;  %s4640_s24 = sadd.s32 4294967295, %s4535_s21   ;;  %s4645_s23 = int_to_ptr.vmem [resolvable:$true] %s444_s23 }
   0xd   : > { %p3148_p0 = scmp.ge.s32.totalorder %s4535_s21, 1  ;;  %p418_p1 = scmp.lt.s32.totalorder %s4535_s21, 3 }
   0xe   : > { %p5478_p2 = scmp.eq.s32.totalorder %s4640_s24, 0  ;;  %s4538_s26 = smov [#allocation7]  }
   0xf   : > { %p4647_p3 = pnand %p3148_p0, %p418_p1  ;;  %s469_s27 = sshll.u32 %s4538_s26, 4  ;;  %s4653_s27 = int_to_ptr.vmem [resolvable:$true] %s469_s27 }
  0x10   : > { %s4539_s28 = smov [#allocation10]   ;;  %s4540_s0 = smov [#allocation2]  }
  0x11   : > { %s5495_s25 = scalar_select %p4647_p3, 1, 0 }
  0x12   : > { %p4261_p4 = pneg %p4647_p3  ;;  %s494_s29 = sshll.u32 %s4539_s28, 4  ;;  %s4661_s29 = int_to_ptr.vmem [resolvable:$true] %s494_s29 }
  0x13   : > { %s430_s17 = sshll.u32 %s4540_s0, 4  ;;  %s5497_s2 = sld [smem:[#allocation19_spill]]  ;;  %s4663_s17 = int_to_ptr.vmem [resolvable:$true] %s430_s17 }
  0x14   : > { %p4657_p5 = pnand %p5478_p2, %p4261_p4 }
  0x16   : > { %p4673_p7 = pneg %p4657_p5 }
  0x19   : > { %s4317_s20 = scalar_lea.hbm %s5497_s2, 16 }
  0x1a   : > { %p4318_p6 = scmp.ne.s32.totalorder %s5497_s2, %s4317_s20  ;;  %p4324_p10 = scmp.lt.u32.totalorder %s4317_s20, %s5497_s2 }
  0x1c   : > { %p4320_p8 = pnand %p4673_p7, %p4318_p6 }
  0x1e   : > { %p4321_p9 = pneg %p4320_p8 }
  0x20   : > { %p4326_p11 = pnand %p4324_p10, %p4321_p9 }
  0x22   : > { %4329 = shalt.err (!%p4326_p11)
}
  0x23   : > { %s4330_s18 = scalar_lea.vmem %s4645_s23, 16  ;;  %s4337_s19 = scalar_lea.vmem %s4645_s23, 32 }
  0x24   : > { %p4331_p12 = scmp.ne.s32.totalorder %s4645_s23, %s4330_s18  ;;  %p4338_p1 = scmp.lt.s32.totalorder %s4645_s23, %s4645_s23 }
  0x25   : > { %p4339_p4 = scmp.lt.s32.totalorder %s4337_s19, %s4330_s18 }
  0x26   : > { %p4333_p13 = pnand %p4331_p12, %p4673_p7 }
  0x27   : > { %p4340_p6 = por %p4339_p4, %p4338_p1 }
  0x28   : > { %p4334_p0 = pneg %p4333_p13 }
  0x2a   : > { %p4341_p8 = pnand %p4340_p6, %p4334_p0 }
  0x2c   : > { %4344 = shalt.err (!%p4341_p8)
}
  0x2d   : > { %4267 = dma.hbm_to_vmem [thread:$0]  (!%p4657_p5), %s5497_s2, 16, %s4645_s23, [#allocation5]  }
  0x2e   : > { %s5499_s5 = sld [smem:[#allocation20_spill]] }
  0x34   : > { %s4345_s0 = scalar_lea.hbm %s5499_s5, 16 }
  0x35   : > { %p4346_p9 = scmp.ne.s32.totalorder %s5499_s5, %s4345_s0  ;;  %p4352_p12 = scmp.lt.u32.totalorder %s4345_s0, %s5499_s5 }
  0x37   : > { %p4348_p10 = pnand %p4346_p9, %p4673_p7 }
  0x39   : > { %p4349_p11 = pneg %p4348_p10 }
  0x3b   : > { %p4354_p13 = pnand %p4352_p12, %p4349_p11 }
  0x3d   : > { %4357 = shalt.err (!%p4354_p13)
}
  0x3e   : > { %s4358_s23 = scalar_lea.vmem %s4653_s27, 16  ;;  %s4365_s12 = scalar_lea.vmem %s4653_s27, 32 }
  0x3f   : > { %p4359_p0 = scmp.ne.s32.totalorder %s4653_s27, %s4358_s23  ;;  %p4366_p6 = scmp.lt.s32.totalorder %s4653_s27, %s4653_s27 }
  0x40   : > { %p4367_p8 = scmp.lt.s32.totalorder %s4365_s12, %s4358_s23 }
  0x41   : > { %p4361_p1 = pnand %p4359_p0, %p4673_p7 }
  0x42   : > { %p4368_p9 = por %p4367_p8, %p4366_p6 }
  0x43   : > { %p4362_p4 = pneg %p4361_p1 }
  0x45   : > { %p4369_p10 = pnand %p4368_p9, %p4362_p4 }
  0x47   : > { %4372 = shalt.err (!%p4369_p10)
}
  0x48   : > { %4273 = dma.hbm_to_vmem [thread:$0]  (!%p4657_p5), %s5499_s5, 16, %s4653_s27, [#allocation8]  }
  0x49   : > { %s5500_s8 = sld [smem:[#allocation21_spill]] }
  0x4f   : > { %s4373_s26 = scalar_lea.hbm %s5500_s8, 16 }
  0x50   : > { %p4374_p11 = scmp.ne.s32.totalorder %s5500_s8, %s4373_s26  ;;  %p4380_p0 = scmp.lt.u32.totalorder %s4373_s26, %s5500_s8 }
  0x52   : > { %p4376_p12 = pnand %p4374_p11, %p4673_p7 }
  0x54   : > { %p4377_p13 = pneg %p4376_p12 }
  0x56   : > { %p4382_p1 = pnand %p4380_p0, %p4377_p13 }
  0x58   : > { %4385 = shalt.err (!%p4382_p1)
}
  0x59   : > { %s4386_s27 = scalar_lea.vmem %s4661_s29, 16  ;;  %s4393_s12 = scalar_lea.vmem %s4661_s29, 32 }
  0x5a   : > { %p4387_p4 = scmp.ne.s32.totalorder %s4661_s29, %s4386_s27  ;;  %p4394_p9 = scmp.lt.s32.totalorder %s4661_s29, %s4661_s29 }
  0x5b   : > { %p4395_p10 = scmp.lt.s32.totalorder %s4393_s12, %s4386_s27 }
  0x5c   : > { %p4389_p6 = pnand %p4387_p4, %p4673_p7 }
  0x5d   : > { %p4396_p11 = por %p4395_p10, %p4394_p9 }
  0x5e   : > { %p4390_p8 = pneg %p4389_p6 }
  0x60   : > { %p4397_p12 = pnand %p4396_p11, %p4390_p8 }
  0x62   : > { %4400 = shalt.err (!%p4397_p12)
}
  0x63   : > { %4279 = dma.hbm_to_vmem [thread:$0]  (!%p4657_p5), %s5500_s8, 16, %s4661_s29, [#allocation11]  }
  0x64   : > { %s4401_s26 = scalar_lea.hbm %s5461_s1, 768 }
  0x65   : > { %p4402_p13 = scmp.ne.s32.totalorder %s5461_s1, %s4401_s26  ;;  %p4408_p4 = scmp.lt.u32.totalorder %s4401_s26, %s5461_s1 }
  0x67   : > { %p4404_p0 = pnand %p4402_p13, %p4673_p7 }
  0x69   : > { %p4405_p1 = pneg %p4404_p0 }
  0x6b   : > { %p4410_p6 = pnand %p4408_p4, %p4405_p1 }
  0x6d   : > { %4413 = shalt.err (!%p4410_p6)
}
  0x6e   : > { %s4414_s29 = scalar_lea.vmem %s4663_s17, 768  ;;  %p4422_p11 = scmp.lt.s32.totalorder %s4663_s17, %s4663_s17 }
  0x6f   : > { %p4415_p8 = scmp.ne.s32.totalorder %s4663_s17, %s4414_s29  ;;  %p4423_p12 = scmp.lt.s32.totalorder %s4414_s29, %s4414_s29 }
  0x71   : > { %p4417_p9 = pnand %p4415_p8, %p4673_p7  ;;  %p4424_p13 = por %p4423_p12, %p4422_p11 }
  0x73   : > { %p4418_p10 = pneg %p4417_p9 }
  0x75   : > { %p4425_p0 = pnand %p4424_p13, %p4418_p10 }
  0x77   : > { %4428 = shalt.err (!%p4425_p0)
}
  0x78   : > { %s4541_s27 = smov 128   ;;  %s4542_s12 = smov 8  }
  0x79   : > { %4264 = dma.hbm_to_vmem [thread:$0]  (!%p4657_p5), %s5461_s1, 768, %s4663_s17, [#allocation3], %s4541_s27, %s4541_s27, %s4542_s12  }
  0x7a   : > { %s4543_s20 = smov [#allocation6]   ;;  %s4544_s26 = smov [#allocation9]  }
  0x7b   : > { %s455_s22 = sshll.u32 %s4543_s20, 4  ;;  %s480_s0 = sshll.u32 %s4544_s26, 4  ;;  %s456_s22 = int_to_ptr.vmem [resolvable:$true] %s455_s22  ;;  %s481_s0 = int_to_ptr.vmem [resolvable:$true] %s480_s0 }
  0x7c   : > { %s4429_s23 = scalar_lea.hbm %s5463_s3, 16 }
  0x7d   : > { %p4430_p1 = scmp.ne.s32.totalorder %s5463_s3, %s4429_s23  ;;  %p4436_p8 = scmp.lt.u32.totalorder %s4429_s23, %s5463_s3 }
  0x7f   : > { %p4432_p4 = pnand %p4430_p1, %p4673_p7 }
  0x81   : > { %p4433_p6 = pneg %p4432_p4 }
  0x83   : > { %p4438_p9 = pnand %p4436_p8, %p4433_p6 }
  0x85   : > { %4441 = shalt.err (!%p4438_p9)
}
  0x86   : > { %s4442_s17 = scalar_lea.vmem %s456_s22, 16  ;;  %s4449_s27 = scalar_lea.vmem %s456_s22, 32 }
  0x87   : > { %p4443_p10 = scmp.ne.s32.totalorder %s456_s22, %s4442_s17  ;;  %p4450_p13 = scmp.lt.s32.totalorder %s456_s22, %s456_s22 }
  0x88   : > { %p4451_p0 = scmp.lt.s32.totalorder %s4449_s27, %s4442_s17 }
  0x89   : > { %p4445_p11 = pnand %p4443_p10, %p4673_p7 }
  0x8a   : > { %p4452_p2 = por %p4451_p0, %p4450_p13 }
  0x8b   : > { %p4446_p12 = pneg %p4445_p11 }
  0x8d   : > { %p4453_p3 = pnand %p4452_p2, %p4446_p12 }
  0x8f   : > { %4456 = shalt.err (!%p4453_p3)
}
  0x90   : > { %4270 = dma.hbm_to_vmem [thread:$0]  (!%p4657_p5), %s5463_s3, 16, %s456_s22, [#allocation5]  }
  0x91   : > { %s4457_s16 = scalar_lea.hbm %s5466_s6, 16 }
  0x92   : > { %p4458_p1 = scmp.ne.s32.totalorder %s5466_s6, %s4457_s16  ;;  %p4464_p3 = scmp.lt.u32.totalorder %s4457_s16, %s5466_s6 }
  0x94   : > { %p4460_p4 = pnand %p4458_p1, %p4673_p7 }
  0x96   : > { %p4461_p2 = pneg %p4460_p4 }
  0x98   : > { %p4466_p6 = pnand %p4464_p3, %p4461_p2 }
  0x9a   : > { %4469 = shalt.err (!%p4466_p6)
}
  0x9b   : > { %s4470_s19 = scalar_lea.vmem %s481_s0, 16  ;;  %s4477_s22 = scalar_lea.vmem %s481_s0, 32 }
  0x9c   : > { %p4471_p8 = scmp.ne.s32.totalorder %s481_s0, %s4470_s19  ;;  %p4478_p11 = scmp.lt.s32.totalorder %s481_s0, %s481_s0 }
  0x9d   : > { %p4479_p12 = scmp.lt.s32.totalorder %s4477_s22, %s4470_s19 }
  0x9e   : > { %p4473_p9 = pnand %p4471_p8, %p4673_p7 }
  0x9f   : > { %p4480_p13 = por %p4479_p12, %p4478_p11 }
  0xa0   : > { %p4474_p10 = pneg %p4473_p9 }
  0xa2   : > { %p4481_p0 = pnand %p4480_p13, %p4474_p10 }
  0xa4   : > { %4484 = shalt.err (!%p4481_p0)
}
  0xa5   : > { %4276 = dma.hbm_to_vmem [thread:$0]  (!%p4657_p5), %s5466_s6, 16, %s481_s0, [#allocation8]  }
  0xa6   : > { %s4545_s17 = smov [#allocation12]   ;;  %s4485_s5 = scalar_lea.hbm %s5469_s9, 16 }
  0xa7   : > { %s505_s27 = sshll.u32 %s4545_s17, 4  ;;  %p4486_p1 = scmp.ne.s32.totalorder %s5469_s9, %s4485_s5  ;;  %s506_s27 = int_to_ptr.vmem [resolvable:$true] %s505_s27 }
  0xa8   : > { %p4492_p3 = scmp.lt.u32.totalorder %s4485_s5, %s5469_s9 }
  0xa9   : > { %p4488_p4 = pnand %p4486_p1, %p4673_p7 }
  0xab   : > { %p4489_p2 = pneg %p4488_p4 }
  0xad   : > { %p4494_p6 = pnand %p4492_p3, %p4489_p2 }
  0xaf   : > { %4497 = shalt.err (!%p4494_p6)
}
  0xb0   : > { %s4498_s0 = scalar_lea.vmem %s506_s27, 16  ;;  %s4505_s26 = scalar_lea.vmem %s506_s27, 32 }
  0xb1   : > { %p4499_p8 = scmp.ne.s32.totalorder %s506_s27, %s4498_s0  ;;  %p4506_p11 = scmp.lt.s32.totalorder %s506_s27, %s506_s27 }
  0xb2   : > { %p4507_p12 = scmp.lt.s32.totalorder %s4505_s26, %s4498_s0 }
  0xb3   : > { %p4501_p9 = pnand %p4499_p8, %p4673_p7 }
  0xb4   : > { %p4508_p13 = por %p4507_p12, %p4506_p11 }
  0xb5   : > { %p4502_p10 = pneg %p4501_p9 }
  0xb7   : > { %p4509_p0 = pnand %p4508_p13, %p4502_p10 }
  0xb9   : > { %4512 = shalt.err (!%p4509_p0)
}
  0xba   : > { %4282 = dma.hbm_to_vmem [thread:$0]  (!%p4657_p5), %s5469_s9, 16, %s506_s27, [#allocation11]  }
  0xbb   : > { %p5501_p1 = scmp.ne.s32.totalorder %s5495_s25, 0 }
  0xbc   : > { %p5502_p4 = scmp.eq.s32.totalorder (!%p5501_p1), %s4640_s24, 0 }
  0xbd   : > { %534 = sbr.rel (%p5501_p1) target bundleno = 1466 (0x5ba), region = 72 }
  0xc4   : > { %4518 = dma.done.wait (%p5502_p4), [#allocation3], 768   ;;  %p5503_p7 = pmov %p5502_p4 }
  0xc5   : > { %p5504_p2 = pmov %p5502_p4 }
  0xc6   : > { %4520 = vsyncadd (%p5503_p7), [#allocation3], 4294966528 }
  0xc7   : > { %4522 = dma.done.wait (%p5504_p2), [#allocation5], 32   ;;  %p5505_p3 = pmov %p5504_p2 }
  0xc8   : > { %p5506_p6 = pmov %p5504_p2 }
  0xc9   : > { %4524 = vsyncadd (%p5505_p3), [#allocation5], 4294967264 }
  0xca   : > { %4526 = dma.done.wait (%p5506_p6), [#allocation8], 32   ;;  %p5507_p5 = pmov %p5504_p2 }
  0xcb   : > { %p5508_p8 = pmov %p5504_p2 }
  0xcc   : > { %4528 = vsyncadd (%p5507_p5), [#allocation8], 4294967264 }
  0xcd   : > { %4530 = dma.done.wait (%p5508_p8), [#allocation11], 32   ;;  %p5509_p9 = pmov %p5504_p2 }
  0xce   : > { %p618_p10 = scmp.lt.s32.totalorder %s4640_s24, 1  ;;  %v4546_v0 = vmov 0.0|0.0   ;;  %vm4547_vm0 = vmmov 0   ;;  %v4548_v1 = vmov 0.0   ;;  %s5510_s22 = sld [smem:[#allocation18_spill]]  ;;  %v639_v2 = vld [vmem:[#allocation2] sm:$0xff] }
  0xcf   : > { %4532 = vsyncadd (%p5509_p9), [#allocation11], 4294967264  ;;  %3897 = vmatprep.subr.bf16.mxu0 %v4546_v0  ;;  %3435 = vmatprep.mubr.msk.f32.mxu0 %vm4547_vm0, %v4548_v1  ;;  %v640_v3 = vld [vmem:[#allocation2 + $0x8] sm:$0xff]  ;;  %v641_v4 = vld [vmem:[#allocation2 + $0x10] sm:$0xff]  ;;  %v650_v5 = vand.u32 4294901760, %v639_v2  ;;  %vm645_vm1 = vcmask 392192  }
  0xd0   : > { %s5523_s24 = smov (!%p618_p10, %s4640_s24), 1  ;;  %3888 = vmatprep.subr.bf16.mxu1 %v4546_v0  ;;  %3420 = vmatprep.mubr.msk.f32.mxu1 %vm4547_vm0, %v4548_v1  ;;  %v653_v6 = vand.u32 4294901760, %v640_v3  ;;  %v642_v7 = vld [vmem:[#allocation2 + $0x18] sm:$0xff]  ;;  %v656_v8 = vand.u32 4294901760, %v641_v4  ;;  %v4852_v9 = vld [vmem:[#allocation2 + $0x20] sm:$0xff]  ;;  %v4854_v10 = vld [vmem:[#allocation2 + $0x28] sm:$0xff] }
  0xd1   : > { %s4846_s25 = sshll.u32 %s5523_s24, 3  ;;  %v659_v11 = vand.u32 4294901760, %v642_v7  ;;  %v662_v12 = vand.u32 4294901760, %v4852_v9  ;;  %v665_v13 = vand.u32 4294901760, %v4854_v10  ;;  %v4858_v15 = vsub.f32 %v639_v2, %v650_v5  ;;  %v1178_v41 = vld [vmem:[%s5464_s4] sm:$0xff]  ;;  %v1179_v42 = vld [vmem:[%s5464_s4 + $0x8] sm:$0xff] }
  0xd2   : > { %v4860_v16 = vsub.f32 %v640_v3, %v653_v6  ;;  %v4862_v17 = vsub.f32 %v641_v4, %v656_v8  ;;  %v4898_v38 = vpack.c.bf16 %v653_v6, %v650_v5  ;;  %v1180_v44 = vld [vmem:[%s5464_s4 + $0x10] sm:$0xff]  ;;  %v1181_v45 = vld [vmem:[%s5464_s4 + $0x18] sm:$0xff]  ;;  %v1182_v49 = vld [vmem:[%s5464_s4 + $0x20] sm:$0xff]  ;;  %v1195_v53 = vand.u32 4294901760, %v1178_v41  ;;  %s625_s30 = scalar_lea.vmem %s5473_s13, %s4846_s25  ;;  %s633_s8 = scalar_lea.vmem %s5475_s15, %s4846_s25 }
  0xd3   : > { %v4864_v18 = vsub.f32 %v642_v7, %v659_v11  ;;  %v4867_v19 = vsub.f32 %v4852_v9, %v662_v12  ;;  %v4870_v20 = vsub.f32 %v4854_v10, %v665_v13  ;;  %v733_v21 = vand.u32 4294901760, %v4858_v15  ;;  %v1183_v50 = vld [vmem:[%s5464_s4 + $0x28] sm:$0xff]  ;;  %s5519_s26 = sld [smem:[#allocation22_spill]] }
  0xd4   : > { %s621_s23 = scalar_lea.vmem %s5510_s22, %s4846_s25  ;;  %v740_v22 = vand.u32 4294901760, %v4860_v16  ;;  %v747_v23 = vand.u32 4294901760, %v4862_v17  ;;  %3890 = vmatpush3.bf16.msra.mxu1 %v4898_v38  ;;  %v4924_v52 = vpack.c.bf16 %v659_v11, %v656_v8  ;;  %v1198_v54 = vand.u32 4294901760, %v1179_v42 }
  0xd5   : > { %v638_v14 = vld [vmem:[%s621_s23] sm:$0xff]  ;;  %v754_v25 = vand.u32 4294901760, %v4864_v18  ;;  %v761_v26 = vand.u32 4294901760, %v4867_v19  ;;  %v768_v27 = vand.u32 4294901760, %v4870_v20  ;;  %v734_v28 = vsub.f32 %v4858_v15, %v733_v21  ;;  %3891 = vmatprep.subr.bf16.mxu1 %v4546_v0 }
  0xd6   : > { %v647_v24 = vsel %vm645_vm1, %v638_v14, 0  ;;  %v741_v29 = vsub.f32 %v4860_v16, %v740_v22  ;;  %v748_v30 = vsub.f32 %v4862_v17, %v747_v23  ;;  %v1201_v56 = vand.u32 4294901760, %v1180_v44 }
  0xd7   : > { %v755_v31 = vsub.f32 %v4864_v18, %v754_v25  ;;  %v762_v32 = vsub.f32 %v4867_v19, %v761_v26  ;;  %v769_v33 = vsub.f32 %v4870_v20, %v768_v27  ;;  %v4896_v34 = vand.u32 4294901760, %v647_v24 }
  0xd8   : > { %v735_v35 = vand.u32 4294901760, %v734_v28  ;;  %v742_v36 = vand.u32 4294901760, %v741_v29  ;;  %v749_v37 = vand.u32 4294901760, %v748_v30  ;;  %v1204_v57 = vand.u32 4294901760, %v1181_v45  ;;  %3893 = vmatpush3.bf16.msra.mxu1 %v4924_v52  ;;  %v1188_v28 = vld [vmem:[%s5464_s4 + $0x50] sm:$0xff]  ;;  %v1189_v29 = vld [vmem:[%s5464_s4 + $0x58] sm:$0xff] }
  0xd9   : > { %v756_v39 = vand.u32 4294901760, %v755_v31  ;;  %v4901_v40 = vsub.f32 %v647_v24, %v4896_v34  ;;  %v763_v46 = vand.u32 4294901760, %v762_v32  ;;  %v770_v47 = vand.u32 4294901760, %v769_v33  ;;  %3894 = vmatprep.subr.bf16.mxu1 %v4546_v0  ;;  %v1187_v24 = vld [vmem:[%s5464_s4 + $0x48] sm:$0xff]  ;;  %v1190_v33 = vld [vmem:[%s5464_s4 + $0x60] sm:$0xff] }
  0xda   : > { %v3898_v43 = vpack.c.bf16 %v742_v36, %v735_v35  ;;  %v4929_v58 = vsub.f32 %v1178_v41, %v1195_v53  ;;  %v4931_v59 = vsub.f32 %v1179_v42, %v1198_v54  ;;  %v1207_v60 = vand.u32 4294901760, %v1182_v49 }
  0xdb   : > { %v722_v48 = vand.u32 4294901760, %v4901_v40  ;;  %v3901_v51 = vpack.c.bf16 %v756_v39, %v749_v37  ;;  %v1210_v61 = vand.u32 4294901760, %v1183_v50  ;;  %v4934_v62 = vsub.f32 %v1180_v44, %v1201_v56  ;;  %v1193_v39 = vld [vmem:[%s5464_s4 + $0x78] sm:$0xff] }
  0xdc   : > { %3899 = vmatpush3.bf16.msra.mxu0 %v3898_v43  ;;  %v4936_v63 = vsub.f32 %v1181_v45, %v1204_v57  ;;  %v3904_v2 = vpack.c.bf16 %v770_v47, %v763_v46  ;;  %v3895_v3 = vpack.c.bf16 %v665_v13, %v662_v12  ;;  %v4938_v4 = vsub.f32 %v1182_v49, %v1207_v60 }
  0xdd   : > { %3900 = vmatprep.subr.bf16.mxu0 %v4546_v0  ;;  %v723_v55 = vsub.f32 %v4901_v40, %v722_v48  ;;  %v4940_v5 = vsub.f32 %v1183_v50, %v1210_v61  ;;  %v4943_v7 = vpack.c.bf16 %v1198_v54, %v1195_v53  ;;  %v3907_v8 = vpack.c.bf16 %v4860_v16, %v4858_v15  ;;  %v1184_v16 = vld [vmem:[%s5464_s4 + $0x30] sm:$0xff] }
  0xde   : > { %3896 = vmatpush3.bf16.msra.mxu1 %v3895_v3  ;;  %v4950_v9 = vpack.c.bf16 %v1204_v57, %v1201_v56  ;;  %v3910_v10 = vpack.c.bf16 %v4864_v18, %v4862_v17  ;;  %v4962_v11 = vpack.c.bf16 %v1210_v61, %v1207_v60  ;;  %v3913_v12 = vpack.c.bf16 %v4870_v20, %v4867_v19  ;;  %v1185_v17 = vld [vmem:[%s5464_s4 + $0x38] sm:$0xff] }
  0xdf   : > { %v724_v6 = vand.u32 4294901760, %v723_v55  ;;  %3942 = vmatprep.subr.bf16.mxu1 %v4546_v0  ;;  %v3925_v13 = vpack.c.bf16 %v740_v22, %v733_v21  ;;  %v3928_v14 = vpack.c.bf16 %v754_v25, %v747_v23  ;;  %v3931_v15 = vpack.c.bf16 %v768_v27, %v761_v26  ;;  %v1186_v23 = vld [vmem:[%s5464_s4 + $0x40] sm:$0xff] }
  0xe0   : > { %3902 = vmatpush3.bf16.msra.mxu0 %v3901_v51  ;;  %v1213_v18 = vand.u32 4294901760, %v1184_v16  ;;  %v1216_v19 = vand.u32 4294901760, %v1185_v17  ;;  %v1219_v25 = vand.u32 4294901760, %v1186_v23  ;;  %v1222_v26 = vand.u32 4294901760, %v1187_v24 }
  0xe1   : > { %3903 = vmatprep.subr.bf16.mxu0 %v4546_v0  ;;  %3421 = vmatmul.mubr.f32.vlgmr.msra.gmra.mrb[0].mxu1 %v724_v6  ;;  %v1225_v30 = vand.u32 4294901760, %v1188_v28  ;;  %v1228_v31 = vand.u32 4294901760, %v1189_v29  ;;  %v1231_v35 = vand.u32 4294901760, %v1190_v33  ;;  %v1240_v47 = vand.u32 4294901760, %v1193_v39 }
  0xe2   : > { %3944 = vmatpush3.bf16.msra.mxu1 %v4943_v7  ;;  %3530 = vmatprep.mubr.msk.f32.mxu1 %vm4547_vm0, %v4548_v1  ;;  %v5013_v20 = vpack.c.bf16 %v1216_v19, %v1213_v18  ;;  %v5015_v21 = vsub.f32 %v1184_v16, %v1213_v18  ;;  %v5017_v22 = vsub.f32 %v1185_v17, %v1216_v19  ;;  %v1295_v49 = vand.u32 4294901760, %v4931_v59 }
  0xe3   : > { %3945 = vmatprep.subr.bf16.mxu1 %v4546_v0  ;;  %v5027_v27 = vpack.c.bf16 %v1222_v26, %v1219_v25  ;;  %v5037_v32 = vpack.c.bf16 %v1228_v31, %v1225_v30  ;;  %v5057_v41 = vsub.f32 %v1187_v24, %v1222_v26  ;;  %v5059_v42 = vsub.f32 %v1188_v28, %v1225_v30 }
  0xe4   : > { %3905 = vmatpush3.bf16.msra.mxu0 %v3904_v2  ;;  %v5061_v43 = vsub.f32 %v1189_v29, %v1228_v31  ;;  %v5064_v44 = vsub.f32 %v1190_v33, %v1231_v35  ;;  %v1296_v54 = vsub.f32 %v4931_v59, %v1295_v49  ;;  %v1302_v55 = vand.u32 4294901760, %v4934_v62 }
  0xe5   : > { %3906 = vmatprep.subr.bf16.mxu0 %v4546_v0  ;;  %v1309_v56 = vand.u32 4294901760, %v4936_v63  ;;  %v1330_v18 = vand.u32 4294901760, %v5015_v21  ;;  %v1337_v19 = vand.u32 4294901760, %v5017_v22  ;;  %v5486_v30 = vand.u32 4294901760, %v5057_v41 }
  0xe6   : > { %3947 = vmatpush3.bf16.msra.mxu1 %v4950_v9  ;;  %v1297_v60 = vand.u32 4294901760, %v1296_v54  ;;  %v1303_v61 = vsub.f32 %v4934_v62, %v1302_v55  ;;  %vm1852_vm2 = vcmask 523264   ;;  %vm2419_vm3 = vcmask 261120  }
  0xe7   : > { %3436 = vmatmul.mubr.f32.vlgmr.msra.gmra.mrb[0].mxu0 %v4896_v34  ;;  %3948 = vmatprep.subr.bf16.mxu1 %v4546_v0  ;;  %v1310_v2 = vsub.f32 %v4936_v63, %v1309_v56  ;;  %v1331_v24 = vsub.f32 %v5015_v21, %v1330_v18 }
  0xe8   : > { %3908 = vmatpush3.bf16.msra.mxu0 %v3907_v8  ;;  %3450 = vmatprep.mubr.msk.f32.mxu0 %vm4547_vm0, %v4548_v1  ;;  %v1304_v6 = vand.u32 4294901760, %v1303_v61 }
  0xe9   : > { %3909 = vmatprep.subr.bf16.mxu0 %v4546_v0  ;;  %v1311_v8 = vand.u32 4294901760, %v1310_v2  ;;  %v1332_v26 = vand.u32 4294901760, %v1331_v24 }
  0xea   : > { %3950 = vmatpush3.bf16.msra.mxu1 %v4962_v11 }
  0xeb   : > { %3951 = vmatprep.subr.bf16.mxu1 %v4546_v0 }
  0xec   : > { %3911 = vmatpush3.bf16.msra.mxu0 %v3910_v10  ;;  %v1316_v10 = vand.u32 4294901760, %v4938_v4 }
  0xed   : > { %3912 = vmatprep.subr.bf16.mxu0 %v4546_v0 }
  0xee   : > { %3953 = vmatpush3.bf16.msra.mxu1 %v5013_v20 }
  0xef   : > { %3954 = vmatprep.subr.bf16.mxu1 %v4546_v0 }
  0xf0   : > { %3914 = vmatpush3.bf16.msra.mxu0 %v3913_v12  ;;  %v1323_v12 = vand.u32 4294901760, %v4940_v5 }
  0xf1   : > { %3915 = vmatprep.subr.bf16.mxu0 %v4546_v0 }
  0xf2   : > { %3956 = vmatpush3.bf16.msra.mxu1 %v5027_v27 }
  0xf3   : > { %3451 = vmatmul.mubr.f32.vlgmr.msra.gmra.mrb[0].mxu0 %v4901_v40  ;;  %3957 = vmatprep.subr.bf16.mxu1 %v4546_v0  ;;  %v5055_v40 = vsub.f32 %v1186_v23, %v1219_v25  ;;  %v1338_v25 = vsub.f32 %v5017_v22, %v1337_v19 }
  0xf4   : > { %3917 = vmatpush3.bf16.msra.mxu0 %v4898_v38  ;;  %3465 = vmatprep.mubr.msk.f32.mxu0 %vm4547_vm0, %v4548_v1 }
  0xf5   : > { %3918 = vmatprep.subr.bf16.mxu0 %v4546_v0  ;;  %v1339_v28 = vand.u32 4294901760, %v1338_v25  ;;  %v5487_v29 = vand.u32 4294901760, %v5055_v40 }
  0xf6   : > { %3959 = vmatpush3.bf16.msra.mxu1 %v5037_v32 }
  0xf7   : > { %3960 = vmatprep.subr.bf16.mxu1 %v4546_v0  ;;  %v3976_v31 = vpack.c.bf16 %v1339_v28, %v1332_v26  ;;  %v1345_v33 = vsub.f32 %v5055_v40, %v5487_v29 }
  0xf8   : > { %3920 = vmatpush3.bf16.msra.mxu0 %v4924_v52 }
  0xf9   : > { %3921 = vmatprep.subr.bf16.mxu0 %v4546_v0 }
  0xfc   : > { %3923 = vmatpush3.bf16.msra.mxu0 %v3895_v3 }
  0xfd   : > { %3924 = vmatprep.subr.bf16.mxu0 %v4546_v0 }
  0xff   : > { %3466 = vmatmul.mubr.f32.vlgmr.msra.gmra.mrb[0].mxu0 %v722_v48  ;;  %v1288_v48 = vand.u32 4294901760, %v4929_v58 }
 0x100   : > { %3926 = vmatpush3.bf16.msra.mxu0 %v3925_v13  ;;  %3480 = vmatprep.mubr.msk.f32.mxu0 %vm4547_vm0, %v4548_v1  ;;  %v5097_v13 = vpack.c.bf16 %v1311_v8, %v1304_v6 }
 0x101   : > { %3927 = vmatprep.subr.bf16.mxu0 %v4546_v0  ;;  %v1289_v53 = vsub.f32 %v4929_v58, %v1288_v48 }
 0x103   : > { %v1290_v57 = vand.u32 4294901760, %v1289_v53 }
 0x104   : > { %3929 = vmatpush3.bf16.msra.mxu0 %v3928_v14  ;;  %v1317_v14 = vsub.f32 %v4938_v4, %v1316_v10 }
 0x105   : > { %3930 = vmatprep.subr.bf16.mxu0 %v4546_v0 }
 0x106   : > { %v1318_v16 = vand.u32 4294901760, %v1317_v14 }
 0x108   : > { %3932 = vmatpush3.bf16.msra.mxu0 %v3931_v15  ;;  %v1324_v15 = vsub.f32 %v4940_v5, %v1323_v12 }
 0x109   : > { %3933 = vmatprep.subr.bf16.mxu0 %v4546_v0 }
 0x10a   : > { %v1325_v17 = vand.u32 4294901760, %v1324_v15 }
 0x10b   : > { %3481 = vmatmul.mubr.f32.vlgmr.msra.gmra.mrb[0].mxu0 %v4896_v34 }
 0x10c   : > { %3935 = vmatpush3.bf16.msra.mxu0 %v4898_v38  ;;  %3495 = vmatprep.mubr.msk.f32.mxu0 %vm4547_vm0, %v4548_v1  ;;  %v1192_v38 = vld [vmem:[%s5464_s4 + $0x70] sm:$0xff]  ;;  %v5107_v23 = vpack.c.bf16 %v1325_v17, %v1318_v16 }
 0x10d   : > { %3936 = vmatprep.subr.bf16.mxu0 %v4546_v0  ;;  %v1237_v46 = vand.u32 4294901760, %v1192_v38 }
 0x10f   : > { %v5071_v50 = vpack.c.bf16 %v1240_v47, %v1237_v46  ;;  %v5073_v51 = vsub.f32 %v1192_v38, %v1237_v46  ;;  %v5485_v38 = vand.u32 4294901760, %v5059_v42 }
 0x110   : > { %3938 = vmatpush3.bf16.msra.mxu0 %v4924_v52  ;;  %v5075_v52 = vsub.f32 %v1193_v39, %v1240_v47  ;;  %v5484_v39 = vand.u32 4294901760, %v5061_v43 }
 0x111   : > { %3939 = vmatprep.subr.bf16.mxu0 %v4546_v0  ;;  %v1359_v47 = vsub.f32 %v5059_v42, %v5485_v38  ;;  %v5481_v16 = vand.u32 4294901760, %v5073_v51 }
 0x112   : > { %v1366_v53 = vsub.f32 %v5061_v43, %v5484_v39  ;;  %v5480_v17 = vand.u32 4294901760, %v5075_v52 }
 0x113   : > { %v1360_v54 = vand.u32 4294901760, %v1359_v47  ;;  %v1387_v25 = vsub.f32 %v5073_v51, %v5481_v16  ;;  %v3997_v47 = vpack.c.bf16 %v4940_v5, %v4938_v4  ;;  %v5513_v4 = vand.u32 4294901760, %v5059_v42 }
 0x114   : > { %3941 = vmatpush3.bf16.msra.mxu0 %v3895_v3  ;;  %v5093_v3 = vpack.c.bf16 %v1297_v60, %v1290_v57  ;;  %v1367_v57 = vand.u32 4294901760, %v1366_v53  ;;  %v5483_v60 = vand.u32 4294901760, %v5064_v44  ;;  %v1394_v26 = vsub.f32 %v5075_v52, %v5480_v17  ;;  %v3171_v17 = vld [vmem:[#allocation6] ss:$0 sm:$0xff] }
 0x115   : > { %4086 = vmatprep.subr.bf16.mxu0 %v4546_v0  ;;  %v1388_v28 = vand.u32 4294901760, %v1387_v25  ;;  %v4000_v53 = vpack.c.bf16 %v5017_v22, %v5015_v21  ;;  %v5514_v5 = vand.u32 4294901760, %v5061_v43  ;;  %v5515_v21 = vand.u32 4294901760, %v5064_v44 }
 0x116   : > { %v3982_v2 = vpack.c.bf16 %v1367_v57, %v1360_v54  ;;  %v1373_v6 = vsub.f32 %v5064_v44, %v5483_v60  ;;  %v4003_v54 = vpack.c.bf16 %v5057_v41, %v5055_v40  ;;  %v4006_v57 = vpack.c.bf16 %v5061_v43, %v5059_v42 }
 0x117   : > { %3496 = vmatmul.mubr.f32.vlgmr.msra.gmra.mrb[0].mxu0 %v4896_v34  ;;  %v1191_v34 = vld [vmem:[%s5464_s4 + $0x68] sm:$0xff] }
 0x118   : > { %3724 = vmatprep.mubr.msk.f32.mxu0 %vm4547_vm0, %v4548_v1  ;;  %v1234_v36 = vand.u32 4294901760, %v1191_v34  ;;  %v1374_v14 = vand.u32 4294901760, %v1373_v6 }
 0x11a   : > { %v5047_v37 = vpack.c.bf16 %v1234_v36, %v1231_v35  ;;  %v5066_v45 = vsub.f32 %v1191_v34, %v1234_v36  ;;  %v1352_v34 = vsub.f32 %v5057_v41, %v5486_v30  ;;  %v1346_v35 = vand.u32 4294901760, %v1345_v33 }
 0x11b   : > { %v1395_v33 = vand.u32 4294901760, %v1394_v26  ;;  %v3170_v26 = vld [vmem:[#allocation4] ss:$0 sm:$0xff] }
 0x11c   : > { %3962 = vmatpush3.bf16.msra.mxu1 %v5047_v37  ;;  %v1353_v36 = vand.u32 4294901760, %v1352_v34  ;;  %v5482_v61 = vand.u32 4294901760, %v5066_v45  ;;  %v4009_v6 = vpack.c.bf16 %v5066_v45, %v5064_v44  ;;  %v5516_v22 = vand.u32 4294901760, %v5066_v45 }
 0x11d   : > { %3963 = vmatprep.subr.bf16.mxu1 %v4546_v0  ;;  %v3988_v34 = vpack.c.bf16 %v1395_v33, %v1388_v28 }
 0x11e   : > { %v3979_v46 = vpack.c.bf16 %v1353_v36, %v1346_v35  ;;  %v1380_v8 = vsub.f32 %v5066_v45, %v5482_v61  ;;  %v3991_v35 = vpack.c.bf16 %v4931_v59, %v4929_v58  ;;  %v3994_v36 = vpack.c.bf16 %v4936_v63, %v4934_v62  ;;  %v1858_v45 = vld [vmem:[%s5467_s7 + $0x20] sm:$0xff] }
 0x11f   : > { %v4045_v58 = vpack.c.bf16 %v1323_v12, %v1316_v10  ;;  %v4048_v59 = vpack.c.bf16 %v1337_v19, %v1330_v18  ;;  %v5511_v62 = vand.u32 4294901760, %v5055_v40  ;;  %v5512_v63 = vand.u32 4294901760, %v5057_v41  ;;  %v1860_v19 = vld [vmem:[%s5467_s7 + $0x30] sm:$0xff] }
 0x120   : > { %3965 = vmatpush3.bf16.msra.mxu1 %v5071_v50  ;;  %v1381_v15 = vand.u32 4294901760, %v1380_v8  ;;  %v4012_v8 = vpack.c.bf16 %v5075_v52, %v5073_v51  ;;  %v5517_v40 = vand.u32 4294901760, %v5073_v51  ;;  %v5518_v41 = vand.u32 4294901760, %v5075_v52 }
 0x121   : > { %3966 = vmatprep.subr.bf16.mxu1 %v4546_v0  ;;  %v1878_v51 = vand.u32 4294901760, %v1858_v45 }
 0x122   : > { %v3985_v24 = vpack.c.bf16 %v1381_v15, %v1374_v14 }
 0x1b4   : > { %v726_v14 = vpop.f32.mrb[0].mxu1 }
 0x1b5   : > { %v3422_v15 = vpop.f32.mrb[1].mxu1 }
 0x1ea   : > { %v1156_v25 = vpop.f32.mrb[0].mxu0 }
 0x1eb   : > { %v4194_v28 = vadd.f32 %v1156_v25, %v726_v14  ;;  %v3497_v33 = vpop.f32.mrb[1].mxu0 }
 0x1ed   : > { %v1167_v16 = vmul.f32 %v4194_v28, %v3170_v26 }
 0x1ef   : > { %v1175_v61 = vadd.f32 %v3171_v17, %v1167_v16 }
 0x1f1   : > { %v1176_v60 = vmax.f32 %v1175_v61, 0.0 }
 0x1f3   : > { %1177 = vst [vmem:[%s625_s30] sm:$0xff] %v1176_v60  ;;  %v5167_v39 = vand.u32 4294901760, %v1176_v60  ;;  %s629_s30 = scalar_lea.vmem %s5474_s14, %s4846_s25 }
 0x1f5   : > { %v1276_v38 = vsub.f32 %v1176_v60, %v5167_v39 }
 0x1f7   : > { %v1277_v30 = vand.u32 4294901760, %v1276_v38 }
 0x1f9   : > { %v1278_v29 = vsub.f32 %v1276_v38, %v1277_v30 }
 0x1fb   : > { %v1279_v15 = vand.u32 4294901760, %v1278_v29 }
 0x1fd   : > { %3531 = vmatmul.mubr.f32.vlgmr.msra.gmra.mrb[2].mxu1 %v1279_v15 }
 0x1fe   : > { %3968 = vmatpush3.bf16.msra.mxu1 %v5093_v3  ;;  %3565 = vmatprep.mubr.msk.f32.mxu1 %vm4547_vm0, %v4548_v1  ;;  %v4039_v3 = vpack.c.bf16 %v1295_v49, %v1288_v48  ;;  %v4051_v48 = vpack.c.bf16 %v5512_v63, %v5511_v62  ;;  %v4054_v49 = vpack.c.bf16 %v5514_v5, %v5513_v4 }
 0x1ff   : > { %3969 = vmatprep.subr.bf16.mxu1 %v4546_v0 }
 0x202   : > { %3971 = vmatpush3.bf16.msra.mxu1 %v5097_v13  ;;  %v4042_v13 = vpack.c.bf16 %v1309_v56, %v1302_v55  ;;  %v4057_v55 = vpack.c.bf16 %v5516_v22, %v5515_v21  ;;  %v4060_v56 = vpack.c.bf16 %v5518_v41, %v5517_v40 }
 0x203   : > { %3972 = vmatprep.subr.bf16.mxu1 %v4546_v0 }
 0x206   : > { %3974 = vmatpush3.bf16.msra.mxu1 %v5107_v23  ;;  %v1861_v23 = vld [vmem:[%s5467_s7 + $0x38] sm:$0xff] }
 0x207   : > { %3975 = vmatprep.subr.bf16.mxu1 %v4546_v0 }
 0x20a   : > { %3977 = vmatpush3.bf16.msra.mxu1 %v3976_v31  ;;  %v5316_v31 = vsub.f32 %v1858_v45, %v1878_v51 }
 0x20b   : > { %3978 = vmatprep.subr.bf16.mxu1 %v4546_v0 }
 0x20c   : > { %v1979_v25 = vand.u32 4294901760, %v5316_v31 }
 0x20e   : > { %3980 = vmatpush3.bf16.msra.mxu1 %v3979_v46  ;;  %v1887_v46 = vand.u32 4294901760, %v1861_v23  ;;  %v1980_v33 = vsub.f32 %v5316_v31, %v1979_v25 }
 0x20f   : > { %3981 = vmatprep.subr.bf16.mxu1 %v4546_v0 }
 0x210   : > { %v5327_v17 = vsub.f32 %v1861_v23, %v1887_v46 }
 0x212   : > { %3983 = vmatpush3.bf16.msra.mxu1 %v3982_v2 }
 0x213   : > { %3984 = vmatprep.subr.bf16.mxu1 %v4546_v0 }
 0x216   : > { %3986 = vmatpush3.bf16.msra.mxu1 %v3985_v24 }
 0x217   : > { %3987 = vmatprep.subr.bf16.mxu1 %v4546_v0 }
 0x21a   : > { %3989 = vmatpush3.bf16.msra.mxu1 %v3988_v34 }
 0x21b   : > { %3990 = vmatprep.subr.bf16.mxu1 %v4546_v0 }
 0x21d   : > { %3566 = vmatmul.mubr.f32.vlgmr.msra.gmra.mrb[2].mxu1 %v5167_v39 }
 0x21e   : > { %3992 = vmatpush3.bf16.msra.mxu1 %v3991_v35  ;;  %3600 = vmatprep.mubr.msk.f32.mxu1 %vm4547_vm0, %v4548_v1 }
 0x21f   : > { %3993 = vmatprep.subr.bf16.mxu1 %v4546_v0 }
 0x222   : > { %3995 = vmatpush3.bf16.msra.mxu1 %v3994_v36 }
 0x223   : > { %3996 = vmatprep.subr.bf16.mxu1 %v4546_v0 }
 0x226   : > { %3998 = vmatpush3.bf16.msra.mxu1 %v3997_v47 }
 0x227   : > { %3999 = vmatprep.subr.bf16.mxu1 %v4546_v0 }
 0x22a   : > { %4001 = vmatpush3.bf16.msra.mxu1 %v4000_v53 }
 0x22b   : > { %4002 = vmatprep.subr.bf16.mxu1 %v4546_v0 }
 0x22e   : > { %4004 = vmatpush3.bf16.msra.mxu1 %v4003_v54 }
 0x22f   : > { %4005 = vmatprep.subr.bf16.mxu1 %v4546_v0 }
 0x232   : > { %4007 = vmatpush3.bf16.msra.mxu1 %v4006_v57 }
 0x233   : > { %4008 = vmatprep.subr.bf16.mxu1 %v4546_v0 }
 0x236   : > { %4010 = vmatpush3.bf16.msra.mxu1 %v4009_v6 }
 0x237   : > { %4011 = vmatprep.subr.bf16.mxu1 %v4546_v0 }
 0x23a   : > { %4013 = vmatpush3.bf16.msra.mxu1 %v4012_v8 }
 0x23b   : > { %4014 = vmatprep.subr.bf16.mxu1 %v4546_v0 }
 0x23d   : > { %3601 = vmatmul.mubr.f32.vlgmr.msra.gmra.mrb[2].mxu1 %v1276_v38 }
 0x23e   : > { %4016 = vmatpush3.bf16.msra.mxu1 %v4943_v7  ;;  %3635 = vmatprep.mubr.msk.f32.mxu1 %vm4547_vm0, %v4548_v1 }
 0x23f   : > { %4017 = vmatprep.subr.bf16.mxu1 %v4546_v0 }
 0x242   : > { %4019 = vmatpush3.bf16.msra.mxu1 %v4950_v9 }
 0x243   : > { %4020 = vmatprep.subr.bf16.mxu1 %v4546_v0 }
 0x246   : > { %4022 = vmatpush3.bf16.msra.mxu1 %v4962_v11 }
 0x247   : > { %4023 = vmatprep.subr.bf16.mxu1 %v4546_v0 }
 0x24a   : > { %4025 = vmatpush3.bf16.msra.mxu1 %v5013_v20 }
 0x24b   : > { %4026 = vmatprep.subr.bf16.mxu1 %v4546_v0 }
 0x24e   : > { %4028 = vmatpush3.bf16.msra.mxu1 %v5027_v27 }
 0x24f   : > { %4029 = vmatprep.subr.bf16.mxu1 %v4546_v0 }
 0x252   : > { %4031 = vmatpush3.bf16.msra.mxu1 %v5037_v32 }
 0x253   : > { %4032 = vmatprep.subr.bf16.mxu1 %v4546_v0 }
 0x256   : > { %4034 = vmatpush3.bf16.msra.mxu1 %v5047_v37 }
 0x257   : > { %4035 = vmatprep.subr.bf16.mxu1 %v4546_v0 }
 0x25a   : > { %4037 = vmatpush3.bf16.msra.mxu1 %v5071_v50 }
 0x25b   : > { %4038 = vmatprep.subr.bf16.mxu1 %v4546_v0 }
 0x25d   : > { %3636 = vmatmul.mubr.f32.vlgmr.msra.gmra.mrb[2].mxu1 %v1277_v30 }
 0x25e   : > { %4040 = vmatpush3.bf16.msra.mxu1 %v4039_v3  ;;  %3670 = vmatprep.mubr.msk.f32.mxu1 %vm4547_vm0, %v4548_v1  ;;  %v1981_v3 = vand.u32 4294901760, %v1980_v33 }
 0x25f   : > { %4041 = vmatprep.subr.bf16.mxu1 %v4546_v0 }
 0x262   : > { %4043 = vmatpush3.bf16.msra.mxu1 %v4042_v13 }
 0x263   : > { %4044 = vmatprep.subr.bf16.mxu1 %v4546_v0 }
 0x266   : > { %4046 = vmatpush3.bf16.msra.mxu1 %v4045_v58 }
 0x267   : > { %4047 = vmatprep.subr.bf16.mxu1 %v4546_v0 }
 0x26a   : > { %4049 = vmatpush3.bf16.msra.mxu1 %v4048_v59  ;;  %v2000_v59 = vand.u32 4294901760, %v5327_v17 }
 0x26b   : > { %4050 = vmatprep.subr.bf16.mxu1 %v4546_v0 }
 0x26e   : > { %4052 = vmatpush3.bf16.msra.mxu1 %v4051_v48  ;;  %v2001_v48 = vsub.f32 %v5327_v17, %v2000_v59 }
 0x26f   : > { %4053 = vmatprep.subr.bf16.mxu1 %v4546_v0 }
 0x270   : > { %v2002_v5 = vand.u32 4294901760, %v2001_v48 }
 0x272   : > { %4055 = vmatpush3.bf16.msra.mxu1 %v4054_v49 }
 0x273   : > { %4056 = vmatprep.subr.bf16.mxu1 %v4546_v0 }
 0x276   : > { %4058 = vmatpush3.bf16.msra.mxu1 %v4057_v55 }
 0x277   : > { %4059 = vmatprep.subr.bf16.mxu1 %v4546_v0 }
 0x27a   : > { %4061 = vmatpush3.bf16.msra.mxu1 %v4060_v56 }
 0x27b   : > { %4062 = vmatprep.subr.bf16.mxu1 %v4546_v0 }
 0x27d   : > { %3671 = vmatmul.mubr.f32.vlgmr.msra.gmra.mrb[2].mxu1 %v5167_v39 }
 0x27e   : > { %4064 = vmatpush3.bf16.msra.mxu1 %v4943_v7  ;;  %3705 = vmatprep.mubr.msk.f32.mxu1 %vm4547_vm0, %v4548_v1  ;;  %v1854_v7 = vld [vmem:[%s5467_s7] sm:$0xff] }
 0x27f   : > { %4065 = vmatprep.subr.bf16.mxu1 %v4546_v0 }
 0x282   : > { %4067 = vmatpush3.bf16.msra.mxu1 %v4950_v9  ;;  %v1855_v9 = vld [vmem:[%s5467_s7 + $0x8] sm:$0xff] }
 0x283   : > { %4068 = vmatprep.subr.bf16.mxu1 %v4546_v0 }
 0x286   : > { %4070 = vmatpush3.bf16.msra.mxu1 %v4962_v11  ;;  %v1866_v11 = vand.u32 4294901760, %v1854_v7 }
 0x287   : > { %4071 = vmatprep.subr.bf16.mxu1 %v4546_v0 }
 0x288   : > { %v5299_v10 = vsub.f32 %v1854_v7, %v1866_v11 }
 0x28a   : > { %4073 = vmatpush3.bf16.msra.mxu1 %v5013_v20  ;;  %v1869_v20 = vand.u32 4294901760, %v1855_v9  ;;  %v1951_v60 = vand.u32 4294901760, %v5299_v10 }
 0x28b   : > { %4074 = vmatprep.subr.bf16.mxu1 %v4546_v0 }
 0x28c   : > { %v5301_v12 = vsub.f32 %v1855_v9, %v1869_v20  ;;  %v1952_v24 = vsub.f32 %v5299_v10, %v1951_v60 }
 0x28e   : > { %4076 = vmatpush3.bf16.msra.mxu1 %v5027_v27  ;;  %v5279_v27 = vpack.c.bf16 %v1869_v20, %v1866_v11  ;;  %v1958_v61 = vand.u32 4294901760, %v5301_v12  ;;  %v1953_v35 = vand.u32 4294901760, %v1952_v24  ;;  %v4111_v21 = vpack.c.bf16 %v5301_v12, %v5299_v10  ;;  %v3172_v11 = vld [vmem:[#allocation7] ss:$0 sm:$0xff] }
 0x28f   : > { %4077 = vmatprep.subr.bf16.mxu1 %v4546_v0 }
 0x290   : > { %4088 = vmatpush3.bf16.msra.mxu0 %v5279_v27  ;;  %v1959_v34 = vsub.f32 %v5301_v12, %v1958_v61  ;;  %v4135_v41 = vpack.c.bf16 %v1958_v61, %v1951_v60 }
 0x291   : > { %4089 = vmatprep.subr.bf16.mxu0 %v4546_v0 }
 0x292   : > { %4079 = vmatpush3.bf16.msra.mxu1 %v5037_v32  ;;  %v1856_v32 = vld [vmem:[%s5467_s7 + $0x10] sm:$0xff]  ;;  %v1960_v53 = vand.u32 4294901760, %v1959_v34 }
 0x293   : > { %4080 = vmatprep.subr.bf16.mxu1 %v4546_v0  ;;  %v1872_v42 = vand.u32 4294901760, %v1856_v32 }
 0x294   : > { %v4099_v6 = vpack.c.bf16 %v1960_v53, %v1953_v35 }
 0x295   : > { %v5311_v29 = vsub.f32 %v1856_v32, %v1872_v42  ;;  %v3173_v32 = vld [vmem:[#allocation9] ss:$0 sm:$0xff] }
 0x296   : > { %4082 = vmatpush3.bf16.msra.mxu1 %v5047_v37  ;;  %v1857_v37 = vld [vmem:[%s5467_s7 + $0x18] sm:$0xff] }
 0x297   : > { %4083 = vmatprep.subr.bf16.mxu1 %v4546_v0  ;;  %v1875_v43 = vand.u32 4294901760, %v1857_v37  ;;  %v1965_v36 = vand.u32 4294901760, %v5311_v29 }
 0x299   : > { %v5289_v44 = vpack.c.bf16 %v1875_v43, %v1872_v42  ;;  %v5313_v30 = vsub.f32 %v1857_v37, %v1875_v43  ;;  %v1966_v54 = vsub.f32 %v5311_v29, %v1965_v36 }
 0x29a   : > { %4085 = vmatpush3.bf16.msra.mxu1 %v5071_v50  ;;  %v1859_v50 = vld [vmem:[%s5467_s7 + $0x28] sm:$0xff] }
 0x29b   : > { %4091 = vmatpush3.bf16.msra.mxu0 %v5289_v44  ;;  %v1881_v52 = vand.u32 4294901760, %v1859_v50  ;;  %v1972_v47 = vand.u32 4294901760, %v5313_v30  ;;  %v1967_v8 = vand.u32 4294901760, %v1966_v54  ;;  %v4114_v22 = vpack.c.bf16 %v5313_v30, %v5311_v29 }
 0x29c   : > { %4092 = vmatprep.subr.bf16.mxu0 %v4546_v0 }
 0x29d   : > { %3706 = vmatmul.mubr.f32.vlgmr.msra.gmra.mrb[2].mxu1 %v5167_v39  ;;  %v5303_v18 = vpack.c.bf16 %v1881_v52, %v1878_v51  ;;  %v5318_v38 = vsub.f32 %v1859_v50, %v1881_v52  ;;  %v1884_v39 = vand.u32 4294901760, %v1860_v19  ;;  %v1973_v57 = vsub.f32 %v5313_v30, %v1972_v47 }
 0x29e   : > { %v4138_v56 = vpack.c.bf16 %v1972_v47, %v1965_v36 }
 0x29f   : > { %4094 = vmatpush3.bf16.msra.mxu0 %v5303_v18  ;;  %v5323_v2 = vpack.c.bf16 %v1887_v46, %v1884_v39  ;;  %v5325_v16 = vsub.f32 %v1860_v19, %v1884_v39  ;;  %v1974_v14 = vand.u32 4294901760, %v1973_v57  ;;  %v1986_v26 = vand.u32 4294901760, %v5318_v38  ;;  %v2424_v39 = vld [vmem:[%s5470_s10 + $0x18] sm:$0xff] }
 0x2a0   : > { %4095 = vmatprep.subr.bf16.mxu0 %v4546_v0  ;;  %v4117_v55 = vpack.c.bf16 %v5318_v38, %v5316_v31  ;;  %v2438_v60 = vand.u32 4294901760, %v2424_v39 }
 0x2a1   : > { %v4102_v28 = vpack.c.bf16 %v1974_v14, %v1967_v8  ;;  %v1987_v15 = vsub.f32 %v5318_v38, %v1986_v26  ;;  %v1993_v58 = vand.u32 4294901760, %v5325_v16  ;;  %v4120_v40 = vpack.c.bf16 %v5327_v17, %v5325_v16  ;;  %v2423_v38 = vld [vmem:[%s5470_s10 + $0x10] sm:$0xff] }
 0x2a2   : > { %v4141_v7 = vpack.c.bf16 %v1986_v26, %v1979_v25  ;;  %v2435_v46 = vand.u32 4294901760, %v2423_v38  ;;  %v2530_v24 = vsub.f32 %v2424_v39, %v2438_v60 }
 0x2a3   : > { %4097 = vmatpush3.bf16.msra.mxu0 %v5323_v2  ;;  %v1988_v13 = vand.u32 4294901760, %v1987_v15  ;;  %v1994_v63 = vsub.f32 %v5325_v16, %v1993_v58  ;;  %v4144_v9 = vpack.c.bf16 %v2000_v59, %v1993_v58  ;;  %v3175_v59 = vld [vmem:[#allocation12] ss:$0 sm:$0xff] }
 0x2a4   : > { %4098 = vmatprep.subr.bf16.mxu0 %v4546_v0  ;;  %v5413_v16 = vpack.c.bf16 %v2438_v60, %v2435_v46  ;;  %v2523_v17 = vsub.f32 %v2423_v38, %v2435_v46  ;;  %v2531_v53 = vand.u32 4294901760, %v2530_v24 }
 0x2a5   : > { %v4105_v62 = vpack.c.bf16 %v1988_v13, %v1981_v3  ;;  %v1995_v4 = vand.u32 4294901760, %v1994_v63  ;;  %v3174_v13 = vld [vmem:[#allocation10] ss:$0 sm:$0xff] }
 0x2a6   : > { %v2524_v47 = vand.u32 4294901760, %v2523_v17  ;;  %v4174_v33 = vpack.c.bf16 %v2530_v24, %v2523_v17 }
 0x2a7   : > { %v4108_v49 = vpack.c.bf16 %v2002_v5, %v1995_v4 }
 0x2a8   : > { %v2525_v57 = vsub.f32 %v2523_v17, %v2524_v47  ;;  %v4186_v3 = vpack.c.bf16 %v2531_v53, %v2524_v47 }
 0x2aa   : > { %v2526_v14 = vand.u32 4294901760, %v2525_v57 }
 0x370   : > { %v1831_v20 = vpop.f32.mrb[2].mxu1 }
 0x371   : > { %v1842_v37 = vmul.f32 %v3172_v11, %v1831_v20  ;;  %v3707_v42 = vpop.f32.mrb[3].mxu1 }
 0x373   : > { %v1850_v43 = vadd.f32 %v3173_v32, %v1842_v37 }
 0x375   : > { %v1851_v45 = vmax.f32 %v1850_v43, 0.0 }
 0x377   : > { %1853 = vst.msk [vmem:[%s629_s30] sm:$0xff] %vm1852_vm2, %v1851_v45  ;;  %v1863_v50 = vsel %vm1852_vm2, %v1851_v45, 0  ;;  %s5520_s30 = sld [smem:[#allocation23_spill]] }
 0x378   : > { %v1938_v51 = vand.u32 4294901760, %v1863_v50 }
 0x37a   : > { %v1939_v52 = vsub.f32 %v1863_v50, %v1938_v51 }
 0x37c   : > { %v1940_v10 = vand.u32 4294901760, %v1939_v52 }
 0x37d   : > { %s637_s28 = scalar_lea.vmem %s5520_s30, %s4846_s25 }
 0x37e   : > { %v1941_v12 = vsub.f32 %v1939_v52, %v1940_v10 }
 0x380   : > { %v1942_v19 = vand.u32 4294901760, %v1941_v12 }
 0x382   : > { %3725 = vmatmul.mubr.f32.vlgmr.msra.gmra.mrb[2].mxu0 %v1942_v19 }
 0x383   : > { %4100 = vmatpush3.bf16.msra.mxu0 %v4099_v6  ;;  %3743 = vmatprep.mubr.msk.f32.mxu0 %vm4547_vm0, %v4548_v1  ;;  %v2532_v6 = vsub.f32 %v2530_v24, %v2531_v53 }
 0x384   : > { %4101 = vmatprep.subr.bf16.mxu0 %v4546_v0 }
 0x385   : > { %v2533_v25 = vand.u32 4294901760, %v2532_v6 }
 0x387   : > { %4103 = vmatpush3.bf16.msra.mxu0 %v4102_v28  ;;  %v4168_v26 = vpack.c.bf16 %v2533_v25, %v2526_v14 }
 0x388   : > { %4104 = vmatprep.subr.bf16.mxu0 %v4546_v0 }
 0x38b   : > { %4106 = vmatpush3.bf16.msra.mxu0 %v4105_v62 }
 0x38c   : > { %4107 = vmatprep.subr.bf16.mxu0 %v4546_v0 }
 0x38f   : > { %4109 = vmatpush3.bf16.msra.mxu0 %v4108_v49 }
 0x390   : > { %4110 = vmatprep.subr.bf16.mxu0 %v4546_v0 }
 0x392   : > { %3744 = vmatmul.mubr.f32.vlgmr.msra.gmra.mrb[2].mxu0 %v1938_v51 }
 0x393   : > { %4112 = vmatpush3.bf16.msra.mxu0 %v4111_v21  ;;  %3762 = vmatprep.mubr.msk.f32.mxu0 %vm4547_vm0, %v4548_v1 }
 0x394   : > { %4113 = vmatprep.subr.bf16.mxu0 %v4546_v0 }
 0x397   : > { %4115 = vmatpush3.bf16.msra.mxu0 %v4114_v22 }
 0x398   : > { %4116 = vmatprep.subr.bf16.mxu0 %v4546_v0 }
 0x39b   : > { %4118 = vmatpush3.bf16.msra.mxu0 %v4117_v55 }
 0x39c   : > { %4119 = vmatprep.subr.bf16.mxu0 %v4546_v0 }
 0x39f   : > { %4121 = vmatpush3.bf16.msra.mxu0 %v4120_v40 }
 0x3a0   : > { %4122 = vmatprep.subr.bf16.mxu0 %v4546_v0 }
 0x3a2   : > { %3763 = vmatmul.mubr.f32.vlgmr.msra.gmra.mrb[2].mxu0 %v1939_v52 }
 0x3a3   : > { %4124 = vmatpush3.bf16.msra.mxu0 %v5279_v27  ;;  %3781 = vmatprep.mubr.msk.f32.mxu0 %vm4547_vm0, %v4548_v1 }
 0x3a4   : > { %4125 = vmatprep.subr.bf16.mxu0 %v4546_v0 }
 0x3a7   : > { %4127 = vmatpush3.bf16.msra.mxu0 %v5289_v44 }
 0x3a8   : > { %4128 = vmatprep.subr.bf16.mxu0 %v4546_v0 }
 0x3ab   : > { %4130 = vmatpush3.bf16.msra.mxu0 %v5303_v18 }
 0x3ac   : > { %4131 = vmatprep.subr.bf16.mxu0 %v4546_v0 }
 0x3af   : > { %4133 = vmatpush3.bf16.msra.mxu0 %v5323_v2 }
 0x3b0   : > { %4134 = vmatprep.subr.bf16.mxu0 %v4546_v0 }
 0x3b2   : > { %3782 = vmatmul.mubr.f32.vlgmr.msra.gmra.mrb[2].mxu0 %v1940_v10 }
 0x3b3   : > { %4136 = vmatpush3.bf16.msra.mxu0 %v4135_v41  ;;  %3800 = vmatprep.mubr.msk.f32.mxu0 %vm4547_vm0, %v4548_v1  ;;  %v3176_v41 = vld [vmem:[%s5471_s11] ss:$0 sm:$0xff] }
 0x3b4   : > { %4137 = vmatprep.subr.bf16.mxu0 %v4546_v0 }
 0x3b7   : > { %4139 = vmatpush3.bf16.msra.mxu0 %v4138_v56 }
 0x3b8   : > { %4140 = vmatprep.subr.bf16.mxu0 %v4546_v0 }
 0x3bb   : > { %4142 = vmatpush3.bf16.msra.mxu0 %v4141_v7  ;;  %v3177_v7 = vld [vmem:[%s5519_s26] ss:$0 sm:$0xff] }
 0x3bc   : > { %4143 = vmatprep.subr.bf16.mxu0 %v4546_v0 }
 0x3bf   : > { %4145 = vmatpush3.bf16.msra.mxu0 %v4144_v9 }
 0x3c0   : > { %4146 = vmatprep.subr.bf16.mxu0 %v4546_v0 }
 0x3c2   : > { %3801 = vmatmul.mubr.f32.vlgmr.msra.gmra.mrb[2].mxu0 %v1938_v51 }
 0x3c3   : > { %4148 = vmatpush3.bf16.msra.mxu0 %v5279_v27  ;;  %3819 = vmatprep.mubr.msk.f32.mxu0 %vm4547_vm0, %v4548_v1  ;;  %v2421_v27 = vld [vmem:[%s5470_s10] sm:$0xff] }
 0x3c4   : > { %4149 = vmatprep.subr.bf16.mxu0 %v4546_v0  ;;  %v2429_v23 = vand.u32 4294901760, %v2421_v27 }
 0x3c6   : > { %v2509_v30 = vsub.f32 %v2421_v27, %v2429_v23 }
 0x3c7   : > { %4151 = vmatpush3.bf16.msra.mxu0 %v5289_v44  ;;  %v2422_v44 = vld [vmem:[%s5470_s10 + $0x8] sm:$0xff] }
 0x3c8   : > { %4152 = vmatprep.subr.bf16.mxu0 %v4546_v0  ;;  %v2510_v61 = vand.u32 4294901760, %v2509_v30 }
 0x3ca   : > { %v2511_v34 = vsub.f32 %v2509_v30, %v2510_v61 }
 0x3cb   : > { %4154 = vmatpush3.bf16.msra.mxu0 %v5303_v18  ;;  %v2432_v18 = vand.u32 4294901760, %v2422_v44 }
 0x3cc   : > { %4155 = vmatprep.subr.bf16.mxu0 %v4546_v0  ;;  %v2512_v36 = vand.u32 4294901760, %v2511_v34 }
 0x3cd   : > { %v5403_v29 = vpack.c.bf16 %v2432_v18, %v2429_v23  ;;  %v2516_v31 = vsub.f32 %v2422_v44, %v2432_v18 }
 0x3cf   : > { %4157 = vmatpush3.bf16.msra.mxu0 %v5323_v2  ;;  %v2517_v2 = vand.u32 4294901760, %v2516_v31  ;;  %v4171_v28 = vpack.c.bf16 %v2516_v31, %v2509_v30 }
 0x3d0   : > { %4158 = vmatprep.subr.bf16.mxu0 %v4546_v0 }
 0x3d1   : > { %v2518_v35 = vsub.f32 %v2516_v31, %v2517_v2  ;;  %v4183_v15 = vpack.c.bf16 %v2517_v2, %v2510_v61 }
 0x3d2   : > { %3820 = vmatmul.mubr.f32.vlgmr.msra.gmra.mrb[2].mxu0 %v1938_v51 }
 0x3d3   : > { %3830 = vmatprep.mubr.msk.f32.mxu0 %vm4547_vm0, %v4548_v1  ;;  %4160 = vmatpush3.bf16.msra.mxu0 %v5403_v29  ;;  %v2519_v54 = vand.u32 4294901760, %v2518_v35 }
 0x3d4   : > { %4161 = vmatprep.subr.bf16.mxu0 %v4546_v0 }
 0x3d5   : > { %v4165_v8 = vpack.c.bf16 %v2519_v54, %v2512_v36 }
 0x3d7   : > { %4163 = vmatpush3.bf16.msra.mxu0 %v5413_v16 }
 0x3d8   : > { %4164 = vmatprep.subr.bf16.mxu0 %v4546_v0 }
 0x4a5   : > { %v2398_v58 = vpop.f32.mrb[2].mxu0 }
 0x4a6   : > { %v2409_v62 = vmul.f32 %v3174_v13, %v2398_v58  ;;  %v3821_v63 = vpop.f32.mrb[3].mxu0 }
 0x4a8   : > { %v2417_v48 = vadd.f32 %v3175_v59, %v2409_v62 }
 0x4aa   : > { %v2418_v4 = vmax.f32 %v2417_v48, 0.0 }
 0x4ac   : > { %2420 = vst.msk [vmem:[%s633_s8] sm:$0xff] %vm2419_vm3, %v2418_v4  ;;  %v2426_v5 = vsel %vm2419_vm3, %v2418_v4, 0 }
 0x4ad   : > { %v2497_v49 = vand.u32 4294901760, %v2426_v5 }
 0x4af   : > { %v2498_v21 = vsub.f32 %v2426_v5, %v2497_v49 }
 0x4b1   : > { %v2499_v22 = vand.u32 4294901760, %v2498_v21 }
 0x4b3   : > { %v2500_v55 = vsub.f32 %v2498_v21, %v2499_v22 }
 0x4b5   : > { %v2501_v40 = vand.u32 4294901760, %v2500_v55 }
 0x4b7   : > { %3831 = vmatmul.mubr.f32.vlgmr.msra.gmra.mrb[4].mxu0 %v2501_v40 }
 0x4b8   : > { %4166 = vmatpush3.bf16.msra.mxu0 %v4165_v8  ;;  %3841 = vmatprep.mubr.msk.f32.mxu0 %vm4547_vm0, %v4548_v1 }
 0x4b9   : > { %4167 = vmatprep.subr.bf16.mxu0 %v4546_v0 }
 0x4bc   : > { %4169 = vmatpush3.bf16.msra.mxu0 %v4168_v26 }
 0x4bd   : > { %4170 = vmatprep.subr.bf16.mxu0 %v4546_v0 }
 0x4bf   : > { %3842 = vmatmul.mubr.f32.vlgmr.msra.gmra.mrb[4].mxu0 %v2497_v49 }
 0x4c0   : > { %4172 = vmatpush3.bf16.msra.mxu0 %v4171_v28  ;;  %3852 = vmatprep.mubr.msk.f32.mxu0 %vm4547_vm0, %v4548_v1 }
 0x4c1   : > { %4173 = vmatprep.subr.bf16.mxu0 %v4546_v0 }
 0x4c4   : > { %4175 = vmatpush3.bf16.msra.mxu0 %v4174_v33 }
 0x4c5   : > { %4176 = vmatprep.subr.bf16.mxu0 %v4546_v0 }
 0x4c7   : > { %3853 = vmatmul.mubr.f32.vlgmr.msra.gmra.mrb[4].mxu0 %v2498_v21 }
 0x4c8   : > { %4178 = vmatpush3.bf16.msra.mxu0 %v5403_v29  ;;  %3863 = vmatprep.mubr.msk.f32.mxu0 %vm4547_vm0, %v4548_v1 }
 0x4c9   : > { %4179 = vmatprep.subr.bf16.mxu0 %v4546_v0 }
 0x4cc   : > { %4181 = vmatpush3.bf16.msra.mxu0 %v5413_v16 }
 0x4cd   : > { %4182 = vmatprep.subr.bf16.mxu0 %v4546_v0 }
 0x4cf   : > { %3864 = vmatmul.mubr.f32.vlgmr.msra.gmra.mrb[4].mxu0 %v2499_v22 }
 0x4d0   : > { %4184 = vmatpush3.bf16.msra.mxu0 %v4183_v15  ;;  %3874 = vmatprep.mubr.msk.f32.mxu0 %vm4547_vm0, %v4548_v1 }
 0x4d1   : > { %4185 = vmatprep.subr.bf16.mxu0 %v4546_v0 }
 0x4d4   : > { %4187 = vmatpush3.bf16.msra.mxu0 %v4186_v3 }
 0x4d5   : > { %4188 = vmatprep.subr.bf16.mxu0 %v4546_v0 }
 0x4d7   : > { %3875 = vmatmul.mubr.f32.vlgmr.msra.gmra.mrb[4].mxu0 %v2497_v49 }
 0x4d8   : > { %4190 = vmatpush3.bf16.msra.mxu0 %v5403_v29  ;;  %3885 = vmatprep.mubr.msk.f32.mxu0 %vm4547_vm0, %v4548_v1 }
 0x4d9   : > { %4191 = vmatprep.subr.bf16.mxu0 %v4546_v0 }
 0x4dc   : > { %4193 = vmatpush3.bf16.msra.mxu0 %v5413_v16 }
 0x4df   : > { %3886 = vmatmul.mubr.f32.vlgmr.msra.gmra.mrb[4].mxu0 %v2497_v49 }
 0x5b2   : > { %v2909_v56 = vpop.f32.mrb[4].mxu0 }
 0x5b3   : > { %v2920_v9 = vmul.f32 %v3176_v41, %v2909_v56  ;;  %v3887_v11 = vpop.f32.mrb[5].mxu0 }
 0x5b5   : > { %v2928_v20 = vadd.f32 %v3177_v7, %v2920_v9 }
 0x5b7   : > { %v2929_v0 = vmax.f32 %v2928_v20, 0.0 }
 0x5b9   : > { %2930 = vst.msk [vmem:[%s637_s28] sm:$0xff] %vm2419_vm3, %v2929_v0 }
 0x5ba PF: > { %s5521_s22 = sld [smem:[#allocation17_spill]] }
 0x5c0   : > { %s31_s21 = sadd.s32 1, %s5521_s22  }
 0x5c1   : > { %p28_p11 = scmp.ge.s32.totalorder %s31_s21, 4  }
 0x5c3   :  { %30 = sbr.rel (!%p28_p11) target bundleno = 11 (0xb), region = 167 }
 0x5ca   :  { %2992 = vsyncpa [#allocation3], 1 }
 0x5cb   :  { %2994 = vsyncpa [#allocation3 + $0x1], 1 }
 0x5cc   :  { %2995 = vsyncpa [#allocation5], 1 }
 0x5cd   :  { %2996 = vsyncpa [#allocation8], 1 }
 0x5ce   :  { %2997 = vsyncpa [#allocation11], 1 }

// kernel: encoder_forward.4
= control target key start
LH: loop header
LB: loop body
LE: loop exit
PB: predicated region body
PF: predicated region fallthrough
CT: control target
= control target key end

     0   :  { %s3472_s13 = smov 0   ;;  %s4272_s0 = inlined_call_operand.vmem [shape: f32[2,8,96], index: 0, kind: input, shape index: {}]   ;;  %s4273_s1 = inlined_call_operand.vmem [shape: f32[96,128], index: 1, kind: input, shape index: {}]   ;;  %s4274_s2 = inlined_call_operand.vmem [shape: f32[1,128], index: 2, kind: input, shape index: {}]   ;;  %s4275_s3 = inlined_call_operand.vmem [shape: f32[1,128], index: 3, kind: input, shape index: {}]   ;;  %s4276_s4 = inlined_call_operand.vmem [shape: f32[128,64], index: 4, kind: input, shape index: {}]   ;;  %s4277_s5 = inlined_call_operand.vmem [shape: f32[1,64], index: 5, kind: input, shape index: {}]   ;;  %s4278_s6 = inlined_call_operand.vmem [shape: f32[1,64], index: 6, kind: input, shape index: {}]   ;;  %s4279_s7 = inlined_call_operand.vmem [shape: f32[64,32], index: 7, kind: input, shape index: {}]   ;;  %s4280_s8 = inlined_call_operand.vmem [shape: f32[1,32], index: 8, kind: input, shape index: {}]   ;;  %s4281_s9 = inlined_call_operand.vmem [shape: f32[2,8,128], index: 9, kind: output, shape index: {0}]   ;;  %s4282_s10 = inlined_call_operand.vmem [shape: f32[2,8,32], index: 10, kind: output, shape index: {1}]  }
   0x1 LB: > { %s2306_s14 = sadd.s32 4294967295, %s3412_s13   ;;  %p2310_p0 = scmp.ge.s32.totalorder %s3412_s13, 1  ;;  %s3412_s13 = sphi %s3472_s13, %s21_s13  }
   0x2   : > { %p314_p1 = scmp.lt.s32.totalorder %s3412_s13, 3 }
   0x4   : > { %p315_p2 = pnand %p2310_p0, %p314_p1 }
   0x5   : > { %v3483_v0 = vld [vmem:[%s4273_s1] sm:$0xff] (!%p315_p2)  ;;  %v3488_v1 = vld [vmem:[%s4273_s1 + $0x8] sm:$0xff] (!%p315_p2)  ;;  %v3493_v2 = vld [vmem:[%s4273_s1 + $0x10] sm:$0xff] (!%p315_p2)  ;;  %v3414_v3 = vmov (!%p315_p2), 0.0|0.0   ;;  %vm3415_vm0 = vmmov (!%p315_p2), 0   ;;  %v3416_v10 = vmov (!%p315_p2), 0.0  }
   0x6   : > { %318 = sbr.rel (%p315_p2) target bundleno = 1051 (0x41b), region = 56  ;;  %3059 = vmatprep.subr.bf16.mxu0 (!%p315_p2), %v3414_v3  ;;  %v384_v4 = vand.u32 (!%p315_p2), 4294901760, %v3483_v0  ;;  %v387_v5 = vand.u32 (!%p315_p2), 4294901760, %v3488_v1  ;;  %v3501_v6 = vld [vmem:[%s4273_s1 + $0x18] sm:$0xff] (!%p315_p2)  ;;  %v390_v7 = vand.u32 (!%p315_p2), 4294901760, %v3493_v2  ;;  %v3507_v8 = vld [vmem:[%s4273_s1 + $0x20] sm:$0xff] (!%p315_p2)  ;;  %2606 = vmatprep.mubr.msk.f32.mxu0 (!%p315_p2), %vm3415_vm0, %v3416_v10 }
   0x7   : > { %v3512_v9 = vld [vmem:[%s4273_s1 + $0x28] sm:$0xff] (!%p315_p2)  ;;  %v393_v11 = vand.u32 (!%p315_p2), 4294901760, %v3501_v6  ;;  %v396_v12 = vand.u32 (!%p315_p2), 4294901760, %v3507_v8  ;;  %v3522_v14 = vld [vmem:[%s4273_s1 + $0x30] sm:$0xff] (!%p315_p2)  ;;  %v3527_v15 = vld [vmem:[%s4273_s1 + $0x38] sm:$0xff] (!%p315_p2)  ;;  %3041 = vmatprep.subr.bf16.mxu1 (!%p315_p2), %v3414_v3  ;;  %2579 = vmatprep.mubr.msk.f32.mxu1 (!%p315_p2), %vm3415_vm0, %v3416_v10  ;;  %p3582_p3 = scmp.lt.s32.totalorder (!%p315_p2), %s2306_s14, 1 }
   0x8   : > { %v399_v13 = vand.u32 (!%p315_p2), 4294901760, %v3512_v9  ;;  %v3535_v16 = vsub.f32 (!%p315_p2), %v3483_v0, %v384_v4  ;;  %v3540_v17 = vsub.f32 (!%p315_p2), %v3488_v1, %v387_v5  ;;  %v3545_v18 = vsub.f32 (!%p315_p2), %v3493_v2, %v390_v7  ;;  %v3609_v40 = vld [vmem:[%s4273_s1 + $0x40] sm:$0xff] (!%p315_p2)  ;;  %v3614_v41 = vld [vmem:[%s4273_s1 + $0x48] sm:$0xff] (!%p315_p2)  ;;  %v3619_v45 = vld [vmem:[%s4273_s1 + $0x50] sm:$0xff] (!%p315_p2) }
   0x9   : > { %v402_v19 = vand.u32 (!%p315_p2), 4294901760, %v3522_v14  ;;  %v3551_v20 = vsub.f32 (!%p315_p2), %v3501_v6, %v393_v11  ;;  %v3556_v21 = vsub.f32 (!%p315_p2), %v3507_v8, %v396_v12  ;;  %v405_v23 = vand.u32 (!%p315_p2), 4294901760, %v3527_v15  ;;  %v3624_v47 = vld [vmem:[%s4273_s1 + $0x58] sm:$0xff] (!%p315_p2)  ;;  %v990_v1 = vld [vmem:[%s4276_s4] sm:$0xff] (!%p315_p2) }
   0xa   : > { %v3561_v22 = vsub.f32 (!%p315_p2), %v3512_v9, %v399_v13  ;;  %v473_v24 = vand.u32 (!%p315_p2), 4294901760, %v3535_v16  ;;  %v480_v25 = vand.u32 (!%p315_p2), 4294901760, %v3540_v17  ;;  %v487_v26 = vand.u32 (!%p315_p2), 4294901760, %v3545_v18 }
   0xb   : > { %v3570_v27 = vsub.f32 (!%p315_p2), %v3522_v14, %v402_v19  ;;  %v494_v28 = vand.u32 (!%p315_p2), 4294901760, %v3551_v20  ;;  %v501_v29 = vand.u32 (!%p315_p2), 4294901760, %v3556_v21  ;;  %v3578_v31 = vsub.f32 (!%p315_p2), %v3527_v15, %v405_v23 }
   0xc   : > { %v508_v30 = vand.u32 (!%p315_p2), 4294901760, %v3561_v22  ;;  %v474_v32 = vsub.f32 (!%p315_p2), %v3535_v16, %v473_v24  ;;  %v481_v33 = vsub.f32 (!%p315_p2), %v3540_v17, %v480_v25  ;;  %v488_v34 = vsub.f32 (!%p315_p2), %v3545_v18, %v487_v26 }
   0xd   : > { %v515_v35 = vand.u32 4294901760, %v3570_v27  ;;  %v495_v36 = vsub.f32 %v3551_v20, %v494_v28  ;;  %v502_v37 = vsub.f32 %v3556_v21, %v501_v29  ;;  %v522_v39 = vand.u32 4294901760, %v3578_v31  ;;  %s4299_s14 = smov (!%p3582_p3, %s2306_s14), 1 }
   0xe   : > { %v509_v38 = vsub.f32 %v3561_v22, %v508_v30  ;;  %v475_v42 = vand.u32 4294901760, %v474_v32  ;;  %v482_v43 = vand.u32 4294901760, %v481_v33  ;;  %v489_v44 = vand.u32 4294901760, %v488_v34  ;;  %s3652_s22 = sshll.u32 %s4299_s14, 3 }
   0xf   : > { %v496_v46 = vand.u32 4294901760, %v495_v36  ;;  %v516_v49 = vsub.f32 %v3570_v27, %v515_v35  ;;  %v408_v50 = vand.u32 4294901760, %v3609_v40  ;;  %v411_v51 = vand.u32 4294901760, %v3614_v41  ;;  %s357_s24 = scalar_lea.vmem %s4272_s0, %s3652_s22  ;;  %s361_s27 = scalar_lea.vmem %s4281_s9, %s3652_s22 }
  0x10   : > { %v3060_v48 = vpack.c.bf16 %v482_v43, %v475_v42  ;;  %v503_v52 = vand.u32 4294901760, %v502_v37  ;;  %v510_v53 = vand.u32 4294901760, %v509_v38  ;;  %v523_v54 = vsub.f32 %v3578_v31, %v522_v39  ;;  %s365_s16 = scalar_lea.vmem %s4282_s10, %s3652_s22 }
  0x11   : > { %v414_v55 = vand.u32 4294901760, %v3619_v45  ;;  %v3063_v56 = vpack.c.bf16 %v496_v46, %v489_v44  ;;  %v3638_v57 = vsub.f32 %v3609_v40, %v408_v50  ;;  %v3643_v58 = vsub.f32 %v3614_v41, %v411_v51  ;;  %v997_v41 = vld [vmem:[%s4276_s4 + $0x38] sm:$0xff] }
  0x12   : > { %3061 = vmatpush3.bf16.msra.mxu0 %v3060_v48  ;;  %v417_v59 = vand.u32 4294901760, %v3624_v47  ;;  %v3066_v32 = vpack.c.bf16 %v510_v53, %v503_v52  ;;  %v517_v33 = vand.u32 4294901760, %v516_v49  ;;  %v524_v36 = vand.u32 4294901760, %v523_v54  ;;  %v366_v49 = vld [vmem:[%s357_s24] sm:$0xff] }
  0x13   : > { %3062 = vmatprep.subr.bf16.mxu0 %v3414_v3  ;;  %v3650_v60 = vsub.f32 %v3619_v45, %v414_v55  ;;  %v529_v61 = vand.u32 4294901760, %v3638_v57  ;;  %v536_v62 = vand.u32 4294901760, %v3643_v58  ;;  %v3674_v43 = vpack.c.bf16 %v387_v5, %v384_v4  ;;  %v991_v4 = vld [vmem:[%s4276_s4 + $0x8] sm:$0xff] }
  0x14   : > { %v3659_v63 = vsub.f32 %v3624_v47, %v417_v59  ;;  %vm379_vm1 = vcmask 785408   ;;  %v3069_v52 = vpack.c.bf16 %v524_v36, %v517_v33  ;;  %v3683_v0 = vpack.c.bf16 %v393_v11, %v390_v7  ;;  %v992_v11 = vld [vmem:[%s4276_s4 + $0x10] sm:$0xff] }
  0x15   : > { %v543_v34 = vand.u32 4294901760, %v3650_v60  ;;  %v530_v37 = vsub.f32 %v3638_v57, %v529_v61  ;;  %v537_v38 = vsub.f32 %v3643_v58, %v536_v62  ;;  %3043 = vmatpush3.bf16.msra.mxu1 %v3674_v43  ;;  %v3697_v2 = vpack.c.bf16 %v480_v25, %v473_v24  ;;  %v993_v24 = vld [vmem:[%s4276_s4 + $0x18] sm:$0xff]  ;;  %v3722_v25 = vld [vmem:[%s4276_s4 + $0x20] sm:$0xff] }
  0x16   : > { %3064 = vmatpush3.bf16.msra.mxu0 %v3063_v56  ;;  %v550_v42 = vand.u32 4294901760, %v3659_v63  ;;  %3044 = vmatprep.subr.bf16.mxu1 %v3414_v3  ;;  %v3703_v5 = vpack.c.bf16 %v494_v28, %v487_v26  ;;  %v3709_v6 = vpack.c.bf16 %v508_v30, %v501_v29  ;;  %v3711_v7 = vpack.c.bf16 %v522_v39, %v515_v35  ;;  %v995_v30 = vld [vmem:[%s4276_s4 + $0x28] sm:$0xff] }
  0x17   : > { %3065 = vmatprep.subr.bf16.mxu0 %v3414_v3  ;;  %v531_v44 = vand.u32 4294901760, %v530_v37  ;;  %v538_v46 = vand.u32 4294901760, %v537_v38  ;;  %v544_v48 = vsub.f32 %v3650_v60, %v543_v34  ;;  %v381_v26 = vsel %vm379_vm1, %v366_v49, 0 }
  0x18   : > { %v551_v53 = vsub.f32 %v3659_v63, %v550_v42  ;;  %v3725_v28 = vpack.c.bf16 %v536_v62, %v529_v61  ;;  %v3727_v29 = vpack.c.bf16 %v550_v42, %v543_v34  ;;  %v1007_v54 = vand.u32 4294901760, %v990_v1 }
  0x19   : > { %v3072_v35 = vpack.c.bf16 %v538_v46, %v531_v44  ;;  %v545_v39 = vand.u32 4294901760, %v544_v48  ;;  %3046 = vmatpush3.bf16.msra.mxu1 %v3683_v0  ;;  %v1010_v56 = vand.u32 4294901760, %v991_v4  ;;  %v1013_v33 = vand.u32 4294901760, %v992_v11 }
  0x1a   : > { %3067 = vmatpush3.bf16.msra.mxu0 %v3066_v32  ;;  %v552_v32 = vand.u32 4294901760, %v551_v53  ;;  %3047 = vmatprep.subr.bf16.mxu1 %v3414_v3  ;;  %v1016_v36 = vand.u32 4294901760, %v993_v24  ;;  %v1019_v61 = vand.u32 4294901760, %v3722_v25  ;;  %v3740_v62 = vpack.c.bf16 %v399_v13, %v396_v12  ;;  %v1001_v53 = vld [vmem:[%s4276_s4 + $0x58] sm:$0xff] }
  0x1b   : > { %3068 = vmatprep.subr.bf16.mxu0 %v3414_v3  ;;  %v3742_v34 = vsub.f32 %v990_v1, %v1007_v54  ;;  %v3744_v37 = vsub.f32 %v991_v4, %v1010_v56  ;;  %v1022_v38 = vand.u32 4294901760, %v995_v30  ;;  %v3746_v42 = vsub.f32 %v992_v11, %v1013_v33 }
  0x1c   : > { %v3748_v44 = vsub.f32 %v993_v24, %v1016_v36  ;;  %v3751_v46 = vsub.f32 %v3722_v25, %v1019_v61  ;;  %v3075_v8 = vpack.c.bf16 %v552_v32, %v545_v39  ;;  %v3756_v9 = vand.u32 4294901760, %v381_v26  ;;  %v1004_v24 = vld [vmem:[%s4276_s4 + $0x70] sm:$0xff]  ;;  %v1005_v25 = vld [vmem:[%s4276_s4 + $0x78] sm:$0xff] }
  0x1d   : > { %3049 = vmatpush3.bf16.msra.mxu1 %v3740_v62  ;;  %v3754_v48 = vsub.f32 %v995_v30, %v1022_v38  ;;  %v3764_v12 = vpack.c.bf16 %v405_v23, %v402_v19  ;;  %v3078_v49 = vpack.c.bf16 %v3540_v17, %v3535_v16  ;;  %v3776_v14 = vpack.c.bf16 %v411_v51, %v408_v50 }
  0x1e   : > { %3070 = vmatpush3.bf16.msra.mxu0 %v3069_v52  ;;  %3050 = vmatprep.subr.bf16.mxu1 %v3414_v3  ;;  %v461_v13 = vsub.f32 %v381_v26, %v3756_v9  ;;  %v3081_v16 = vpack.c.bf16 %v3551_v20, %v3545_v18  ;;  %v3789_v17 = vpack.c.bf16 %v417_v59, %v414_v55  ;;  %v1028_v47 = vand.u32 4294901760, %v997_v41 }
  0x1f   : > { %3071 = vmatprep.subr.bf16.mxu0 %v3414_v3  ;;  %v3793_v23 = vpack.c.bf16 %v1010_v56, %v1007_v54  ;;  %v3084_v18 = vpack.c.bf16 %v3561_v22, %v3556_v21  ;;  %v3800_v20 = vpack.c.bf16 %v1016_v36, %v1013_v33  ;;  %v3087_v40 = vpack.c.bf16 %v3578_v31, %v3570_v27  ;;  %v996_v31 = vld [vmem:[%s4276_s4 + $0x30] sm:$0xff] }
  0x20   : > { %v462_v52 = vand.u32 4294901760, %v461_v13  ;;  %v3809_v21 = vpack.c.bf16 %v1022_v38, %v1019_v61  ;;  %v3090_v22 = vpack.c.bf16 %v3643_v58, %v3638_v57  ;;  %v3093_v27 = vpack.c.bf16 %v3659_v63, %v3650_v60  ;;  %v998_v57 = vld [vmem:[%s4276_s4 + $0x40] sm:$0xff]  ;;  %v999_v58 = vld [vmem:[%s4276_s4 + $0x48] sm:$0xff] }
  0x21   : > { %3052 = vmatpush3.bf16.msra.mxu1 %v3764_v12  ;;  %v1025_v45 = vand.u32 4294901760, %v996_v31  ;;  %v3873_v55 = vsub.f32 %v997_v41, %v1028_v47  ;;  %v1031_v59 = vand.u32 4294901760, %v998_v57  ;;  %v1034_v60 = vand.u32 4294901760, %v999_v58 }
  0x22   : > { %3073 = vmatpush3.bf16.msra.mxu0 %v3072_v35  ;;  %3053 = vmatprep.subr.bf16.mxu1 %v3414_v3  ;;  %v463_v15 = vsub.f32 %v461_v13, %v462_v52  ;;  %v1040_v1 = vand.u32 4294901760, %v1001_v53  ;;  %v1049_v54 = vand.u32 4294901760, %v1004_v24  ;;  %v1052_v56 = vand.u32 4294901760, %v1005_v25 }
  0x23   : > { %3074 = vmatprep.subr.bf16.mxu0 %v3414_v3  ;;  %v3869_v50 = vpack.c.bf16 %v1028_v47, %v1025_v45  ;;  %v3871_v51 = vsub.f32 %v996_v31, %v1025_v45  ;;  %v3887_v63 = vpack.c.bf16 %v1034_v60, %v1031_v59  ;;  %v3915_v26 = vsub.f32 %v998_v57, %v1031_v59 }
  0x24   : > { %v464_v19 = vand.u32 4294901760, %v463_v15  ;;  %v3921_v30 = vsub.f32 %v1001_v53, %v1040_v1  ;;  %v1100_v32 = vand.u32 4294901760, %v3742_v34  ;;  %v1107_v33 = vand.u32 4294901760, %v3744_v37 }
  0x25   : > { %3055 = vmatpush3.bf16.msra.mxu1 %v3776_v14  ;;  %v3931_v36 = vpack.c.bf16 %v1052_v56, %v1049_v54  ;;  %v3933_v61 = vsub.f32 %v1004_v24, %v1049_v54  ;;  %v1142_v45 = vand.u32 4294901760, %v3871_v51  ;;  %v1149_v47 = vand.u32 4294901760, %v3873_v55 }
  0x26   : > { %3076 = vmatpush3.bf16.msra.mxu0 %v3075_v8  ;;  %3056 = vmatprep.subr.bf16.mxu1 %v3414_v3  ;;  %v1101_v38 = vsub.f32 %v3742_v34, %v1100_v32  ;;  %v1108_v8 = vsub.f32 %v3744_v37, %v1107_v33  ;;  %v1156_v53 = vand.u32 4294901760, %v3915_v26  ;;  %vm1679_vm2 = vcmask 523264  }
  0x27   : > { %3077 = vmatprep.subr.bf16.mxu0 %v3414_v3  ;;  %v1150_v59 = vsub.f32 %v3873_v55, %v1149_v47  ;;  %vm2220_vm3 = vcmask 261120  }
  0x29   : > { %2607 = vmatmul.mubr.f32.vlgmr.msra.gmra.mrb[0].mxu0 %v3756_v9  ;;  %3058 = vmatpush3.bf16.msra.mxu1 %v3789_v17 }
  0x2a   : > { %3079 = vmatpush3.bf16.msra.mxu0 %v3078_v49  ;;  %2633 = vmatprep.mubr.msk.f32.mxu0 %vm3415_vm0, %v3416_v10  ;;  %v1109_v49 = vand.u32 4294901760, %v1108_v8 }
  0x2b   : > { %3080 = vmatprep.subr.bf16.mxu0 %v3414_v3  ;;  %3149 = vmatprep.subr.bf16.mxu1 %v3414_v3 }
  0x2c   : > { %2580 = vmatmul.mubr.f32.vlgmr.msra.gmra.mrb[0].mxu1 %v464_v19  ;;  %v1128_v19 = vand.u32 4294901760, %v3751_v46 }
  0x2d   : > { %3151 = vmatpush3.bf16.msra.mxu1 %v3793_v23  ;;  %2749 = vmatprep.mubr.msk.f32.mxu1 %vm3415_vm0, %v3416_v10 }
  0x2e   : > { %3082 = vmatpush3.bf16.msra.mxu0 %v3081_v16  ;;  %3152 = vmatprep.subr.bf16.mxu1 %v3414_v3 }
  0x2f   : > { %3083 = vmatprep.subr.bf16.mxu0 %v3414_v3 }
  0x31   : > { %3154 = vmatpush3.bf16.msra.mxu1 %v3800_v20 }
  0x32   : > { %3085 = vmatpush3.bf16.msra.mxu0 %v3084_v18  ;;  %3155 = vmatprep.subr.bf16.mxu1 %v3414_v3  ;;  %v1135_v18 = vand.u32 4294901760, %v3754_v48 }
  0x33   : > { %3086 = vmatprep.subr.bf16.mxu0 %v3414_v3 }
  0x35   : > { %3157 = vmatpush3.bf16.msra.mxu1 %v3809_v21 }
  0x36   : > { %3088 = vmatpush3.bf16.msra.mxu0 %v3087_v40  ;;  %3158 = vmatprep.subr.bf16.mxu1 %v3414_v3 }
  0x37   : > { %3089 = vmatprep.subr.bf16.mxu0 %v3414_v3 }
  0x39   : > { %3160 = vmatpush3.bf16.msra.mxu1 %v3869_v50 }
  0x3a   : > { %3091 = vmatpush3.bf16.msra.mxu0 %v3090_v22  ;;  %3161 = vmatprep.subr.bf16.mxu1 %v3414_v3  ;;  %v1129_v22 = vsub.f32 %v3751_v46, %v1128_v19 }
  0x3b   : > { %3092 = vmatprep.subr.bf16.mxu0 %v3414_v3 }
  0x3c   : > { %v1130_v31 = vand.u32 4294901760, %v1129_v22 }
  0x3d   : > { %3163 = vmatpush3.bf16.msra.mxu1 %v3887_v63 }
  0x3e   : > { %3094 = vmatpush3.bf16.msra.mxu0 %v3093_v27  ;;  %3164 = vmatprep.subr.bf16.mxu1 %v3414_v3  ;;  %v1136_v27 = vsub.f32 %v3754_v48, %v1135_v18 }
  0x3f   : > { %3095 = vmatprep.subr.bf16.mxu0 %v3414_v3 }
  0x40   : > { %v1137_v41 = vand.u32 4294901760, %v1136_v27 }
  0x41   : > { %2634 = vmatmul.mubr.f32.vlgmr.msra.gmra.mrb[0].mxu0 %v461_v13  ;;  %v1102_v13 = vand.u32 4294901760, %v1101_v38 }
  0x42   : > { %3097 = vmatpush3.bf16.msra.mxu0 %v3674_v43  ;;  %2660 = vmatprep.mubr.msk.f32.mxu0 %vm3415_vm0, %v3416_v10  ;;  %v3967_v57 = vpack.c.bf16 %v1137_v41, %v1130_v31 }
  0x43   : > { %3098 = vmatprep.subr.bf16.mxu0 %v3414_v3  ;;  %v3953_v15 = vpack.c.bf16 %v1109_v49, %v1102_v13 }
  0x46   : > { %3100 = vmatpush3.bf16.msra.mxu0 %v3683_v0 }
  0x47   : > { %3101 = vmatprep.subr.bf16.mxu0 %v3414_v3 }
  0x4a   : > { %3103 = vmatpush3.bf16.msra.mxu0 %v3740_v62 }
  0x4b   : > { %3104 = vmatprep.subr.bf16.mxu0 %v3414_v3 }
  0x4e   : > { %3106 = vmatpush3.bf16.msra.mxu0 %v3764_v12 }
  0x4f   : > { %3107 = vmatprep.subr.bf16.mxu0 %v3414_v3 }
  0x52   : > { %3109 = vmatpush3.bf16.msra.mxu0 %v3776_v14 }
  0x53   : > { %3110 = vmatprep.subr.bf16.mxu0 %v3414_v3 }
  0x56   : > { %3112 = vmatpush3.bf16.msra.mxu0 %v3789_v17 }
  0x57   : > { %3113 = vmatprep.subr.bf16.mxu0 %v3414_v3 }
  0x59   : > { %2661 = vmatmul.mubr.f32.vlgmr.msra.gmra.mrb[0].mxu0 %v462_v52 }
  0x5a   : > { %3115 = vmatpush3.bf16.msra.mxu0 %v3697_v2  ;;  %2687 = vmatprep.mubr.msk.f32.mxu0 %vm3415_vm0, %v3416_v10  ;;  %v1002_v2 = vld [vmem:[%s4276_s4 + $0x60] sm:$0xff] }
  0x5b   : > { %3116 = vmatprep.subr.bf16.mxu0 %v3414_v3 }
  0x5e   : > { %3118 = vmatpush3.bf16.msra.mxu0 %v3703_v5  ;;  %v1003_v5 = vld [vmem:[%s4276_s4 + $0x68] sm:$0xff] }
  0x5f   : > { %3119 = vmatprep.subr.bf16.mxu0 %v3414_v3 }
  0x62   : > { %3121 = vmatpush3.bf16.msra.mxu0 %v3709_v6  ;;  %v1043_v6 = vand.u32 4294901760, %v1002_v2 }
  0x63   : > { %3122 = vmatprep.subr.bf16.mxu0 %v3414_v3 }
  0x64   : > { %v3924_v35 = vsub.f32 %v1002_v2, %v1043_v6  ;;  %v1157_v2 = vsub.f32 %v3915_v26, %v1156_v53 }
  0x66   : > { %3124 = vmatpush3.bf16.msra.mxu0 %v3711_v7  ;;  %v1046_v7 = vand.u32 4294901760, %v1003_v5  ;;  %v4286_v49 = vand.u32 4294901760, %v3924_v35 }
  0x67   : > { %3125 = vmatprep.subr.bf16.mxu0 %v3414_v3 }
  0x68   : > { %v3907_v11 = vpack.c.bf16 %v1046_v7, %v1043_v6  ;;  %v3926_v39 = vsub.f32 %v1003_v5, %v1046_v7  ;;  %v1158_v6 = vand.u32 4294901760, %v1157_v2 }
  0x6a   : > { %3127 = vmatpush3.bf16.msra.mxu0 %v3725_v28  ;;  %v3917_v28 = vsub.f32 %v999_v58, %v1034_v60  ;;  %v1143_v58 = vsub.f32 %v3871_v51, %v1142_v45 }
  0x6b   : > { %3128 = vmatprep.subr.bf16.mxu0 %v3414_v3 }
  0x6c   : > { %v1144_v60 = vand.u32 4294901760, %v1143_v58  ;;  %v4284_v58 = vand.u32 4294901760, %v3933_v61 }
  0x6e   : > { %3130 = vmatpush3.bf16.msra.mxu0 %v3727_v29 }
  0x6f   : > { %3131 = vmatprep.subr.bf16.mxu0 %v3414_v3 }
  0x71   : > { %2688 = vmatmul.mubr.f32.vlgmr.msra.gmra.mrb[0].mxu0 %v3756_v9 }
  0x72   : > { %3133 = vmatpush3.bf16.msra.mxu0 %v3674_v43  ;;  %2714 = vmatprep.mubr.msk.f32.mxu0 %vm3415_vm0, %v3416_v10  ;;  %v1000_v43 = vld [vmem:[%s4276_s4 + $0x50] sm:$0xff] }
  0x73   : > { %3134 = vmatprep.subr.bf16.mxu0 %v3414_v3 }
  0x76   : > { %3136 = vmatpush3.bf16.msra.mxu0 %v3683_v0  ;;  %v1037_v0 = vand.u32 4294901760, %v1000_v43 }
  0x77   : > { %3137 = vmatprep.subr.bf16.mxu0 %v3414_v3 }
  0x78   : > { %v3897_v4 = vpack.c.bf16 %v1040_v1, %v1037_v0  ;;  %v3919_v29 = vsub.f32 %v1000_v43, %v1037_v0  ;;  %v1151_v43 = vand.u32 4294901760, %v1150_v59  ;;  %v4289_v0 = vand.u32 4294901760, %v3917_v28 }
  0x7a   : > { %3139 = vmatpush3.bf16.msra.mxu0 %v3740_v62  ;;  %3166 = vmatpush3.bf16.msra.mxu1 %v3897_v4  ;;  %v3935_v62 = vsub.f32 %v1005_v25, %v1052_v56  ;;  %v3183_v1 = vpack.c.bf16 %v1151_v43, %v1144_v60  ;;  %v1164_v5 = vsub.f32 %v3917_v28, %v4289_v0  ;;  %v4288_v24 = vand.u32 4294901760, %v3919_v29 }
  0x7b   : > { %3140 = vmatprep.subr.bf16.mxu0 %v3414_v3  ;;  %3167 = vmatprep.subr.bf16.mxu1 %v3414_v3  ;;  %v4287_v25 = vand.u32 4294901760, %v3921_v30  ;;  %v1199_v43 = vsub.f32 %v3933_v61, %v4284_v58 }
  0x7c   : > { %v1165_v7 = vand.u32 4294901760, %v1164_v5  ;;  %v1171_v56 = vsub.f32 %v3919_v29, %v4288_v24  ;;  %v4283_v59 = vand.u32 4294901760, %v3935_v62 }
  0x7d   : > { %v1178_v38 = vsub.f32 %v3921_v30, %v4287_v25  ;;  %v1200_v5 = vand.u32 4294901760, %v1199_v43  ;;  %v2314_v43 = vld [vmem:[%s4274_s2] ss:$0 sm:$0xff] }
  0x7e   : > { %3142 = vmatpush3.bf16.msra.mxu0 %v3764_v12  ;;  %3169 = vmatpush3.bf16.msra.mxu1 %v3907_v11  ;;  %v1121_v12 = vand.u32 4294901760, %v3748_v44  ;;  %v3186_v54 = vpack.c.bf16 %v1165_v7, %v1158_v6  ;;  %v1172_v8 = vand.u32 4294901760, %v1171_v56  ;;  %v1206_v2 = vsub.f32 %v3935_v62, %v4283_v59 }
  0x7f   : > { %3143 = vmatprep.subr.bf16.mxu0 %v3414_v3  ;;  %3170 = vmatprep.subr.bf16.mxu1 %v3414_v3  ;;  %v1179_v13 = vand.u32 4294901760, %v1178_v38  ;;  %v3198_v56 = vpack.c.bf16 %v3744_v37, %v3742_v34  ;;  %v3201_v38 = vpack.c.bf16 %v3748_v44, %v3746_v42  ;;  %v3252_v34 = vpack.c.bf16 %v1135_v18, %v1128_v19 }
  0x80   : > { %v1207_v6 = vand.u32 4294901760, %v1206_v2  ;;  %v3255_v37 = vpack.c.bf16 %v1149_v47, %v1142_v45  ;;  %v1670_v45 = vld [vmem:[%s4279_s7 + $0x30] sm:$0xff]  ;;  %v1671_v47 = vld [vmem:[%s4279_s7 + $0x38] sm:$0xff] }
  0x82   : > { %3145 = vmatpush3.bf16.msra.mxu0 %v3776_v14  ;;  %3172 = vmatpush3.bf16.msra.mxu1 %v3931_v36  ;;  %v1122_v14 = vsub.f32 %v3748_v44, %v1121_v12  ;;  %v3195_v7 = vpack.c.bf16 %v1207_v6, %v1200_v5  ;;  %v2315_v6 = vld [vmem:[%s4275_s3] ss:$0 sm:$0xff] }
  0x83   : > { %3146 = vmatprep.subr.bf16.mxu0 %v3414_v3  ;;  %3173 = vmatprep.subr.bf16.mxu1 %v3414_v3 }
  0x86   : > { %3148 = vmatpush3.bf16.msra.mxu0 %v3789_v17  ;;  %v1123_v17 = vand.u32 4294901760, %v1122_v14  ;;  %v3189_v14 = vpack.c.bf16 %v1179_v13, %v1172_v8  ;;  %v3204_v8 = vpack.c.bf16 %v3754_v48, %v3751_v46  ;;  %v3207_v13 = vpack.c.bf16 %v3873_v55, %v3871_v51 }
  0x87   : > { %3293 = vmatprep.subr.bf16.mxu0 %v3414_v3  ;;  %v4292_v46 = vand.u32 4294901760, %v3919_v29  ;;  %v4293_v48 = vand.u32 4294901760, %v3921_v30  ;;  %v4294_v51 = vand.u32 4294901760, %v3924_v35  ;;  %v4295_v55 = vand.u32 4294901760, %v3926_v39 }
  0x89   : > { %2715 = vmatmul.mubr.f32.vlgmr.msra.gmra.mrb[0].mxu0 %v3756_v9  ;;  %v1114_v9 = vand.u32 4294901760, %v3746_v42 }
  0x8a   : > { %2943 = vmatprep.mubr.msk.f32.mxu0 %vm3415_vm0, %v3416_v10 }
  0x8b   : > { %v1115_v52 = vsub.f32 %v3746_v42, %v1114_v9  ;;  %v4291_v42 = vand.u32 4294901760, %v3917_v28 }
  0x8d   : > { %v1116_v16 = vand.u32 4294901760, %v1115_v52  ;;  %v4285_v52 = vand.u32 4294901760, %v3926_v39  ;;  %v3258_v44 = vpack.c.bf16 %v4291_v42, %v1156_v53 }
  0x8f   : > { %v3957_v40 = vpack.c.bf16 %v1123_v17, %v1116_v16  ;;  %v1185_v16 = vsub.f32 %v3924_v35, %v4286_v49  ;;  %v1192_v17 = vsub.f32 %v3926_v39, %v4285_v52 }
  0x91   : > { %v1186_v31 = vand.u32 4294901760, %v1185_v16  ;;  %v1193_v41 = vand.u32 4294901760, %v1192_v17  ;;  %v3210_v16 = vpack.c.bf16 %v3917_v28, %v3915_v26  ;;  %v3213_v17 = vpack.c.bf16 %v3921_v30, %v3919_v29 }
  0x92   : > { %v4296_v26 = vand.u32 4294901760, %v3933_v61  ;;  %v4297_v28 = vand.u32 4294901760, %v3935_v62 }
  0x93   : > { %v3192_v60 = vpack.c.bf16 %v1193_v41, %v1186_v31  ;;  %v3219_v31 = vpack.c.bf16 %v3935_v62, %v3933_v61 }
  0xff   : > { %v466_v22 = vpop.f32.mrb[0].mxu1 }
 0x100   : > { %v2581_v27 = vpop.f32.mrb[1].mxu1 }
 0x101   : > { %v3216_v27 = vpack.c.bf16 %v3926_v39, %v3924_v35  ;;  %v1668_v39 = vld [vmem:[%s4279_s7 + $0x20] sm:$0xff] }
 0x102   : > { %v1696_v61 = vand.u32 4294901760, %v1668_v39 }
 0x15c   : > { %v968_v41 = vpop.f32.mrb[0].mxu0 }
 0x15d   : > { %v3365_v2 = vadd.f32 %v968_v41, %v466_v22  ;;  %v2716_v5 = vpop.f32.mrb[1].mxu0 }
 0x15f   : > { %v979_v59 = vmul.f32 %v3365_v2, %v2314_v43 }
 0x161   : > { %v987_v58 = vadd.f32 %v2315_v6, %v979_v59 }
 0x163   : > { %v988_v52 = vmax.f32 %v987_v58, 0.0 }
 0x165   : > { %989 = vst [vmem:[%s361_s27] sm:$0xff] %v988_v52  ;;  %v4033_v49 = vand.u32 4294901760, %v988_v52 }
 0x167   : > { %v1088_v25 = vsub.f32 %v988_v52, %v4033_v49 }
 0x169   : > { %v1089_v24 = vand.u32 4294901760, %v1088_v25 }
 0x16b   : > { %v1090_v0 = vsub.f32 %v1088_v25, %v1089_v24 }
 0x16d   : > { %v1091_v22 = vand.u32 4294901760, %v1090_v0  ;;  %v4182_v0 = vsub.f32 %v1668_v39, %v1696_v61 }
 0x16f   : > { %2750 = vmatmul.mubr.f32.vlgmr.msra.gmra.mrb[2].mxu1 %v1091_v22  ;;  %v1797_v41 = vand.u32 4294901760, %v4182_v0 }
 0x170   : > { %3175 = vmatpush3.bf16.msra.mxu1 %v3953_v15  ;;  %2784 = vmatprep.mubr.msk.f32.mxu1 %vm3415_vm0, %v3416_v10  ;;  %v3246_v15 = vpack.c.bf16 %v1107_v33, %v1100_v32  ;;  %v3261_v32 = vpack.c.bf16 %v4293_v48, %v4292_v46  ;;  %v3264_v33 = vpack.c.bf16 %v4295_v55, %v4294_v51 }
 0x171   : > { %3176 = vmatprep.subr.bf16.mxu1 %v3414_v3  ;;  %v1798_v5 = vsub.f32 %v4182_v0, %v1797_v41 }
 0x173   : > { %v1799_v22 = vand.u32 4294901760, %v1798_v5 }
 0x174   : > { %3178 = vmatpush3.bf16.msra.mxu1 %v3957_v40  ;;  %v3249_v40 = vpack.c.bf16 %v1121_v12, %v1114_v9  ;;  %v3267_v9 = vpack.c.bf16 %v4297_v28, %v4296_v26 }
 0x175   : > { %3179 = vmatprep.subr.bf16.mxu1 %v3414_v3 }
 0x178   : > { %3181 = vmatpush3.bf16.msra.mxu1 %v3967_v57 }
 0x179   : > { %3182 = vmatprep.subr.bf16.mxu1 %v3414_v3 }
 0x17c   : > { %3184 = vmatpush3.bf16.msra.mxu1 %v3183_v1 }
 0x17d   : > { %3185 = vmatprep.subr.bf16.mxu1 %v3414_v3 }
 0x180   : > { %3187 = vmatpush3.bf16.msra.mxu1 %v3186_v54 }
 0x181   : > { %3188 = vmatprep.subr.bf16.mxu1 %v3414_v3 }
 0x184   : > { %3190 = vmatpush3.bf16.msra.mxu1 %v3189_v14 }
 0x185   : > { %3191 = vmatprep.subr.bf16.mxu1 %v3414_v3 }
 0x188   : > { %3193 = vmatpush3.bf16.msra.mxu1 %v3192_v60 }
 0x189   : > { %3194 = vmatprep.subr.bf16.mxu1 %v3414_v3 }
 0x18c   : > { %3196 = vmatpush3.bf16.msra.mxu1 %v3195_v7 }
 0x18d   : > { %3197 = vmatprep.subr.bf16.mxu1 %v3414_v3 }
 0x18f   : > { %2785 = vmatmul.mubr.f32.vlgmr.msra.gmra.mrb[2].mxu1 %v4033_v49 }
 0x190   : > { %3199 = vmatpush3.bf16.msra.mxu1 %v3198_v56  ;;  %2819 = vmatprep.mubr.msk.f32.mxu1 %vm3415_vm0, %v3416_v10 }
 0x191   : > { %3200 = vmatprep.subr.bf16.mxu1 %v3414_v3 }
 0x194   : > { %3202 = vmatpush3.bf16.msra.mxu1 %v3201_v38 }
 0x195   : > { %3203 = vmatprep.subr.bf16.mxu1 %v3414_v3 }
 0x198   : > { %3205 = vmatpush3.bf16.msra.mxu1 %v3204_v8 }
 0x199   : > { %3206 = vmatprep.subr.bf16.mxu1 %v3414_v3 }
 0x19c   : > { %3208 = vmatpush3.bf16.msra.mxu1 %v3207_v13 }
 0x19d   : > { %3209 = vmatprep.subr.bf16.mxu1 %v3414_v3 }
 0x1a0   : > { %3211 = vmatpush3.bf16.msra.mxu1 %v3210_v16 }
 0x1a1   : > { %3212 = vmatprep.subr.bf16.mxu1 %v3414_v3 }
 0x1a4   : > { %3214 = vmatpush3.bf16.msra.mxu1 %v3213_v17 }
 0x1a5   : > { %3215 = vmatprep.subr.bf16.mxu1 %v3414_v3 }
 0x1a8   : > { %3217 = vmatpush3.bf16.msra.mxu1 %v3216_v27 }
 0x1a9   : > { %3218 = vmatprep.subr.bf16.mxu1 %v3414_v3 }
 0x1ac   : > { %3220 = vmatpush3.bf16.msra.mxu1 %v3219_v31 }
 0x1ad   : > { %3221 = vmatprep.subr.bf16.mxu1 %v3414_v3 }
 0x1af   : > { %2820 = vmatmul.mubr.f32.vlgmr.msra.gmra.mrb[2].mxu1 %v1088_v25  ;;  %v1705_v25 = vand.u32 4294901760, %v1671_v47 }
 0x1b0   : > { %3223 = vmatpush3.bf16.msra.mxu1 %v3793_v23  ;;  %2854 = vmatprep.mubr.msk.f32.mxu1 %vm3415_vm0, %v3416_v10 }
 0x1b1   : > { %3224 = vmatprep.subr.bf16.mxu1 %v3414_v3  ;;  %v4193_v58 = vsub.f32 %v1671_v47, %v1705_v25 }
 0x1b4   : > { %3226 = vmatpush3.bf16.msra.mxu1 %v3800_v20 }
 0x1b5   : > { %3227 = vmatprep.subr.bf16.mxu1 %v3414_v3 }
 0x1b8   : > { %3229 = vmatpush3.bf16.msra.mxu1 %v3809_v21 }
 0x1b9   : > { %3230 = vmatprep.subr.bf16.mxu1 %v3414_v3 }
 0x1bc   : > { %3232 = vmatpush3.bf16.msra.mxu1 %v3869_v50 }
 0x1bd   : > { %3233 = vmatprep.subr.bf16.mxu1 %v3414_v3 }
 0x1c0   : > { %3235 = vmatpush3.bf16.msra.mxu1 %v3887_v63 }
 0x1c1   : > { %3236 = vmatprep.subr.bf16.mxu1 %v3414_v3 }
 0x1c4   : > { %3238 = vmatpush3.bf16.msra.mxu1 %v3897_v4 }
 0x1c5   : > { %3239 = vmatprep.subr.bf16.mxu1 %v3414_v3 }
 0x1c8   : > { %3241 = vmatpush3.bf16.msra.mxu1 %v3907_v11 }
 0x1c9   : > { %3242 = vmatprep.subr.bf16.mxu1 %v3414_v3 }
 0x1cc   : > { %3244 = vmatpush3.bf16.msra.mxu1 %v3931_v36 }
 0x1cd   : > { %3245 = vmatprep.subr.bf16.mxu1 %v3414_v3 }
 0x1cf   : > { %2855 = vmatmul.mubr.f32.vlgmr.msra.gmra.mrb[2].mxu1 %v1089_v24  ;;  %v1702_v24 = vand.u32 4294901760, %v1670_v45 }
 0x1d0   : > { %3247 = vmatpush3.bf16.msra.mxu1 %v3246_v15  ;;  %2889 = vmatprep.mubr.msk.f32.mxu1 %vm3415_vm0, %v3416_v10 }
 0x1d1   : > { %3248 = vmatprep.subr.bf16.mxu1 %v3414_v3  ;;  %v4189_v52 = vpack.c.bf16 %v1705_v25, %v1702_v24  ;;  %v4191_v14 = vsub.f32 %v1670_v45, %v1702_v24 }
 0x1d3   : > { %v3327_v26 = vpack.c.bf16 %v4193_v58, %v4191_v14 }
 0x1d4   : > { %3250 = vmatpush3.bf16.msra.mxu1 %v3249_v40  ;;  %v1811_v40 = vand.u32 4294901760, %v4191_v14 }
 0x1d5   : > { %3251 = vmatprep.subr.bf16.mxu1 %v3414_v3 }
 0x1d6   : > { %v1812_v42 = vsub.f32 %v4191_v14, %v1811_v40 }
 0x1d8   : > { %3253 = vmatpush3.bf16.msra.mxu1 %v3252_v34  ;;  %v1818_v34 = vand.u32 4294901760, %v4193_v58  ;;  %v1813_v46 = vand.u32 4294901760, %v1812_v42 }
 0x1d9   : > { %3254 = vmatprep.subr.bf16.mxu1 %v3414_v3 }
 0x1dc   : > { %3256 = vmatpush3.bf16.msra.mxu1 %v3255_v37 }
 0x1dd   : > { %3257 = vmatprep.subr.bf16.mxu1 %v3414_v3 }
 0x1e0   : > { %3259 = vmatpush3.bf16.msra.mxu1 %v3258_v44  ;;  %v1819_v44 = vsub.f32 %v4193_v58, %v1818_v34 }
 0x1e1   : > { %3260 = vmatprep.subr.bf16.mxu1 %v3414_v3 }
 0x1e2   : > { %v1820_v48 = vand.u32 4294901760, %v1819_v44 }
 0x1e4   : > { %3262 = vmatpush3.bf16.msra.mxu1 %v3261_v32  ;;  %v3315_v32 = vpack.c.bf16 %v1820_v48, %v1813_v46 }
 0x1e5   : > { %3263 = vmatprep.subr.bf16.mxu1 %v3414_v3 }
 0x1e8   : > { %3265 = vmatpush3.bf16.msra.mxu1 %v3264_v33 }
 0x1e9   : > { %3266 = vmatprep.subr.bf16.mxu1 %v3414_v3 }
 0x1ec   : > { %3268 = vmatpush3.bf16.msra.mxu1 %v3267_v9 }
 0x1ed   : > { %3269 = vmatprep.subr.bf16.mxu1 %v3414_v3 }
 0x1ef   : > { %2890 = vmatmul.mubr.f32.vlgmr.msra.gmra.mrb[2].mxu1 %v4033_v49 }
 0x1f0   : > { %3271 = vmatpush3.bf16.msra.mxu1 %v3793_v23  ;;  %2924 = vmatprep.mubr.msk.f32.mxu1 %vm3415_vm0, %v3416_v10  ;;  %v1664_v23 = vld [vmem:[%s4279_s7] sm:$0xff] }
 0x1f1   : > { %3272 = vmatprep.subr.bf16.mxu1 %v3414_v3 }
 0x1f4   : > { %3274 = vmatpush3.bf16.msra.mxu1 %v3800_v20  ;;  %v1665_v20 = vld [vmem:[%s4279_s7 + $0x8] sm:$0xff] }
 0x1f5   : > { %3275 = vmatprep.subr.bf16.mxu1 %v3414_v3 }
 0x1f8   : > { %3277 = vmatpush3.bf16.msra.mxu1 %v3809_v21  ;;  %v1684_v21 = vand.u32 4294901760, %v1664_v23 }
 0x1f9   : > { %3278 = vmatprep.subr.bf16.mxu1 %v3414_v3 }
 0x1fa   : > { %v4165_v12 = vsub.f32 %v1664_v23, %v1684_v21 }
 0x1fc   : > { %3280 = vmatpush3.bf16.msra.mxu1 %v3869_v50  ;;  %v1687_v50 = vand.u32 4294901760, %v1665_v20  ;;  %v1769_v54 = vand.u32 4294901760, %v4165_v12 }
 0x1fd   : > { %3281 = vmatprep.subr.bf16.mxu1 %v3414_v3 }
 0x1fe   : > { %v4167_v19 = vsub.f32 %v1665_v20, %v1687_v50  ;;  %v1770_v59 = vsub.f32 %v4165_v12, %v1769_v54  ;;  %v3351_v20 = vpack.c.bf16 %v1818_v34, %v1811_v40 }
 0x200   : > { %3283 = vmatpush3.bf16.msra.mxu1 %v3887_v63  ;;  %v4145_v63 = vpack.c.bf16 %v1687_v50, %v1684_v21  ;;  %v1771_v7 = vand.u32 4294901760, %v1770_v59  ;;  %v3318_v51 = vpack.c.bf16 %v4167_v19, %v4165_v12  ;;  %v2316_v21 = vld [vmem:[%s4277_s5] ss:$0 sm:$0xff] }
 0x201   : > { %3284 = vmatprep.subr.bf16.mxu1 %v3414_v3 }
 0x202   : > { %3295 = vmatpush3.bf16.msra.mxu0 %v4145_v63 }
 0x203   : > { %3296 = vmatprep.subr.bf16.mxu0 %v3414_v3 }
 0x204   : > { %3286 = vmatpush3.bf16.msra.mxu1 %v3897_v4  ;;  %v1666_v4 = vld [vmem:[%s4279_s7 + $0x10] sm:$0xff] }
 0x205   : > { %3287 = vmatprep.subr.bf16.mxu1 %v3414_v3  ;;  %v1690_v29 = vand.u32 4294901760, %v1666_v4 }
 0x207   : > { %v4177_v57 = vsub.f32 %v1666_v4, %v1690_v29  ;;  %v2317_v4 = vld [vmem:[%s4278_s6] ss:$0 sm:$0xff] }
 0x208   : > { %3289 = vmatpush3.bf16.msra.mxu1 %v3907_v11  ;;  %v1667_v11 = vld [vmem:[%s4279_s7 + $0x18] sm:$0xff] }
 0x209   : > { %3290 = vmatprep.subr.bf16.mxu1 %v3414_v3  ;;  %v1693_v30 = vand.u32 4294901760, %v1667_v11  ;;  %v1783_v56 = vand.u32 4294901760, %v4177_v57 }
 0x20b   : > { %v4155_v35 = vpack.c.bf16 %v1693_v30, %v1690_v29  ;;  %v4179_v53 = vsub.f32 %v1667_v11, %v1693_v30  ;;  %v1784_v13 = vsub.f32 %v4177_v57, %v1783_v56 }
 0x20c   : > { %3292 = vmatpush3.bf16.msra.mxu1 %v3931_v36  ;;  %v1669_v36 = vld [vmem:[%s4279_s7 + $0x28] sm:$0xff] }
 0x20d   : > { %3298 = vmatpush3.bf16.msra.mxu0 %v4155_v35  ;;  %v1699_v62 = vand.u32 4294901760, %v1669_v36  ;;  %v1790_v38 = vand.u32 4294901760, %v4179_v53  ;;  %v1785_v27 = vand.u32 4294901760, %v1784_v13  ;;  %v3321_v55 = vpack.c.bf16 %v4179_v53, %v4177_v57 }
 0x20e   : > { %3299 = vmatprep.subr.bf16.mxu0 %v3414_v3 }
 0x20f   : > { %2925 = vmatmul.mubr.f32.vlgmr.msra.gmra.mrb[2].mxu1 %v4033_v49  ;;  %v4169_v18 = vpack.c.bf16 %v1699_v62, %v1696_v61  ;;  %v4184_v1 = vsub.f32 %v1669_v36, %v1699_v62  ;;  %v1776_v49 = vand.u32 4294901760, %v4167_v19  ;;  %v1791_v16 = vsub.f32 %v4179_v53, %v1790_v38 }
 0x210   : > { %v3345_v9 = vpack.c.bf16 %v1790_v38, %v1783_v56 }
 0x211   : > { %3301 = vmatpush3.bf16.msra.mxu0 %v4169_v18  ;;  %v1777_v60 = vsub.f32 %v4167_v19, %v1776_v49  ;;  %v1792_v31 = vand.u32 4294901760, %v1791_v16  ;;  %v1804_v43 = vand.u32 4294901760, %v4184_v1  ;;  %v3324_v33 = vpack.c.bf16 %v4184_v1, %v4182_v0 }
 0x212   : > { %3302 = vmatprep.subr.bf16.mxu0 %v3414_v3  ;;  %v3342_v28 = vpack.c.bf16 %v1776_v49, %v1769_v54 }
 0x213   : > { %v1778_v8 = vand.u32 4294901760, %v1777_v60  ;;  %v3309_v2 = vpack.c.bf16 %v1792_v31, %v1785_v27  ;;  %v1805_v6 = vsub.f32 %v4184_v1, %v1804_v43  ;;  %v3348_v23 = vpack.c.bf16 %v1804_v43, %v1797_v41 }
 0x215   : > { %3304 = vmatpush3.bf16.msra.mxu0 %v4189_v52  ;;  %v3306_v17 = vpack.c.bf16 %v1778_v8, %v1771_v7  ;;  %v1806_v15 = vand.u32 4294901760, %v1805_v6 }
 0x216   : > { %3305 = vmatprep.subr.bf16.mxu0 %v3414_v3 }
 0x217   : > { %v3312_v37 = vpack.c.bf16 %v1806_v15, %v1799_v22 }
 0x2e2   : > { %v1643_v50 = vpop.f32.mrb[2].mxu1 }
 0x2e3   : > { %v1654_v11 = vmul.f32 %v2316_v21, %v1643_v50  ;;  %v2926_v29 = vpop.f32.mrb[3].mxu1 }
 0x2e5   : > { %v1662_v30 = vadd.f32 %v2317_v4, %v1654_v11 }
 0x2e7   : > { %v1663_v39 = vmax.f32 %v1662_v30, 0.0 }
 0x2e9   : > { %v1681_v36 = vsel %vm1679_vm2, %v1663_v39, 0 }
 0x2ea   : > { %v1756_v61 = vand.u32 4294901760, %v1681_v36 }
 0x2ec   : > { %v1757_v62 = vsub.f32 %v1681_v36, %v1756_v61 }
 0x2ee   : > { %v1758_v12 = vand.u32 4294901760, %v1757_v62 }
 0x2f0   : > { %v1759_v19 = vsub.f32 %v1757_v62, %v1758_v12 }
 0x2f2   : > { %v1760_v45 = vand.u32 4294901760, %v1759_v19 }
 0x2f4   : > { %2944 = vmatmul.mubr.f32.vlgmr.msra.gmra.mrb[2].mxu0 %v1760_v45 }
 0x2f5   : > { %3307 = vmatpush3.bf16.msra.mxu0 %v3306_v17  ;;  %2962 = vmatprep.mubr.msk.f32.mxu0 %vm3415_vm0, %v3416_v10 }
 0x2f6   : > { %3308 = vmatprep.subr.bf16.mxu0 %v3414_v3 }
 0x2f9   : > { %3310 = vmatpush3.bf16.msra.mxu0 %v3309_v2 }
 0x2fa   : > { %3311 = vmatprep.subr.bf16.mxu0 %v3414_v3 }
 0x2fd   : > { %3313 = vmatpush3.bf16.msra.mxu0 %v3312_v37 }
 0x2fe   : > { %3314 = vmatprep.subr.bf16.mxu0 %v3414_v3 }
 0x301   : > { %3316 = vmatpush3.bf16.msra.mxu0 %v3315_v32 }
 0x302   : > { %3317 = vmatprep.subr.bf16.mxu0 %v3414_v3 }
 0x304   : > { %2963 = vmatmul.mubr.f32.vlgmr.msra.gmra.mrb[2].mxu0 %v1756_v61 }
 0x305   : > { %3319 = vmatpush3.bf16.msra.mxu0 %v3318_v51  ;;  %2981 = vmatprep.mubr.msk.f32.mxu0 %vm3415_vm0, %v3416_v10 }
 0x306   : > { %3320 = vmatprep.subr.bf16.mxu0 %v3414_v3 }
 0x309   : > { %3322 = vmatpush3.bf16.msra.mxu0 %v3321_v55 }
 0x30a   : > { %3323 = vmatprep.subr.bf16.mxu0 %v3414_v3 }
 0x30d   : > { %3325 = vmatpush3.bf16.msra.mxu0 %v3324_v33 }
 0x30e   : > { %3326 = vmatprep.subr.bf16.mxu0 %v3414_v3 }
 0x311   : > { %3328 = vmatpush3.bf16.msra.mxu0 %v3327_v26 }
 0x312   : > { %3329 = vmatprep.subr.bf16.mxu0 %v3414_v3 }
 0x314   : > { %2982 = vmatmul.mubr.f32.vlgmr.msra.gmra.mrb[2].mxu0 %v1757_v62 }
 0x315   : > { %3331 = vmatpush3.bf16.msra.mxu0 %v4145_v63  ;;  %3000 = vmatprep.mubr.msk.f32.mxu0 %vm3415_vm0, %v3416_v10 }
 0x316   : > { %3332 = vmatprep.subr.bf16.mxu0 %v3414_v3 }
 0x319   : > { %3334 = vmatpush3.bf16.msra.mxu0 %v4155_v35 }
 0x31a   : > { %3335 = vmatprep.subr.bf16.mxu0 %v3414_v3 }
 0x31d   : > { %3337 = vmatpush3.bf16.msra.mxu0 %v4169_v18 }
 0x31e   : > { %3338 = vmatprep.subr.bf16.mxu0 %v3414_v3 }
 0x321   : > { %3340 = vmatpush3.bf16.msra.mxu0 %v4189_v52 }
 0x322   : > { %3341 = vmatprep.subr.bf16.mxu0 %v3414_v3 }
 0x324   : > { %3001 = vmatmul.mubr.f32.vlgmr.msra.gmra.mrb[2].mxu0 %v1758_v12 }
 0x325   : > { %3343 = vmatpush3.bf16.msra.mxu0 %v3342_v28  ;;  %3019 = vmatprep.mubr.msk.f32.mxu0 %vm3415_vm0, %v3416_v10 }
 0x326   : > { %3344 = vmatprep.subr.bf16.mxu0 %v3414_v3 }
 0x329   : > { %3346 = vmatpush3.bf16.msra.mxu0 %v3345_v9 }
 0x32a   : > { %3347 = vmatprep.subr.bf16.mxu0 %v3414_v3 }
 0x32d   : > { %3349 = vmatpush3.bf16.msra.mxu0 %v3348_v23 }
 0x32e   : > { %3350 = vmatprep.subr.bf16.mxu0 %v3414_v3 }
 0x331   : > { %3352 = vmatpush3.bf16.msra.mxu0 %v3351_v20 }
 0x332   : > { %3353 = vmatprep.subr.bf16.mxu0 %v3414_v3 }
 0x334   : > { %3020 = vmatmul.mubr.f32.vlgmr.msra.gmra.mrb[2].mxu0 %v1756_v61 }
 0x335   : > { %3355 = vmatpush3.bf16.msra.mxu0 %v4145_v63  ;;  %3038 = vmatprep.mubr.msk.f32.mxu0 %vm3415_vm0, %v3416_v10  ;;  %v2318_v63 = vld [vmem:[%s4280_s8] ss:$0 sm:$0xff] }
 0x336   : > { %3356 = vmatprep.subr.bf16.mxu0 %v3414_v3 }
 0x339   : > { %3358 = vmatpush3.bf16.msra.mxu0 %v4155_v35 }
 0x33a   : > { %3359 = vmatprep.subr.bf16.mxu0 %v3414_v3 }
 0x33d   : > { %3361 = vmatpush3.bf16.msra.mxu0 %v4169_v18 }
 0x33e   : > { %3362 = vmatprep.subr.bf16.mxu0 %v3414_v3 }
 0x341   : > { %3364 = vmatpush3.bf16.msra.mxu0 %v4189_v52 }
 0x344   : > { %3039 = vmatmul.mubr.f32.vlgmr.msra.gmra.mrb[2].mxu0 %v1756_v61 }
 0x417   : > { %v2216_v10 = vpop.f32.mrb[2].mxu0 }
 0x418   : > { %v3366_v35 = vadd.f32 %v2318_v63, %v2216_v10  ;;  %v3040_v47 = vpop.f32.mrb[3].mxu0 }
 0x41a   : > { %2221 = vst.msk [vmem:[%s365_s16] sm:$0xff] %vm2220_vm3, %v3366_v35 }
 0x41b PF: > { %s21_s13 = sadd.s32 1, %s3412_s13  }
 0x41c   : > { %p18_p4 = scmp.ge.s32.totalorder %s21_s13, 4  }
 0x41e   :  { %20 = sbr.rel (!%p18_p4) target bundleno = 1 (0x1), region = 98 }

// kernel: encoder_forward.5
= control target key start
LH: loop header
LB: loop body
LE: loop exit
PB: predicated region body
PF: predicated region fallthrough
CT: control target
= control target key end

     0   :  { %s8775_s0 = inlined_call_operand.vmem [shape: f32[2,8,32], index: 0, kind: input, shape index: {}]   ;;  %s8776_s1 = inlined_call_operand.vmem [shape: f32[2,8,32], index: 1, kind: input, shape index: {}]   ;;  %s8777_s2 = inlined_call_operand.vmem [shape: f32[32,96], index: 2, kind: input, shape index: {}]   ;;  %s8778_s3 = inlined_call_operand.vmem [shape: f32[32,96], index: 3, kind: input, shape index: {}]   ;;  %s8779_s4 = inlined_call_operand.vmem [shape: f32[32,96], index: 4, kind: input, shape index: {}]   ;;  %s8780_s5 = inlined_call_operand.vmem [shape: f32[1,96], index: 5, kind: input, shape index: {}]   ;;  %s8781_s6 = inlined_call_operand.vmem [shape: f32[1,96], index: 6, kind: input, shape index: {}]   ;;  %s8782_s7 = inlined_call_operand.vmem [shape: f32[32,128], index: 7, kind: input, shape index: {}]   ;;  %s8783_s8 = inlined_call_operand.vmem [shape: f32[1,128], index: 8, kind: input, shape index: {}]   ;;  %s8784_s9 = inlined_call_operand.hbm [shape: f32[2,8,32], index: 9, kind: output, shape index: {0}]   ;;  %s8785_s10 = inlined_call_operand.vmem [shape: f32[2,8,128], index: 10, kind: output, shape index: {1}]  }
   0x1   :  { %8787 = sst [smem:[#allocation6_spill]] %s8775_s0 }
   0x2   :  { %8788 = sst [smem:[#allocation7_spill]] %s8776_s1 }
   0x3   :  { %16 = vsyncpa [#allocation4], 0 }
   0x4   :  { %18 = vsyncpa [#allocation4 + $0x1], 0  ;;  %s7959_s13 = smov 0   ;;  %s7961_s14 = smov 0  }
   0x5   :  { %s7963_s15 = smov 0   ;;  %s7965_s16 = smov 0  }
   0x6 LB: > { %s7980_s17 = sadd.s32 4294967295, %s7896_s16   ;;  %s6164_s18 = sadd.s32 4294967294, %s7896_s16   ;;  %s7896_s16 = sphi %s7965_s16, %s8797_s16   ;;  %s7892_s15 = sphi %s7963_s15, %s8796_s15   ;;  %s7888_s14 = sphi %s7961_s14, %s8795_s14   ;;  %s7884_s13 = sphi %s7959_s13, %s8794_s13  }
   0x7   : > { %s7984_s19 = sadd.s32 1, %s7896_s16   ;;  %s230_s20 = sadd.s32 1, %s7892_s15 }
   0x8   : > { %s227_s21 = ssub.s32 %s7896_s16, %s7984_s19  ;;  %p240_p0 = scmp.ne.s32.totalorder %s7892_s15, %s7888_s14 }
   0x9   : > { %p228_p1 = scmp.eq.s32.totalorder %s227_s21, 0  ;;  %p241_p2 = scmp.eq.s32.totalorder %s7980_s17, 1 }
   0xa   : > { %p246_p3 = scmp.ne.s32.totalorder %s7888_s14, %s7884_s13  ;;  %p247_p4 = scmp.eq.s32.totalorder %s6164_s18, 1 }
   0xb   : > { %s7995_s22 = scalar_select %p228_p1, %s7892_s15, %s230_s20  }
   0xc   : > { %p7997_p5 = por %p241_p2, %p240_p0  ;;  %p8001_p6 = por %p247_p4, %p246_p3 }
   0xd   : > { %p6167_p7 = scmp.ge.s32.totalorder %s7896_s16, 1  ;;  %p326_p8 = scmp.lt.s32.totalorder %s7896_s16, 3 }
   0xf   : > { %p327_p9 = pnand %p6167_p7, %p326_p8 }
  0x10   : > { %v389_v0 = vld [vmem:[%s8778_s3] sm:$0xff] (!%p327_p9)  ;;  %v390_v1 = vld [vmem:[%s8778_s3 + $0x8] sm:$0xff] (!%p327_p9)  ;;  %v7898_v3 = vmov (!%p327_p9), 0.0|0.0   ;;  %v391_v8 = vld [vmem:[%s8778_s3 + $0x10] sm:$0xff] (!%p327_p9)  ;;  %vm7899_vm0 = vmmov (!%p327_p9), 0   ;;  %v7900_v15 = vmov (!%p327_p9), 0.0  }
  0x11   : > { %330 = sbr.rel (%p327_p9) target bundleno = 6310 (0x18a6), region = 56  ;;  %v384_v2 = vld [vmem:[%s8777_s2] sm:$0xff] (!%p327_p9)  ;;  %7243 = vmatprep.subr.bf16.mxu1 (!%p327_p9), %v7898_v3  ;;  %7279 = vmatprep.subr.bf16.mxu0 (!%p327_p9), %v7898_v3  ;;  %v398_v4 = vand.u32 (!%p327_p9), 4294901760, %v389_v0  ;;  %v401_v5 = vand.u32 (!%p327_p9), 4294901760, %v390_v1  ;;  %v385_v6 = vld [vmem:[%s8777_s2 + $0x8] sm:$0xff] (!%p327_p9)  ;;  %v392_v9 = vld [vmem:[%s8778_s3 + $0x18] sm:$0xff] (!%p327_p9) }
  0x12   : > { %v886_v7 = vand.u32 (!%p327_p9), 4294901760, %v384_v2  ;;  %v889_v10 = vand.u32 (!%p327_p9), 4294901760, %v385_v6  ;;  %v404_v11 = vand.u32 (!%p327_p9), 4294901760, %v391_v8  ;;  %v407_v12 = vand.u32 (!%p327_p9), 4294901760, %v392_v9  ;;  %v386_v13 = vld [vmem:[%s8777_s2 + $0x10] sm:$0xff] (!%p327_p9)  ;;  %v387_v14 = vld [vmem:[%s8777_s2 + $0x18] sm:$0xff] (!%p327_p9)  ;;  %6525 = vmatprep.mubr.msk.f32.mxu1 (!%p327_p9), %vm7899_vm0, %v7900_v15  ;;  %6591 = vmatprep.mubr.msk.f32.mxu0 (!%p327_p9), %vm7899_vm0, %v7900_v15 }
  0x13   : > { %p371_p10 = scmp.lt.s32.totalorder (!%p327_p9), %s7980_s17, 1  ;;  %v8038_v16 = vpack.c.bf16 (!%p327_p9), %v401_v5, %v398_v4  ;;  %v8040_v17 = vsub.f32 (!%p327_p9), %v389_v0, %v398_v4  ;;  %v8042_v18 = vsub.f32 (!%p327_p9), %v390_v1, %v401_v5  ;;  %v892_v23 = vand.u32 (!%p327_p9), 4294901760, %v386_v13  ;;  %s8791_s1 = sld [smem:[#allocation7_spill]] (!%p327_p9)  ;;  %v1380_v58 = vld [vmem:[%s8779_s4] sm:$0xff] (!%p327_p9)  ;;  %v1381_v59 = vld [vmem:[%s8779_s4 + $0x8] sm:$0xff] (!%p327_p9)  ;;  %v1383_v4 = vld [vmem:[%s8779_s4 + $0x18] sm:$0xff] (!%p327_p9) }
  0x14   : > { %v8044_v19 = vpack.c.bf16 (!%p327_p9), %v889_v10, %v886_v7  ;;  %v8046_v20 = vsub.f32 (!%p327_p9), %v391_v8, %v404_v11  ;;  %v8050_v21 = vpack.c.bf16 (!%p327_p9), %v407_v12, %v404_v11  ;;  %v8052_v22 = vsub.f32 (!%p327_p9), %v392_v9, %v407_v12  ;;  %s8792_s0 = sld [smem:[#allocation6_spill]] (!%p327_p9)  ;;  %s7901_s29 = smov (!%p327_p9), 64  }
  0x15   : > { %7245 = vmatpush3.bf16.msra.mxu1 (!%p327_p9), %v8038_v16  ;;  %v895_v24 = vand.u32 (!%p327_p9), 4294901760, %v387_v14  ;;  %vm393_vm1 = vcmask (!%p327_p9), 261120   ;;  %v479_v25 = vand.u32 (!%p327_p9), 4294901760, %v8040_v17  ;;  %v486_v26 = vand.u32 (!%p327_p9), 4294901760, %v8042_v18  ;;  %s8786_s12 = sand.u32 (!%p327_p9), 1, %s7888_s14   ;;  %s8793_s27 = sand.u32 (!%p327_p9), 1, %s7888_s14  }
  0x16   : > { %7281 = vmatpush3.bf16.msra.mxu0 (!%p327_p9), %v8044_v19  ;;  %7246 = vmatprep.subr.bf16.mxu1 (!%p327_p9), %v7898_v3  ;;  %v493_v30 = vand.u32 (!%p327_p9), 4294901760, %v8046_v20  ;;  %v500_v31 = vand.u32 (!%p327_p9), 4294901760, %v8052_v22  ;;  %v8089_v38 = vsub.f32 (!%p327_p9), %v384_v2, %v886_v7  ;;  %v8091_v39 = vsub.f32 (!%p327_p9), %v385_v6, %v889_v10  ;;  %v1382_v2 = vld [vmem:[%s8779_s4 + $0x10] sm:$0xff] (!%p327_p9)  ;;  %s6168_s18 = sshll.u32 (!%p327_p9), %s8786_s12, 3  ;;  %s6049_s28 = scalar_lea.sflag (!%p327_p9), [#allocation4], %s8793_s27 }
  0x17   : > { %7282 = vmatprep.subr.bf16.mxu0 (!%p327_p9), %v7898_v3  ;;  %v8061_v27 = vpack.c.bf16 (!%p327_p9), %v895_v24, %v892_v23  ;;  %v480_v33 = vsub.f32 (!%p327_p9), %v8040_v17, %v479_v25  ;;  %v487_v34 = vsub.f32 (!%p327_p9), %v8042_v18, %v486_v26  ;;  %v8107_v48 = vsub.f32 (!%p327_p9), %v386_v13, %v892_v23 }
  0x18   : > { %s372_s30 = scalar_select %p371_p10, %s7980_s17, 1  ;;  %v494_v44 = vsub.f32 %v8046_v20, %v493_v30  ;;  %v501_v45 = vsub.f32 %v8052_v22, %v500_v31  ;;  %v7292_v51 = vpack.c.bf16 %v8091_v39, %v8089_v38  ;;  %v8117_v52 = vsub.f32 %v387_v14, %v895_v24 }
  0x19   : > { %7248 = vmatpush3.bf16.msra.mxu1 %v8050_v21  ;;  %v481_v42 = vand.u32 4294901760, %v480_v33  ;;  %v488_v43 = vand.u32 4294901760, %v487_v34  ;;  %v967_v60 = vand.u32 4294901760, %v8089_v38  ;;  %v974_v61 = vand.u32 4294901760, %v8091_v39 }
  0x1a   : > { %s8056_s11 = sshll.u32 %s372_s30, 3  ;;  %7284 = vmatpush3.bf16.msra.mxu0 %v8061_v27  ;;  %7249 = vmatprep.subr.bf16.mxu1 %v7898_v3  ;;  %v495_v54 = vand.u32 4294901760, %v494_v44  ;;  %v502_v55 = vand.u32 4294901760, %v501_v45  ;;  %v7295_v63 = vpack.c.bf16 %v8117_v52, %v8107_v48  ;;  %v1390_v0 = vand.u32 4294901760, %v1380_v58  ;;  %s7902_s30 = smov 96  }
  0x1b   : > { %s378_s20 = scalar_lea.vmem %s8791_s1, %s8056_s11  ;;  %s374_s26 = scalar_lea.vmem %s8792_s0, %s8056_s11  ;;  %7291 = vmatprep.subr.bf16.mxu0 %v7898_v3  ;;  %v7250_v53 = vpack.c.bf16 %v488_v43, %v481_v42  ;;  %v1393_v1 = vand.u32 4294901760, %v1381_v59  ;;  %v7256_v5 = vpack.c.bf16 %v8042_v18, %v8040_v17  ;;  %v7304_v6 = vpack.c.bf16 %v974_v61, %v967_v60 }
  0x1c   : > { %v388_v28 = vld [vmem:[%s378_s20] sm:$0xff]  ;;  %v7253_v62 = vpack.c.bf16 %v502_v55, %v495_v54  ;;  %v981_v7 = vand.u32 4294901760, %v8107_v48  ;;  %v988_v8 = vand.u32 4294901760, %v8117_v52  ;;  %v1396_v9 = vand.u32 4294901760, %v1382_v2  ;;  %s8354_s20 = scalar_lea.vmem [#allocation3], %s6168_s18 }
  0x1d   : > { %v383_v29 = vld [vmem:[%s374_s26] sm:$0xff]  ;;  %v395_v32 = vsel %vm393_vm1, %v388_v28, 0  ;;  %v1399_v10 = vand.u32 4294901760, %v1383_v4  ;;  %v8149_v11 = vsub.f32 %v1380_v58, %v1390_v0  ;;  %v8151_v12 = vsub.f32 %v1381_v59, %v1393_v1  ;;  %s6066_s12 = sshll.u32 %s8354_s20, 4  ;;  %s6067_s12 = int_to_ptr.vmem [resolvable:$true] %s6066_s12 }
  0x1e   : > { %v883_v35 = vsel %vm393_vm1, %v383_v29, 0  ;;  %v8084_v36 = vand.u32 4294901760, %v395_v32  ;;  %v7259_v13 = vpack.c.bf16 %v8052_v22, %v8046_v20  ;;  %v7307_v14 = vpack.c.bf16 %v988_v8, %v981_v7  ;;  %s7834_s18 = scalar_lea.vmem %s6067_s12, 128 }
  0x1f   : > { %v8086_v37 = vand.u32 4294901760, %v883_v35  ;;  %v1471_v23 = vand.u32 4294901760, %v8149_v11  ;;  %v1478_v24 = vand.u32 4294901760, %v8151_v12  ;;  %v8165_v28 = vsub.f32 %v1382_v2, %v1396_v9  ;;  %p7835_p11 = scmp.ne.s32.totalorder %s6067_s12, %s7834_s18 }
  0x20   : > { %v8094_v40 = vsub.f32 %v395_v32, %v8084_v36  ;;  %v8167_v29 = vsub.f32 %v1383_v4, %v1399_v10  ;;  %v8175_v32 = vpack.c.bf16 %v1393_v1, %v1390_v0  ;;  %v8189_v43 = vpack.c.bf16 %v1399_v10, %v1396_v9 }
  0x21   : > { %v8097_v41 = vsub.f32 %v883_v35, %v8086_v37  ;;  %v1472_v33 = vsub.f32 %v8149_v11, %v1471_v23  ;;  %v1479_v34 = vsub.f32 %v8151_v12, %v1478_v24  ;;  %v1485_v35 = vand.u32 4294901760, %v8165_v28  ;;  %p7836_p12 = pnand %p7835_p11, %p7997_p5 }
  0x22   : > { %v468_v46 = vand.u32 4294901760, %v8094_v40  ;;  %v1492_v42 = vand.u32 4294901760, %v8167_v29  ;;  %v7271_v17 = vpack.c.bf16 %v500_v31, %v493_v30  ;;  %v8234_v20 = vpack.c.bf16 %v8151_v12, %v8149_v11 }
  0x23   : > { %v956_v47 = vand.u32 4294901760, %v8097_v41  ;;  %v1473_v44 = vand.u32 4294901760, %v1472_v33  ;;  %v1480_v45 = vand.u32 4294901760, %v1479_v34  ;;  %v968_v22 = vsub.f32 %v8089_v38, %v967_v60  ;;  %v8338_v33 = vld [vmem:[%s8781_s6] sm:$0x1]  ;;  %p7837_p13 = pneg %p7836_p12 }
  0x24   : > { %v469_v49 = vsub.f32 %v8094_v40, %v468_v46  ;;  %v982_v38 = vsub.f32 %v8107_v48, %v981_v7  ;;  %vm1378_vm2 = vcmask 785408   ;;  %vm1904_vm3 = vcmask 253952  }
  0x25   : > { %v957_v50 = vsub.f32 %v8097_v41, %v956_v47  ;;  %v969_v30 = vand.u32 4294901760, %v968_v22 }
  0x26   : > { %v470_v56 = vand.u32 4294901760, %v469_v49  ;;  %v1486_v49 = vsub.f32 %v8165_v28, %v1485_v35 }
  0x27   : > { %v958_v57 = vand.u32 4294901760, %v957_v50  ;;  %v1493_v50 = vsub.f32 %v8167_v29, %v1492_v42 }
  0x28   : > { %6526 = vmatmul.mubr.f32.vlgmr.msra.gmra.mrb[0].mxu1 %v470_v56  ;;  %v1487_v54 = vand.u32 4294901760, %v1486_v49 }
  0x29   : > { %6592 = vmatmul.mubr.f32.vlgmr.msra.gmra.mrb[0].mxu0 %v958_v57  ;;  %7251 = vmatpush3.bf16.msra.mxu1 %v7250_v53  ;;  %v8211_v53 = vpack.c.bf16 %v1480_v45, %v1473_v44  ;;  %v1494_v55 = vand.u32 4294901760, %v1493_v50 }
  0x2a   : > { %7293 = vmatpush3.bf16.msra.mxu0 %v7292_v51  ;;  %7252 = vmatprep.subr.bf16.mxu1 %v7898_v3  ;;  %v7268_v51 = vpack.c.bf16 %v486_v26, %v479_v25  ;;  %v975_v25 = vsub.f32 %v8091_v39, %v974_v61  ;;  %v8248_v26 = vpack.c.bf16 %v8167_v29, %v8165_v28 }
  0x2b   : > { %7294 = vmatprep.subr.bf16.mxu0 %v7898_v3  ;;  %6613 = vmatprep.mubr.msk.f32.mxu0 %vm7899_vm0, %v7900_v15  ;;  %v8223_v18 = vpack.c.bf16 %v1494_v55, %v1487_v54  ;;  %v989_v39 = vsub.f32 %v8117_v52, %v988_v8 }
  0x2c   : > { %6536 = vmatprep.mubr.msk.f32.mxu1 %vm7899_vm0, %v7900_v15  ;;  %v976_v31 = vand.u32 4294901760, %v975_v25 }
  0x2d   : > { %7254 = vmatpush3.bf16.msra.mxu1 %v7253_v62 }
  0x2e   : > { %7296 = vmatpush3.bf16.msra.mxu0 %v7295_v63  ;;  %7255 = vmatprep.subr.bf16.mxu1 %v7898_v3 }
  0x2f   : > { %7303 = vmatprep.subr.bf16.mxu0 %v7898_v3 }
  0x30   : > { %6537 = vmatmul.mubr.f32.vlgmr.msra.gmra.mrb[2].mxu1 %v8084_v36 }
  0x31   : > { %6614 = vmatmul.mubr.f32.vlgmr.msra.gmra.mrb[2].mxu0 %v8097_v41  ;;  %7257 = vmatpush3.bf16.msra.mxu1 %v7256_v5 }
  0x32   : > { %7305 = vmatpush3.bf16.msra.mxu0 %v7304_v6  ;;  %7258 = vmatprep.subr.bf16.mxu1 %v7898_v3 }
  0x33   : > { %7306 = vmatprep.subr.bf16.mxu0 %v7898_v3  ;;  %6635 = vmatprep.mubr.msk.f32.mxu0 %vm7899_vm0, %v7900_v15 }
  0x34   : > { %6547 = vmatprep.mubr.msk.f32.mxu1 %vm7899_vm0, %v7900_v15 }
  0x35   : > { %7260 = vmatpush3.bf16.msra.mxu1 %v7259_v13 }
  0x36   : > { %7308 = vmatpush3.bf16.msra.mxu0 %v7307_v14  ;;  %7261 = vmatprep.subr.bf16.mxu1 %v7898_v3 }
  0x37   : > { %7315 = vmatprep.subr.bf16.mxu0 %v7898_v3 }
  0x38   : > { %6548 = vmatmul.mubr.f32.vlgmr.msra.gmra.mrb[4].mxu1 %v8094_v40  ;;  %v983_v40 = vand.u32 4294901760, %v982_v38 }
  0x39   : > { %6636 = vmatmul.mubr.f32.vlgmr.msra.gmra.mrb[4].mxu0 %v8086_v37  ;;  %7263 = vmatpush3.bf16.msra.mxu1 %v8038_v16 }
  0x3a   : > { %7317 = vmatpush3.bf16.msra.mxu0 %v8175_v32  ;;  %7264 = vmatprep.subr.bf16.mxu1 %v7898_v3 }
  0x3b   : > { %7318 = vmatprep.subr.bf16.mxu0 %v7898_v3  ;;  %6657 = vmatprep.mubr.msk.f32.mxu0 %vm7899_vm0, %v7900_v15 }
  0x3c   : > { %6558 = vmatprep.mubr.msk.f32.mxu1 %vm7899_vm0, %v7900_v15 }
  0x3d   : > { %7266 = vmatpush3.bf16.msra.mxu1 %v8050_v21 }
  0x3e   : > { %7320 = vmatpush3.bf16.msra.mxu0 %v8189_v43  ;;  %7267 = vmatprep.subr.bf16.mxu1 %v7898_v3 }
  0x3f   : > { %7321 = vmatprep.subr.bf16.mxu0 %v7898_v3 }
  0x40   : > { %6559 = vmatmul.mubr.f32.vlgmr.msra.gmra.mrb[6].mxu1 %v468_v46  ;;  %v990_v46 = vand.u32 4294901760, %v989_v39 }
  0x41   : > { %6658 = vmatmul.mubr.f32.vlgmr.msra.gmra.mrb[6].mxu0 %v7900_v15  ;;  %7269 = vmatpush3.bf16.msra.mxu1 %v7268_v51 }
  0x42   : > { %7323 = vmatpush3.bf16.msra.mxu0 %v8211_v53  ;;  %7270 = vmatprep.subr.bf16.mxu1 %v7898_v3  ;;  %v7289_v48 = vpack.c.bf16 %v990_v46, %v983_v40 }
  0x43   : > { %7324 = vmatprep.subr.bf16.mxu0 %v7898_v3  ;;  %6668 = vmatprep.mubr.msk.f32.mxu0 %vm7899_vm0, %v7900_v15 }
  0x44   : > { %6569 = vmatprep.mubr.msk.f32.mxu1 %vm7899_vm0, %v7900_v15 }
  0x45   : > { %7272 = vmatpush3.bf16.msra.mxu1 %v7271_v17 }
  0x46   : > { %7326 = vmatpush3.bf16.msra.mxu0 %v8223_v18  ;;  %7273 = vmatprep.subr.bf16.mxu1 %v7898_v3 }
  0x47   : > { %7327 = vmatprep.subr.bf16.mxu0 %v7898_v3 }
  0x48   : > { %6570 = vmatmul.mubr.f32.vlgmr.msra.gmra.mrb[8].mxu1 %v8084_v36 }
  0x49   : > { %6669 = vmatmul.mubr.f32.vlgmr.msra.gmra.mrb[6].mxu0 %v7900_v15  ;;  %7275 = vmatpush3.bf16.msra.mxu1 %v8038_v16  ;;  %v7286_v16 = vpack.c.bf16 %v976_v31, %v969_v30 }
  0x4a   : > { %7329 = vmatpush3.bf16.msra.mxu0 %v8234_v20  ;;  %7276 = vmatprep.subr.bf16.mxu1 %v7898_v3 }
  0x4b   : > { %7330 = vmatprep.subr.bf16.mxu0 %v7898_v3  ;;  %6580 = vmatprep.mubr.msk.f32.mxu1 %vm7899_vm0, %v7900_v15 }
  0x4c   : > { %6679 = vmatprep.mubr.msk.f32.mxu0 %vm7899_vm0, %v7900_v15 }
  0x4d   : > { %7278 = vmatpush3.bf16.msra.mxu1 %v8050_v21  ;;  %v8282_v21 = vpack.c.bf16 %v1478_v24, %v1471_v23 }
  0x4e   : > { %7332 = vmatpush3.bf16.msra.mxu0 %v8248_v26  ;;  %7285 = vmatprep.subr.bf16.mxu1 %v7898_v3 }
  0x4f   : > { %7333 = vmatprep.subr.bf16.mxu0 %v7898_v3 }
  0x50   : > { %6581 = vmatmul.mubr.f32.vlgmr.msra.gmra.mrb[10].mxu1 %v8084_v36  ;;  %v8294_v36 = vpack.c.bf16 %v1492_v42, %v1485_v35  ;;  %v6172_v35 = vld [vmem:[%s8780_s5] ss:$0 sm:$0xff] }
  0x51   : > { %6680 = vmatmul.mubr.f32.vlgmr.msra.gmra.mrb[6].mxu0 %v7900_v15  ;;  %7287 = vmatpush3.bf16.msra.mxu1 %v7286_v16 }
  0x52   : > { %7335 = vmatpush3.bf16.msra.mxu0 %v8175_v32  ;;  %7288 = vmatprep.subr.bf16.mxu1 %v7898_v3 }
  0x53   : > { %7336 = vmatprep.subr.bf16.mxu0 %v7898_v3  ;;  %6602 = vmatprep.mubr.msk.f32.mxu1 %vm7899_vm0, %v7900_v15 }
  0x54   : > { %6690 = vmatprep.mubr.msk.f32.mxu0 %vm7899_vm0, %v7900_v15 }
  0x55   : > { %7290 = vmatpush3.bf16.msra.mxu1 %v7289_v48 }
  0x56   : > { %7338 = vmatpush3.bf16.msra.mxu0 %v8189_v43  ;;  %7297 = vmatprep.subr.bf16.mxu1 %v7898_v3 }
  0x57   : > { %7339 = vmatprep.subr.bf16.mxu0 %v7898_v3 }
  0x58   : > { %6603 = vmatmul.mubr.f32.vlgmr.msra.gmra.mrb[12].mxu1 %v8086_v37 }
  0x59   : > { %6691 = vmatmul.mubr.f32.vlgmr.msra.gmra.mrb[6].mxu0 %v7900_v15  ;;  %7299 = vmatpush3.bf16.msra.mxu1 %v8044_v19 }
  0x5a   : > { %7341 = vmatpush3.bf16.msra.mxu0 %v8282_v21  ;;  %7300 = vmatprep.subr.bf16.mxu1 %v7898_v3 }
  0x5b   : > { %7342 = vmatprep.subr.bf16.mxu0 %v7898_v3  ;;  %6624 = vmatprep.mubr.msk.f32.mxu1 %vm7899_vm0, %v7900_v15 }
  0x5c   : > { %6701 = vmatprep.mubr.msk.f32.mxu0 %vm7899_vm0, %v7900_v15 }
  0x5d   : > { %7302 = vmatpush3.bf16.msra.mxu1 %v8061_v27 }
  0x5e   : > { %7344 = vmatpush3.bf16.msra.mxu0 %v8294_v36  ;;  %7309 = vmatprep.subr.bf16.mxu1 %v7898_v3 }
  0x5f   : > { %7345 = vmatprep.subr.bf16.mxu0 %v7898_v3 }
  0x60   : > { %6625 = vmatmul.mubr.f32.vlgmr.msra.gmra.mrb[14].mxu1 %v956_v47 }
  0x61   : > { %6702 = vmatmul.mubr.f32.vlgmr.msra.gmra.mrb[6].mxu0 %v7900_v15  ;;  %7311 = vmatpush3.bf16.msra.mxu1 %v8044_v19 }
  0x62   : > { %7347 = vmatpush3.bf16.msra.mxu0 %v8175_v32  ;;  %7312 = vmatprep.subr.bf16.mxu1 %v7898_v3 }
  0x63   : > { %7348 = vmatprep.subr.bf16.mxu0 %v7898_v3  ;;  %6646 = vmatprep.mubr.msk.f32.mxu1 %vm7899_vm0, %v7900_v15 }
  0x64   : > { %6712 = vmatprep.mubr.msk.f32.mxu0 %vm7899_vm0, %v7900_v15 }
  0x65   : > { %7314 = vmatpush3.bf16.msra.mxu1 %v8061_v27 }
  0x66   : > { %7350 = vmatpush3.bf16.msra.mxu0 %v8189_v43  ;;  %7351 = vmatprep.subr.bf16.mxu1 %v7898_v3 }
  0x67   : > { %7387 = vmatprep.subr.bf16.mxu0 %v7898_v3 }
  0x68   : > { %6647 = vmatmul.mubr.f32.vlgmr.msra.gmra.mrb[16].mxu1 %v8086_v37 }
  0x69   : > { %6713 = vmatmul.mubr.f32.vlgmr.msra.gmra.mrb[6].mxu0 %v7900_v15  ;;  %7353 = vmatpush3.bf16.msra.mxu1 %v8175_v32 }
  0x6a   : > { %6723 = vmatprep.mubr.msk.f32.mxu1 %vm7899_vm0, %v7900_v15  ;;  %7354 = vmatprep.subr.bf16.mxu1 %v7898_v3 }
  0x6b   : > { %7389 = vmatpush3.bf16.msra.mxu0 %v8175_v32  ;;  %6789 = vmatprep.mubr.msk.f32.mxu0 %vm7899_vm0, %v7900_v15 }
  0x6c   : > { %7390 = vmatprep.subr.bf16.mxu0 %v7898_v3 }
  0x6d   : > { %7356 = vmatpush3.bf16.msra.mxu1 %v8189_v43 }
  0x6e   : > { %7357 = vmatprep.subr.bf16.mxu1 %v7898_v3 }
  0x6f   : > { %7392 = vmatpush3.bf16.msra.mxu0 %v8189_v43 }
  0x70   : > { %7393 = vmatprep.subr.bf16.mxu0 %v7898_v3 }
  0xfb   : > { %v472_v27 = vpop.f32.mrb[0].mxu1 }
  0xfc   : > { %v960_v19 = vpop.f32.mrb[0].mxu0  ;;  %v6527_v41 = vpop.f32.mrb[1].mxu1 }
  0xfd   : > { %v6593_v37 = vpop.f32.mrb[1].mxu0 }
 0x103   : > { %v563_v52 = vpop.f32.mrb[2].mxu1 }
 0x104   : > { %v1131_v47 = vpop.f32.mrb[2].mxu0  ;;  %v564_v57 = vadd.f32 %v563_v52, %v472_v27  ;;  %v6538_v58 = vpop.f32.mrb[3].mxu1 }
 0x105   : > { %v6615_v56 = vpop.f32.mrb[3].mxu0 }
 0x10b   : > { %v643_v60 = vpop.f32.mrb[4].mxu1 }
 0x10c   : > { %v1291_v59 = vpop.f32.mrb[4].mxu0  ;;  %v644_v62 = vadd.f32 %v643_v60, %v564_v57  ;;  %v6549_v63 = vpop.f32.mrb[5].mxu1 }
 0x10d   : > { %v6637_v61 = vpop.f32.mrb[5].mxu0 }
 0x113   : > { %v720_v0 = vpop.f32.mrb[6].mxu1 }
 0x114   : > { %v721_v1 = vadd.f32 %v720_v0, %v644_v62  ;;  %v6560_v2 = vpop.f32.mrb[7].mxu1 }
 0x11b   : > { %v803_v4 = vpop.f32.mrb[8].mxu1 }
 0x11c   : > { %v804_v5 = vadd.f32 %v803_v4, %v721_v1  ;;  %v6571_v6 = vpop.f32.mrb[9].mxu1 }
 0x123   : > { %v878_v7 = vpop.f32.mrb[10].mxu1 }
 0x124   : > { %v879_v8 = vadd.f32 %v878_v7, %v804_v5  ;;  %v6582_v9 = vpop.f32.mrb[11].mxu1 }
 0x126   : > { %v961_v10 = vadd.f32 %v960_v19, %v879_v8 }
 0x12b   : > { %v1051_v11 = vpop.f32.mrb[12].mxu1 }
 0x12c   : > { %v1052_v12 = vadd.f32 %v1051_v11, %v961_v10  ;;  %v6604_v13 = vpop.f32.mrb[13].mxu1 }
 0x12e   : > { %v1132_v14 = vadd.f32 %v1131_v47, %v1052_v12 }
 0x133   : > { %v1208_v23 = vpop.f32.mrb[14].mxu1 }
 0x134   : > { %v1209_v24 = vadd.f32 %v1208_v23, %v1132_v14  ;;  %v6626_v28 = vpop.f32.mrb[15].mxu1 }
 0x136   : > { %v1292_v29 = vadd.f32 %v1291_v59, %v1209_v24 }
 0x13b   : > { %v1366_v34 = vpop.f32.mrb[16].mxu1 }
 0x13c   : > { %v1870_v42 = vpop.f32.mrb[6].mxu0  ;;  %v1367_v44 = vadd.f32 %v1366_v34, %v1292_v29  ;;  %v6648_v50 = vpop.f32.mrb[17].mxu1 }
 0x13d   : > { %v7639_v45 = vadd.f32 %v1870_v42, %v8338_v33  ;;  %v6714_v49 = vpop.f32.mrb[7].mxu0 }
 0x13e   : > { %v1377_v51 = vadd.f32 %v6172_v35, %v1367_v44 }
 0x13f   : > { %1882 = vrot.lane.b32.xlu0 %v7639_v45, %s7901_s29 }
 0x140   : > { %1379 = vst.msk [vmem:[#allocation2] sm:$0xff] %vm1378_vm2, %v1377_v51 }
 0x147   : > { %v1385_v54 = vld [vmem:[#allocation2] sm:$0x1]  ;;  %v1906_v63 = vld [vmem:[#allocation2 + $0x1] sm:$0x1]  ;;  %v2425_v51 = vld [vmem:[#allocation2 + $0x2] sm:$0x1] }
 0x148   : > { %v1874_v55 = vadd.f32 %v7639_v45, %v1385_v54 }
 0x14a   : > { %v6173_v17 = vmul.f32 -1.442695, %v1874_v55 }
 0x14c   : > { %7782 = vpow2.f32 %v6173_v17 }
 0x156   : > { %v7783_v22 = vpop.eup %7782 }
 0x157   : > { %v1878_v25 = vadd.f32 1.0, %v7783_v22 }
 0x159   : > { %7784 = vrcp.f32 %v1878_v25 }
 0x163   : > { %v7785_v30 = vpop.eup %7784 }
 0x164   : > { %v1892_v46 = vsub.f32 1.0, %v7785_v30  ;;  %v1898_v19 = vmul.f32 0.0, %v7785_v30 }
 0x1b1   : > { %v1883_v31 = vpop.permute.xlu0 %1882 }
 0x1b2   : > { %v1885_v38 = vmul.f32 %v7785_v30, %v1883_v31 }
 0x1b4   : > { %1887 = vrot.lane.b32.xlu0 %v1885_v38, %s7901_s29 }
 0x226   : > { %v1888_v39 = vpop.permute.xlu0 %1887 }
 0x227   : > { %v1890_v16 = vadd.f32 %v1888_v39, %v1385_v54 }
 0x229   : > { %7786 = vtanh.f32 %v1890_v16 }
 0x233   : > { %v7787_v40 = vpop.eup %7786 }
 0x234   : > { %1894 = vrot.lane.b32.xlu1 %v7787_v40, %s7902_s30 }
 0x2a6   : > { %v1895_v48 = vpop.permute.xlu1 %1894 }
 0x2a7   : > { %v1897_v27 = vmul.f32 %v1895_v48, %v1892_v46 }
 0x2a9   : > { %v8347_v37 = vadd.f32 %v1898_v19, %v1897_v27 }
 0x2ab   : > { %1901 = vrot.lane.b32.xlu1 %v8347_v37, %s7902_s30 }
 0x31d   : > { %v1902_v41 = vpop.permute.xlu1 %1901 }
 0x31e   : > { %1905 = vst.msk [vmem:[%s8354_s20] sm:$0x1] %vm1904_vm3, %v1902_v41  ;;  %v1907_v47 = vsel %vm393_vm1, %v1902_v41, 0 }
 0x31f   : > { %v1978_v52 = vand.u32 4294901760, %v1907_v47 }
 0x321   : > { %v1979_v56 = vsub.f32 %v1907_v47, %v1978_v52 }
 0x323   : > { %v1980_v57 = vand.u32 4294901760, %v1979_v56 }
 0x325   : > { %v1981_v58 = vsub.f32 %v1979_v56, %v1980_v57 }
 0x327   : > { %v1982_v59 = vand.u32 4294901760, %v1981_v58 }
 0x329   : > { %6724 = vmatmul.mubr.f32.vlgmr.msra.gmra.mrb[18].mxu1 %v1982_v59 }
 0x32a   : > { %7359 = vmatpush3.bf16.msra.mxu1 %v8211_v53  ;;  %6734 = vmatprep.mubr.msk.f32.mxu1 %vm7899_vm0, %v7900_v15 }
 0x32b   : > { %7360 = vmatprep.subr.bf16.mxu1 %v7898_v3 }
 0x32e   : > { %7362 = vmatpush3.bf16.msra.mxu1 %v8223_v18 }
 0x32f   : > { %7363 = vmatprep.subr.bf16.mxu1 %v7898_v3 }
 0x331   : > { %6735 = vmatmul.mubr.f32.vlgmr.msra.gmra.mrb[18].mxu1 %v1978_v52 }
 0x332   : > { %7365 = vmatpush3.bf16.msra.mxu1 %v8234_v20  ;;  %6745 = vmatprep.mubr.msk.f32.mxu1 %vm7899_vm0, %v7900_v15 }
 0x333   : > { %7366 = vmatprep.subr.bf16.mxu1 %v7898_v3 }
 0x336   : > { %7368 = vmatpush3.bf16.msra.mxu1 %v8248_v26 }
 0x337   : > { %7369 = vmatprep.subr.bf16.mxu1 %v7898_v3 }
 0x339   : > { %6746 = vmatmul.mubr.f32.vlgmr.msra.gmra.mrb[18].mxu1 %v1979_v56 }
 0x33a   : > { %7371 = vmatpush3.bf16.msra.mxu1 %v8175_v32  ;;  %6756 = vmatprep.mubr.msk.f32.mxu1 %vm7899_vm0, %v7900_v15 }
 0x33b   : > { %7372 = vmatprep.subr.bf16.mxu1 %v7898_v3 }
 0x33e   : > { %7374 = vmatpush3.bf16.msra.mxu1 %v8189_v43 }
 0x33f   : > { %7375 = vmatprep.subr.bf16.mxu1 %v7898_v3 }
 0x341   : > { %6757 = vmatmul.mubr.f32.vlgmr.msra.gmra.mrb[18].mxu1 %v1980_v57 }
 0x342   : > { %7377 = vmatpush3.bf16.msra.mxu1 %v8282_v21  ;;  %6767 = vmatprep.mubr.msk.f32.mxu1 %vm7899_vm0, %v7900_v15 }
 0x343   : > { %7378 = vmatprep.subr.bf16.mxu1 %v7898_v3 }
 0x346   : > { %7380 = vmatpush3.bf16.msra.mxu1 %v8294_v36 }
 0x347   : > { %7381 = vmatprep.subr.bf16.mxu1 %v7898_v3 }
 0x349   : > { %6768 = vmatmul.mubr.f32.vlgmr.msra.gmra.mrb[18].mxu1 %v1978_v52 }
 0x34a   : > { %7383 = vmatpush3.bf16.msra.mxu1 %v8175_v32  ;;  %6778 = vmatprep.mubr.msk.f32.mxu1 %vm7899_vm0, %v7900_v15 }
 0x34b   : > { %7384 = vmatprep.subr.bf16.mxu1 %v7898_v3 }
 0x34e   : > { %7386 = vmatpush3.bf16.msra.mxu1 %v8189_v43 }
 0x34f   : > { %7423 = vmatprep.subr.bf16.mxu1 %v7898_v3 }
 0x351   : > { %6779 = vmatmul.mubr.f32.vlgmr.msra.gmra.mrb[18].mxu1 %v1978_v52 }
 0x352   : > { %7425 = vmatpush3.bf16.msra.mxu1 %v8175_v32  ;;  %6855 = vmatprep.mubr.msk.f32.mxu1 %vm7899_vm0, %v7900_v15 }
 0x353   : > { %7426 = vmatprep.subr.bf16.mxu1 %v7898_v3 }
 0x356   : > { %7428 = vmatpush3.bf16.msra.mxu1 %v8189_v43 }
 0x357   : > { %7429 = vmatprep.subr.bf16.mxu1 %v7898_v3 }
 0x424   : > { %v2390_v60 = vpop.f32.mrb[18].mxu1 }
 0x425   : > { %v7640_v61 = vadd.f32 %v2390_v60, %v8338_v33  ;;  %v6780_v62 = vpop.f32.mrb[19].mxu1 }
 0x426   : > { %v2944_v62 = vld [vmem:[#allocation2 + $0x3] sm:$0x1] }
 0x427   : > { %2402 = vrot.lane.b32.xlu0 %v7640_v61, %s7901_s29  ;;  %v2394_v0 = vadd.f32 %v7640_v61, %v1906_v63 }
 0x429   : > { %v6174_v1 = vmul.f32 -1.442695, %v2394_v0 }
 0x42b   : > { %7788 = vpow2.f32 %v6174_v1 }
 0x435   : > { %v7789_v2 = vpop.eup %7788 }
 0x436   : > { %v2398_v4 = vadd.f32 1.0, %v7789_v2 }
 0x438   : > { %7790 = vrcp.f32 %v2398_v4 }
 0x442   : > { %v7791_v5 = vpop.eup %7790 }
 0x443   : > { %v2412_v11 = vsub.f32 1.0, %v7791_v5  ;;  %v2418_v13 = vmul.f32 %v7791_v5, %v8347_v37 }
 0x499   : > { %v2403_v6 = vpop.permute.xlu0 %2402 }
 0x49a   : > { %v2405_v7 = vmul.f32 %v7791_v5, %v2403_v6 }
 0x49c   : > { %2407 = vrot.lane.b32.xlu1 %v2405_v7, %s7901_s29 }
 0x50e   : > { %v2408_v8 = vpop.permute.xlu1 %2407 }
 0x50f   : > { %v2410_v9 = vadd.f32 %v2408_v8, %v1906_v63 }
 0x511   : > { %7792 = vtanh.f32 %v2410_v9 }
 0x51b   : > { %v7793_v10 = vpop.eup %7792 }
 0x51c   : > { %2414 = vrot.lane.b32.xlu0 %v7793_v10, %s7902_s30 }
 0x58e   : > { %v2415_v12 = vpop.permute.xlu0 %2414 }
 0x58f   : > { %v2417_v14 = vmul.f32 %v2415_v12, %v2412_v11 }
 0x591   : > { %v8400_v23 = vadd.f32 %v2418_v13, %v2417_v14 }
 0x593   : > { %2421 = vrot.lane.b32.xlu1 %v8400_v23, %s7902_s30 }
 0x605   : > { %v2422_v24 = vpop.permute.xlu1 %2421 }
 0x606   : > { %2424 = vst.msk [vmem:[%s8354_s20 + $0x1] sm:$0x1] %vm1904_vm3, %v2422_v24  ;;  %v2426_v28 = vsel %vm393_vm1, %v2422_v24, 0 }
 0x607   : > { %v2497_v29 = vand.u32 4294901760, %v2426_v28 }
 0x609   : > { %v2498_v34 = vsub.f32 %v2426_v28, %v2497_v29 }
 0x60b   : > { %v2499_v35 = vand.u32 4294901760, %v2498_v34 }
 0x60d   : > { %v2500_v42 = vsub.f32 %v2498_v34, %v2499_v35 }
 0x60f   : > { %v2501_v44 = vand.u32 4294901760, %v2500_v42 }
 0x611   : > { %6790 = vmatmul.mubr.f32.vlgmr.msra.gmra.mrb[8].mxu0 %v2501_v44 }
 0x612   : > { %7395 = vmatpush3.bf16.msra.mxu0 %v8211_v53  ;;  %6800 = vmatprep.mubr.msk.f32.mxu0 %vm7899_vm0, %v7900_v15 }
 0x613   : > { %7396 = vmatprep.subr.bf16.mxu0 %v7898_v3 }
 0x616   : > { %7398 = vmatpush3.bf16.msra.mxu0 %v8223_v18 }
 0x617   : > { %7399 = vmatprep.subr.bf16.mxu0 %v7898_v3 }
 0x619   : > { %6801 = vmatmul.mubr.f32.vlgmr.msra.gmra.mrb[8].mxu0 %v2497_v29 }
 0x61a   : > { %7401 = vmatpush3.bf16.msra.mxu0 %v8234_v20  ;;  %6811 = vmatprep.mubr.msk.f32.mxu0 %vm7899_vm0, %v7900_v15 }
 0x61b   : > { %7402 = vmatprep.subr.bf16.mxu0 %v7898_v3 }
 0x61e   : > { %7404 = vmatpush3.bf16.msra.mxu0 %v8248_v26 }
 0x61f   : > { %7405 = vmatprep.subr.bf16.mxu0 %v7898_v3 }
 0x621   : > { %6812 = vmatmul.mubr.f32.vlgmr.msra.gmra.mrb[8].mxu0 %v2498_v34 }
 0x622   : > { %7407 = vmatpush3.bf16.msra.mxu0 %v8175_v32  ;;  %6822 = vmatprep.mubr.msk.f32.mxu0 %vm7899_vm0, %v7900_v15 }
 0x623   : > { %7408 = vmatprep.subr.bf16.mxu0 %v7898_v3 }
 0x626   : > { %7410 = vmatpush3.bf16.msra.mxu0 %v8189_v43 }
 0x627   : > { %7411 = vmatprep.subr.bf16.mxu0 %v7898_v3 }
 0x629   : > { %6823 = vmatmul.mubr.f32.vlgmr.msra.gmra.mrb[8].mxu0 %v2499_v35 }
 0x62a   : > { %7413 = vmatpush3.bf16.msra.mxu0 %v8282_v21  ;;  %6833 = vmatprep.mubr.msk.f32.mxu0 %vm7899_vm0, %v7900_v15 }
 0x62b   : > { %7414 = vmatprep.subr.bf16.mxu0 %v7898_v3 }
 0x62e   : > { %7416 = vmatpush3.bf16.msra.mxu0 %v8294_v36 }
 0x62f   : > { %7417 = vmatprep.subr.bf16.mxu0 %v7898_v3 }
 0x631   : > { %6834 = vmatmul.mubr.f32.vlgmr.msra.gmra.mrb[8].mxu0 %v2497_v29 }
 0x632   : > { %7419 = vmatpush3.bf16.msra.mxu0 %v8175_v32  ;;  %6844 = vmatprep.mubr.msk.f32.mxu0 %vm7899_vm0, %v7900_v15 }
 0x633   : > { %7420 = vmatprep.subr.bf16.mxu0 %v7898_v3 }
 0x636   : > { %7422 = vmatpush3.bf16.msra.mxu0 %v8189_v43 }
 0x637   : > { %7459 = vmatprep.subr.bf16.mxu0 %v7898_v3 }
 0x639   : > { %6845 = vmatmul.mubr.f32.vlgmr.msra.gmra.mrb[8].mxu0 %v2497_v29 }
 0x63a   : > { %7461 = vmatpush3.bf16.msra.mxu0 %v8175_v32  ;;  %6921 = vmatprep.mubr.msk.f32.mxu0 %vm7899_vm0, %v7900_v15 }
 0x63b   : > { %7462 = vmatprep.subr.bf16.mxu0 %v7898_v3 }
 0x63e   : > { %7464 = vmatpush3.bf16.msra.mxu0 %v8189_v43 }
 0x63f   : > { %7465 = vmatprep.subr.bf16.mxu0 %v7898_v3 }
 0x70c   : > { %v2909_v45 = vpop.f32.mrb[8].mxu0 }
 0x70d   : > { %v7641_v49 = vadd.f32 %v2909_v45, %v8338_v33  ;;  %v6846_v50 = vpop.f32.mrb[9].mxu0 }
 0x70e   : > { %v3463_v50 = vld [vmem:[#allocation2 + $0x4] sm:$0x1] }
 0x70f   : > { %2921 = vrot.lane.b32.xlu0 %v7641_v49, %s7901_s29  ;;  %v2913_v54 = vadd.f32 %v7641_v49, %v2425_v51 }
 0x711   : > { %v6175_v55 = vmul.f32 -1.442695, %v2913_v54 }
 0x713   : > { %7794 = vpow2.f32 %v6175_v55 }
 0x71d   : > { %v7795_v17 = vpop.eup %7794 }
 0x71e   : > { %v2917_v22 = vadd.f32 1.0, %v7795_v17 }
 0x720   : > { %7796 = vrcp.f32 %v2917_v22 }
 0x72a   : > { %v7797_v25 = vpop.eup %7796 }
 0x72b   : > { %v2931_v40 = vsub.f32 1.0, %v7797_v25  ;;  %v2937_v48 = vmul.f32 %v7797_v25, %v8400_v23 }
 0x781   : > { %v2922_v30 = vpop.permute.xlu0 %2921 }
 0x782   : > { %v2924_v31 = vmul.f32 %v7797_v25, %v2922_v30 }
 0x784   : > { %2926 = vrot.lane.b32.xlu1 %v2924_v31, %s7901_s29 }
 0x7f6   : > { %v2927_v38 = vpop.permute.xlu1 %2926 }
 0x7f7   : > { %v2929_v39 = vadd.f32 %v2927_v38, %v2425_v51 }
 0x7f9   : > { %7798 = vtanh.f32 %v2929_v39 }
 0x803   : > { %v7799_v16 = vpop.eup %7798 }
 0x804   : > { %2933 = vrot.lane.b32.xlu0 %v7799_v16, %s7902_s30 }
 0x876   : > { %v2934_v46 = vpop.permute.xlu0 %2933 }
 0x877   : > { %v2936_v19 = vmul.f32 %v2934_v46, %v2931_v40 }
 0x879   : > { %v8448_v27 = vadd.f32 %v2937_v48, %v2936_v19 }
 0x87b   : > { %2940 = vrot.lane.b32.xlu1 %v8448_v27, %s7902_s30 }
 0x8ed   : > { %v2941_v37 = vpop.permute.xlu1 %2940 }
 0x8ee   : > { %2943 = vst.msk [vmem:[%s8354_s20 + $0x2] sm:$0x1] %vm1904_vm3, %v2941_v37  ;;  %v2945_v41 = vsel %vm393_vm1, %v2941_v37, 0 }
 0x8ef   : > { %v3016_v47 = vand.u32 4294901760, %v2945_v41 }
 0x8f1   : > { %v3017_v52 = vsub.f32 %v2945_v41, %v3016_v47 }
 0x8f3   : > { %v3018_v56 = vand.u32 4294901760, %v3017_v52 }
 0x8f5   : > { %v3019_v57 = vsub.f32 %v3017_v52, %v3018_v56 }
 0x8f7   : > { %v3020_v58 = vand.u32 4294901760, %v3019_v57 }
 0x8f9   : > { %6856 = vmatmul.mubr.f32.vlgmr.msra.gmra.mrb[20].mxu1 %v3020_v58 }
 0x8fa   : > { %7431 = vmatpush3.bf16.msra.mxu1 %v8211_v53  ;;  %6866 = vmatprep.mubr.msk.f32.mxu1 %vm7899_vm0, %v7900_v15 }
 0x8fb   : > { %7432 = vmatprep.subr.bf16.mxu1 %v7898_v3 }
 0x8fe   : > { %7434 = vmatpush3.bf16.msra.mxu1 %v8223_v18 }
 0x8ff   : > { %7435 = vmatprep.subr.bf16.mxu1 %v7898_v3 }
 0x901   : > { %6867 = vmatmul.mubr.f32.vlgmr.msra.gmra.mrb[20].mxu1 %v3016_v47 }
 0x902   : > { %7437 = vmatpush3.bf16.msra.mxu1 %v8234_v20  ;;  %6877 = vmatprep.mubr.msk.f32.mxu1 %vm7899_vm0, %v7900_v15 }
 0x903   : > { %7438 = vmatprep.subr.bf16.mxu1 %v7898_v3 }
 0x906   : > { %7440 = vmatpush3.bf16.msra.mxu1 %v8248_v26 }
 0x907   : > { %7441 = vmatprep.subr.bf16.mxu1 %v7898_v3 }
 0x909   : > { %6878 = vmatmul.mubr.f32.vlgmr.msra.gmra.mrb[20].mxu1 %v3017_v52 }
 0x90a   : > { %7443 = vmatpush3.bf16.msra.mxu1 %v8175_v32  ;;  %6888 = vmatprep.mubr.msk.f32.mxu1 %vm7899_vm0, %v7900_v15 }
 0x90b   : > { %7444 = vmatprep.subr.bf16.mxu1 %v7898_v3 }
 0x90e   : > { %7446 = vmatpush3.bf16.msra.mxu1 %v8189_v43 }
 0x90f   : > { %7447 = vmatprep.subr.bf16.mxu1 %v7898_v3 }
 0x911   : > { %6889 = vmatmul.mubr.f32.vlgmr.msra.gmra.mrb[20].mxu1 %v3018_v56 }
 0x912   : > { %7449 = vmatpush3.bf16.msra.mxu1 %v8282_v21  ;;  %6899 = vmatprep.mubr.msk.f32.mxu1 %vm7899_vm0, %v7900_v15 }
 0x913   : > { %7450 = vmatprep.subr.bf16.mxu1 %v7898_v3 }
 0x916   : > { %7452 = vmatpush3.bf16.msra.mxu1 %v8294_v36 }
 0x917   : > { %7453 = vmatprep.subr.bf16.mxu1 %v7898_v3 }
 0x919   : > { %6900 = vmatmul.mubr.f32.vlgmr.msra.gmra.mrb[20].mxu1 %v3016_v47 }
 0x91a   : > { %7455 = vmatpush3.bf16.msra.mxu1 %v8175_v32  ;;  %6910 = vmatprep.mubr.msk.f32.mxu1 %vm7899_vm0, %v7900_v15 }
 0x91b   : > { %7456 = vmatprep.subr.bf16.mxu1 %v7898_v3 }
 0x91e   : > { %7458 = vmatpush3.bf16.msra.mxu1 %v8189_v43 }
 0x91f   : > { %7495 = vmatprep.subr.bf16.mxu1 %v7898_v3 }
 0x921   : > { %6911 = vmatmul.mubr.f32.vlgmr.msra.gmra.mrb[20].mxu1 %v3016_v47 }
 0x922   : > { %7497 = vmatpush3.bf16.msra.mxu1 %v8175_v32  ;;  %6987 = vmatprep.mubr.msk.f32.mxu1 %vm7899_vm0, %v7900_v15 }
 0x923   : > { %7498 = vmatprep.subr.bf16.mxu1 %v7898_v3 }
 0x926   : > { %7500 = vmatpush3.bf16.msra.mxu1 %v8189_v43 }
 0x927   : > { %7501 = vmatprep.subr.bf16.mxu1 %v7898_v3 }
 0x9f4   : > { %v3428_v59 = vpop.f32.mrb[20].mxu1 }
 0x9f5   : > { %v7642_v60 = vadd.f32 %v3428_v59, %v8338_v33  ;;  %v6912_v61 = vpop.f32.mrb[21].mxu1 }
 0x9f6   : > { %v3982_v61 = vld [vmem:[#allocation2 + $0x5] sm:$0x1] }
 0x9f7   : > { %3440 = vrot.lane.b32.xlu0 %v7642_v60, %s7901_s29  ;;  %v3432_v63 = vadd.f32 %v7642_v60, %v2944_v62 }
 0x9f9   : > { %v6176_v0 = vmul.f32 -1.442695, %v3432_v63 }
 0x9fb   : > { %7800 = vpow2.f32 %v6176_v0 }
 0xa05   : > { %v7801_v1 = vpop.eup %7800 }
 0xa06   : > { %v3436_v2 = vadd.f32 1.0, %v7801_v1 }
 0xa08   : > { %7802 = vrcp.f32 %v3436_v2 }
 0xa12   : > { %v7803_v4 = vpop.eup %7802 }
 0xa13   : > { %v3450_v10 = vsub.f32 1.0, %v7803_v4  ;;  %v3456_v12 = vmul.f32 %v7803_v4, %v8448_v27 }
 0xa69   : > { %v3441_v5 = vpop.permute.xlu0 %3440 }
 0xa6a   : > { %v3443_v6 = vmul.f32 %v7803_v4, %v3441_v5 }
 0xa6c   : > { %3445 = vrot.lane.b32.xlu1 %v3443_v6, %s7901_s29 }
 0xade   : > { %v3446_v7 = vpop.permute.xlu1 %3445 }
 0xadf   : > { %v3448_v8 = vadd.f32 %v3446_v7, %v2944_v62 }
 0xae1   : > { %7804 = vtanh.f32 %v3448_v8 }
 0xaeb   : > { %v7805_v9 = vpop.eup %7804 }
 0xaec   : > { %3452 = vrot.lane.b32.xlu0 %v7805_v9, %s7902_s30 }
 0xb5e   : > { %v3453_v11 = vpop.permute.xlu0 %3452 }
 0xb5f   : > { %v3455_v13 = vmul.f32 %v3453_v11, %v3450_v10 }
 0xb61   : > { %v8496_v14 = vadd.f32 %v3456_v12, %v3455_v13 }
 0xb63   : > { %3459 = vrot.lane.b32.xlu1 %v8496_v14, %s7902_s30 }
 0xbd5   : > { %v3460_v23 = vpop.permute.xlu1 %3459 }
 0xbd6   : > { %3462 = vst.msk [vmem:[%s8354_s20 + $0x3] sm:$0x1] %vm1904_vm3, %v3460_v23  ;;  %v3464_v24 = vsel %vm393_vm1, %v3460_v23, 0 }
 0xbd7   : > { %v3535_v28 = vand.u32 4294901760, %v3464_v24 }
 0xbd9   : > { %v3536_v29 = vsub.f32 %v3464_v24, %v3535_v28 }
 0xbdb   : > { %v3537_v34 = vand.u32 4294901760, %v3536_v29 }
 0xbdd   : > { %v3538_v35 = vsub.f32 %v3536_v29, %v3537_v34 }
 0xbdf   : > { %v3539_v42 = vand.u32 4294901760, %v3538_v35 }
 0xbe1   : > { %6922 = vmatmul.mubr.f32.vlgmr.msra.gmra.mrb[10].mxu0 %v3539_v42 }
 0xbe2   : > { %7467 = vmatpush3.bf16.msra.mxu0 %v8211_v53  ;;  %6932 = vmatprep.mubr.msk.f32.mxu0 %vm7899_vm0, %v7900_v15 }
 0xbe3   : > { %7468 = vmatprep.subr.bf16.mxu0 %v7898_v3 }
 0xbe6   : > { %7470 = vmatpush3.bf16.msra.mxu0 %v8223_v18 }
 0xbe7   : > { %7471 = vmatprep.subr.bf16.mxu0 %v7898_v3 }
 0xbe9   : > { %6933 = vmatmul.mubr.f32.vlgmr.msra.gmra.mrb[10].mxu0 %v3535_v28 }
 0xbea   : > { %7473 = vmatpush3.bf16.msra.mxu0 %v8234_v20  ;;  %6943 = vmatprep.mubr.msk.f32.mxu0 %vm7899_vm0, %v7900_v15 }
 0xbeb   : > { %7474 = vmatprep.subr.bf16.mxu0 %v7898_v3 }
 0xbee   : > { %7476 = vmatpush3.bf16.msra.mxu0 %v8248_v26 }
 0xbef   : > { %7477 = vmatprep.subr.bf16.mxu0 %v7898_v3 }
 0xbf1   : > { %6944 = vmatmul.mubr.f32.vlgmr.msra.gmra.mrb[10].mxu0 %v3536_v29 }
 0xbf2   : > { %7479 = vmatpush3.bf16.msra.mxu0 %v8175_v32  ;;  %6954 = vmatprep.mubr.msk.f32.mxu0 %vm7899_vm0, %v7900_v15 }
 0xbf3   : > { %7480 = vmatprep.subr.bf16.mxu0 %v7898_v3 }
 0xbf6   : > { %7482 = vmatpush3.bf16.msra.mxu0 %v8189_v43 }
 0xbf7   : > { %7483 = vmatprep.subr.bf16.mxu0 %v7898_v3 }
 0xbf9   : > { %6955 = vmatmul.mubr.f32.vlgmr.msra.gmra.mrb[10].mxu0 %v3537_v34 }
 0xbfa   : > { %7485 = vmatpush3.bf16.msra.mxu0 %v8282_v21  ;;  %6965 = vmatprep.mubr.msk.f32.mxu0 %vm7899_vm0, %v7900_v15 }
 0xbfb   : > { %7486 = vmatprep.subr.bf16.mxu0 %v7898_v3 }
 0xbfe   : > { %7488 = vmatpush3.bf16.msra.mxu0 %v8294_v36 }
 0xbff   : > { %7489 = vmatprep.subr.bf16.mxu0 %v7898_v3 }
 0xc01   : > { %6966 = vmatmul.mubr.f32.vlgmr.msra.gmra.mrb[10].mxu0 %v3535_v28 }
 0xc02   : > { %7491 = vmatpush3.bf16.msra.mxu0 %v8175_v32  ;;  %6976 = vmatprep.mubr.msk.f32.mxu0 %vm7899_vm0, %v7900_v15 }
 0xc03   : > { %7492 = vmatprep.subr.bf16.mxu0 %v7898_v3 }
 0xc06   : > { %7494 = vmatpush3.bf16.msra.mxu0 %v8189_v43 }
 0xc07   : > { %7531 = vmatprep.subr.bf16.mxu0 %v7898_v3 }
 0xc09   : > { %6977 = vmatmul.mubr.f32.vlgmr.msra.gmra.mrb[10].mxu0 %v3535_v28 }
 0xc0a   : > { %7533 = vmatpush3.bf16.msra.mxu0 %v8175_v32  ;;  %7053 = vmatprep.mubr.msk.f32.mxu0 %vm7899_vm0, %v7900_v15 }
 0xc0b   : > { %7534 = vmatprep.subr.bf16.mxu0 %v7898_v3 }
 0xc0e   : > { %7536 = vmatpush3.bf16.msra.mxu0 %v8189_v43 }
 0xc0f   : > { %7537 = vmatprep.subr.bf16.mxu0 %v7898_v3 }
 0xcdc   : > { %v3947_v44 = vpop.f32.mrb[10].mxu0 }
 0xcdd   : > { %v7643_v45 = vadd.f32 %v3947_v44, %v8338_v33  ;;  %v6978_v49 = vpop.f32.mrb[11].mxu0 }
 0xcde   : > { %v4501_v49 = vld [vmem:[#allocation2 + $0x6] sm:$0x1] }
 0xcdf   : > { %3959 = vrot.lane.b32.xlu0 %v7643_v45, %s7901_s29  ;;  %v3951_v51 = vadd.f32 %v7643_v45, %v3463_v50 }
 0xce1   : > { %v6177_v54 = vmul.f32 -1.442695, %v3951_v51 }
 0xce3   : > { %7806 = vpow2.f32 %v6177_v54 }
 0xced   : > { %v7807_v55 = vpop.eup %7806 }
 0xcee   : > { %v3955_v17 = vadd.f32 1.0, %v7807_v55 }
 0xcf0   : > { %7808 = vrcp.f32 %v3955_v17 }
 0xcfa   : > { %v7809_v22 = vpop.eup %7808 }
 0xcfb   : > { %v3969_v16 = vsub.f32 1.0, %v7809_v22  ;;  %v3975_v46 = vmul.f32 %v7809_v22, %v8496_v14 }
 0xd51   : > { %v3960_v25 = vpop.permute.xlu0 %3959 }
 0xd52   : > { %v3962_v30 = vmul.f32 %v7809_v22, %v3960_v25 }
 0xd54   : > { %3964 = vrot.lane.b32.xlu1 %v3962_v30, %s7901_s29 }
 0xdc6   : > { %v3965_v31 = vpop.permute.xlu1 %3964 }
 0xdc7   : > { %v3967_v38 = vadd.f32 %v3965_v31, %v3463_v50 }
 0xdc9   : > { %7810 = vtanh.f32 %v3967_v38 }
 0xdd3   : > { %v7811_v39 = vpop.eup %7810 }
 0xdd4   : > { %3971 = vrot.lane.b32.xlu0 %v7811_v39, %s7902_s30 }
 0xe46   : > { %v3972_v40 = vpop.permute.xlu0 %3971 }
 0xe47   : > { %v3974_v48 = vmul.f32 %v3972_v40, %v3969_v16 }
 0xe49   : > { %v8544_v19 = vadd.f32 %v3975_v46, %v3974_v48 }
 0xe4b   : > { %3978 = vrot.lane.b32.xlu1 %v8544_v19, %s7902_s30 }
 0xebd   : > { %v3979_v27 = vpop.permute.xlu1 %3978 }
 0xebe   : > { %3981 = vst.msk [vmem:[%s8354_s20 + $0x4] sm:$0x1] %vm1904_vm3, %v3979_v27  ;;  %v3983_v37 = vsel %vm393_vm1, %v3979_v27, 0 }
 0xebf   : > { %v4054_v41 = vand.u32 4294901760, %v3983_v37 }
 0xec1   : > { %v4055_v47 = vsub.f32 %v3983_v37, %v4054_v41 }
 0xec3   : > { %v4056_v52 = vand.u32 4294901760, %v4055_v47 }
 0xec5   : > { %v4057_v56 = vsub.f32 %v4055_v47, %v4056_v52 }
 0xec7   : > { %v4058_v57 = vand.u32 4294901760, %v4057_v56 }
 0xec9   : > { %6988 = vmatmul.mubr.f32.vlgmr.msra.gmra.mrb[22].mxu1 %v4058_v57 }
 0xeca   : > { %7503 = vmatpush3.bf16.msra.mxu1 %v8211_v53  ;;  %6998 = vmatprep.mubr.msk.f32.mxu1 %vm7899_vm0, %v7900_v15 }
 0xecb   : > { %7504 = vmatprep.subr.bf16.mxu1 %v7898_v3 }
 0xece   : > { %7506 = vmatpush3.bf16.msra.mxu1 %v8223_v18 }
 0xecf   : > { %7507 = vmatprep.subr.bf16.mxu1 %v7898_v3 }
 0xed1   : > { %6999 = vmatmul.mubr.f32.vlgmr.msra.gmra.mrb[22].mxu1 %v4054_v41 }
 0xed2   : > { %7509 = vmatpush3.bf16.msra.mxu1 %v8234_v20  ;;  %7009 = vmatprep.mubr.msk.f32.mxu1 %vm7899_vm0, %v7900_v15 }
 0xed3   : > { %7510 = vmatprep.subr.bf16.mxu1 %v7898_v3 }
 0xed6   : > { %7512 = vmatpush3.bf16.msra.mxu1 %v8248_v26 }
 0xed7   : > { %7513 = vmatprep.subr.bf16.mxu1 %v7898_v3 }
 0xed9   : > { %7010 = vmatmul.mubr.f32.vlgmr.msra.gmra.mrb[22].mxu1 %v4055_v47 }
 0xeda   : > { %7515 = vmatpush3.bf16.msra.mxu1 %v8175_v32  ;;  %7020 = vmatprep.mubr.msk.f32.mxu1 %vm7899_vm0, %v7900_v15 }
 0xedb   : > { %7516 = vmatprep.subr.bf16.mxu1 %v7898_v3 }
 0xede   : > { %7518 = vmatpush3.bf16.msra.mxu1 %v8189_v43 }
 0xedf   : > { %7519 = vmatprep.subr.bf16.mxu1 %v7898_v3 }
 0xee1   : > { %7021 = vmatmul.mubr.f32.vlgmr.msra.gmra.mrb[22].mxu1 %v4056_v52 }
 0xee2   : > { %7521 = vmatpush3.bf16.msra.mxu1 %v8282_v21  ;;  %7031 = vmatprep.mubr.msk.f32.mxu1 %vm7899_vm0, %v7900_v15 }
 0xee3   : > { %7522 = vmatprep.subr.bf16.mxu1 %v7898_v3 }
 0xee6   : > { %7524 = vmatpush3.bf16.msra.mxu1 %v8294_v36 }
 0xee7   : > { %7525 = vmatprep.subr.bf16.mxu1 %v7898_v3 }
 0xee9   : > { %7032 = vmatmul.mubr.f32.vlgmr.msra.gmra.mrb[22].mxu1 %v4054_v41 }
 0xeea   : > { %7527 = vmatpush3.bf16.msra.mxu1 %v8175_v32  ;;  %7042 = vmatprep.mubr.msk.f32.mxu1 %vm7899_vm0, %v7900_v15 }
 0xeeb   : > { %7528 = vmatprep.subr.bf16.mxu1 %v7898_v3 }
 0xeee   : > { %7530 = vmatpush3.bf16.msra.mxu1 %v8189_v43 }
 0xeef   : > { %7567 = vmatprep.subr.bf16.mxu1 %v7898_v3 }
 0xef1   : > { %7043 = vmatmul.mubr.f32.vlgmr.msra.gmra.mrb[22].mxu1 %v4054_v41 }
 0xef2   : > { %7569 = vmatpush3.bf16.msra.mxu1 %v8175_v32  ;;  %7119 = vmatprep.mubr.msk.f32.mxu1 %vm7899_vm0, %v7900_v15 }
 0xef3   : > { %7570 = vmatprep.subr.bf16.mxu1 %v7898_v3 }
 0xef6   : > { %7572 = vmatpush3.bf16.msra.mxu1 %v8189_v43 }
 0xef7   : > { %7573 = vmatprep.subr.bf16.mxu1 %v7898_v3 }
 0xfc4   : > { %v4466_v58 = vpop.f32.mrb[22].mxu1 }
 0xfc5   : > { %v7644_v59 = vadd.f32 %v4466_v58, %v8338_v33  ;;  %v7044_v60 = vpop.f32.mrb[23].mxu1 }
 0xfc7   : > { %4478 = vrot.lane.b32.xlu0 %v7644_v59, %s7901_s29  ;;  %v4470_v62 = vadd.f32 %v7644_v59, %v3982_v61 }
 0xfc9   : > { %v6178_v63 = vmul.f32 -1.442695, %v4470_v62 }
 0xfcb   : > { %7812 = vpow2.f32 %v6178_v63  ;;  %v5541_v63 = vld [vmem:[%s8782_s7 + $0x8] sm:$0xff] }
 0xfd5   : > { %v7813_v0 = vpop.eup %7812 }
 0xfd6   : > { %v4474_v1 = vadd.f32 1.0, %v7813_v0  ;;  %v5542_v0 = vld [vmem:[%s8782_s7 + $0x10] sm:$0xff] }
 0xfd8   : > { %7814 = vrcp.f32 %v4474_v1 }
 0xfe2   : > { %v7815_v2 = vpop.eup %7814 }
 0xfe3   : > { %v4488_v9 = vsub.f32 1.0, %v7815_v2  ;;  %v4494_v11 = vmul.f32 %v7815_v2, %v8544_v19 }
0x1039   : > { %v4479_v4 = vpop.permute.xlu0 %4478 }
0x103a   : > { %v4481_v5 = vmul.f32 %v7815_v2, %v4479_v4  ;;  %v5558_v2 = vand.u32 4294901760, %v5541_v63  ;;  %v5543_v4 = vld [vmem:[%s8782_s7 + $0x18] sm:$0xff] }
0x103c   : > { %4483 = vrot.lane.b32.xlu1 %v4481_v5, %s7901_s29  ;;  %v5561_v5 = vand.u32 4294901760, %v5542_v0 }
0x10ae   : > { %v4484_v6 = vpop.permute.xlu1 %4483 }
0x10af   : > { %v4486_v7 = vadd.f32 %v4484_v6, %v3982_v61  ;;  %v5564_v6 = vand.u32 4294901760, %v5543_v4 }
0x10b1   : > { %7816 = vtanh.f32 %v4486_v7 }
0x10bb   : > { %v7817_v8 = vpop.eup %7816 }
0x10bc   : > { %4490 = vrot.lane.b32.xlu0 %v7817_v8, %s7902_s30 }
0x112e   : > { %v4491_v10 = vpop.permute.xlu0 %4490 }
0x112f   : > { %v4493_v12 = vmul.f32 %v4491_v10, %v4488_v9  ;;  %v5642_v9 = vsub.f32 %v5541_v63, %v5558_v2  ;;  %v5649_v10 = vsub.f32 %v5542_v0, %v5561_v5 }
0x1131   : > { %v8592_v13 = vadd.f32 %v4494_v11, %v4493_v12  ;;  %v5656_v11 = vsub.f32 %v5543_v4, %v5564_v6  ;;  %v8691_v12 = vpack.c.bf16 %v5564_v6, %v5561_v5 }
0x1133   : > { %4497 = vrot.lane.b32.xlu1 %v8592_v13, %s7902_s30 }
0x11a5   : > { %v4498_v14 = vpop.permute.xlu1 %4497 }
0x11a6   : > { %4500 = vst.msk [vmem:[%s8354_s20 + $0x5] sm:$0x1] %vm1904_vm3, %v4498_v14  ;;  %v4502_v23 = vsel %vm393_vm1, %v4498_v14, 0 }
0x11a7   : > { %v4573_v24 = vand.u32 4294901760, %v4502_v23 }
0x11a9   : > { %v4574_v28 = vsub.f32 %v4502_v23, %v4573_v24 }
0x11ab   : > { %v4575_v29 = vand.u32 4294901760, %v4574_v28 }
0x11ad   : > { %v4576_v34 = vsub.f32 %v4574_v28, %v4575_v29 }
0x11af   : > { %v4577_v35 = vand.u32 4294901760, %v4576_v34  ;;  %v5643_v34 = vand.u32 4294901760, %v5642_v9 }
0x11b1   : > { %7054 = vmatmul.mubr.f32.vlgmr.msra.gmra.mrb[12].mxu0 %v4577_v35 }
0x11b2   : > { %7539 = vmatpush3.bf16.msra.mxu0 %v8211_v53  ;;  %7064 = vmatprep.mubr.msk.f32.mxu0 %vm7899_vm0, %v7900_v15 }
0x11b3   : > { %7540 = vmatprep.subr.bf16.mxu0 %v7898_v3 }
0x11b6   : > { %7542 = vmatpush3.bf16.msra.mxu0 %v8223_v18 }
0x11b7   : > { %7543 = vmatprep.subr.bf16.mxu0 %v7898_v3 }
0x11b9   : > { %7065 = vmatmul.mubr.f32.vlgmr.msra.gmra.mrb[12].mxu0 %v4573_v24 }
0x11ba   : > { %7545 = vmatpush3.bf16.msra.mxu0 %v8234_v20  ;;  %7075 = vmatprep.mubr.msk.f32.mxu0 %vm7899_vm0, %v7900_v15 }
0x11bb   : > { %7546 = vmatprep.subr.bf16.mxu0 %v7898_v3 }
0x11be   : > { %7548 = vmatpush3.bf16.msra.mxu0 %v8248_v26 }
0x11bf   : > { %7549 = vmatprep.subr.bf16.mxu0 %v7898_v3 }
0x11c1   : > { %7076 = vmatmul.mubr.f32.vlgmr.msra.gmra.mrb[12].mxu0 %v4574_v28 }
0x11c2   : > { %7551 = vmatpush3.bf16.msra.mxu0 %v8175_v32  ;;  %7086 = vmatprep.mubr.msk.f32.mxu0 %vm7899_vm0, %v7900_v15 }
0x11c3   : > { %7552 = vmatprep.subr.bf16.mxu0 %v7898_v3 }
0x11c6   : > { %7554 = vmatpush3.bf16.msra.mxu0 %v8189_v43 }
0x11c7   : > { %7555 = vmatprep.subr.bf16.mxu0 %v7898_v3 }
0x11c9   : > { %7087 = vmatmul.mubr.f32.vlgmr.msra.gmra.mrb[12].mxu0 %v4575_v29 }
0x11ca   : > { %7557 = vmatpush3.bf16.msra.mxu0 %v8282_v21  ;;  %7097 = vmatprep.mubr.msk.f32.mxu0 %vm7899_vm0, %v7900_v15 }
0x11cb   : > { %7558 = vmatprep.subr.bf16.mxu0 %v7898_v3 }
0x11ce   : > { %7560 = vmatpush3.bf16.msra.mxu0 %v8294_v36 }
0x11cf   : > { %7561 = vmatprep.subr.bf16.mxu0 %v7898_v3 }
0x11d1   : > { %7098 = vmatmul.mubr.f32.vlgmr.msra.gmra.mrb[12].mxu0 %v4573_v24 }
0x11d2   : > { %7563 = vmatpush3.bf16.msra.mxu0 %v8175_v32  ;;  %7108 = vmatprep.mubr.msk.f32.mxu0 %vm7899_vm0, %v7900_v15 }
0x11d3   : > { %7564 = vmatprep.subr.bf16.mxu0 %v7898_v3 }
0x11d6   : > { %7566 = vmatpush3.bf16.msra.mxu0 %v8189_v43 }
0x11d7   : > { %7603 = vmatprep.subr.bf16.mxu0 %v7898_v3 }
0x11d9   : > { %7109 = vmatmul.mubr.f32.vlgmr.msra.gmra.mrb[12].mxu0 %v4573_v24 }
0x11da   : > { %7185 = vmatprep.mubr.msk.f32.mxu0 %vm7899_vm0, %v7900_v15 }
0x12ac   : > { %v4985_v42 = vpop.f32.mrb[12].mxu0 }
0x12ad   : > { %v7645_v44 = vadd.f32 %v4985_v42, %v8338_v33  ;;  %v7110_v45 = vpop.f32.mrb[13].mxu0  ;;  %v5644_v42 = vsub.f32 %v5642_v9, %v5643_v34 }
0x12af   : > { %4997 = vrot.lane.b32.xlu0 %v7645_v44, %s7901_s29  ;;  %v4989_v50 = vadd.f32 %v7645_v44, %v4501_v49  ;;  %v5645_v45 = vand.u32 4294901760, %v5644_v42 }
0x12b1   : > { %v6179_v51 = vmul.f32 -1.442695, %v4989_v50  ;;  %v5657_v50 = vand.u32 4294901760, %v5656_v11 }
0x12b3   : > { %7818 = vpow2.f32 %v6179_v51 }
0x12bd   : > { %v7819_v54 = vpop.eup %7818 }
0x12be   : > { %v4993_v55 = vadd.f32 1.0, %v7819_v54 }
0x12c0   : > { %7820 = vrcp.f32 %v4993_v55  ;;  %v5658_v55 = vsub.f32 %v5656_v11, %v5657_v50 }
0x12ca   : > { %v7821_v17 = vpop.eup %7820 }
0x12cb   : > { %v5007_v39 = vsub.f32 1.0, %v7821_v17  ;;  %v5013_v40 = vmul.f32 %v7821_v17, %v8592_v13 }
0x1321   : > { %v4998_v22 = vpop.permute.xlu0 %4997 }
0x1322   : > { %v5000_v25 = vmul.f32 %v7821_v17, %v4998_v22  ;;  %v5659_v22 = vand.u32 4294901760, %v5658_v55 }
0x1324   : > { %5002 = vrot.lane.b32.xlu1 %v5000_v25, %s7901_s29 }
0x1396   : > { %v5003_v30 = vpop.permute.xlu1 %5002 }
0x1397   : > { %v5005_v31 = vadd.f32 %v5003_v30, %v4501_v49  ;;  %v5650_v49 = vand.u32 4294901760, %v5649_v10 }
0x1399   : > { %7822 = vtanh.f32 %v5005_v31  ;;  %v5651_v54 = vsub.f32 %v5649_v10, %v5650_v49  ;;  %v7619_v31 = vpack.c.bf16 %v5656_v11, %v5649_v10 }
0x139b   : > { %v5652_v17 = vand.u32 4294901760, %v5651_v54 }
0x139d   : > { %v7613_v25 = vpack.c.bf16 %v5659_v22, %v5652_v17 }
0x13a3   : > { %v7823_v38 = vpop.eup %7822 }
0x13a4   : > { %5009 = vrot.lane.b32.xlu0 %v7823_v38, %s7902_s30 }
0x1416   : > { %v5010_v16 = vpop.permute.xlu0 %5009 }
0x1417   : > { %v5012_v46 = vmul.f32 %v5010_v16, %v5007_v39  ;;  %v7631_v39 = vpack.c.bf16 %v5657_v50, %v5650_v49 }
0x1419   : > { %v8636_v48 = vadd.f32 %v5013_v40, %v5012_v46 }
0x141b   : > { %5016 = vrot.lane.b32.xlu1 %v8636_v48, %s7902_s30 }
0x148d   : > { %v5017_v19 = vpop.permute.xlu1 %5016 }
0x148e   : > { %5019 = vst.msk [vmem:[%s8354_s20 + $0x6] sm:$0x1] %vm1904_vm3, %v5017_v19  ;;  %v5021_v27 = vsel %vm393_vm1, %v5017_v19, 0 }
0x148f   : > { %v5092_v37 = vand.u32 4294901760, %v5021_v27 }
0x1491   : > { %v5093_v41 = vsub.f32 %v5021_v27, %v5092_v37 }
0x1493   : > { %v5094_v47 = vand.u32 4294901760, %v5093_v41 }
0x1495   : > { %v5095_v52 = vsub.f32 %v5093_v41, %v5094_v47 }
0x1497   : > { %v5096_v56 = vand.u32 4294901760, %v5095_v52 }
0x1499   : > { %7120 = vmatmul.mubr.f32.vlgmr.msra.gmra.mrb[24].mxu1 %v5096_v56 }
0x149a   : > { %7575 = vmatpush3.bf16.msra.mxu1 %v8211_v53  ;;  %7130 = vmatprep.mubr.msk.f32.mxu1 %vm7899_vm0, %v7900_v15 }
0x149b   : > { %7576 = vmatprep.subr.bf16.mxu1 %v7898_v3 }
0x149e   : > { %7578 = vmatpush3.bf16.msra.mxu1 %v8223_v18 }
0x149f   : > { %7579 = vmatprep.subr.bf16.mxu1 %v7898_v3 }
0x14a1   : > { %7131 = vmatmul.mubr.f32.vlgmr.msra.gmra.mrb[24].mxu1 %v5092_v37 }
0x14a2   : > { %7581 = vmatpush3.bf16.msra.mxu1 %v8234_v20  ;;  %7141 = vmatprep.mubr.msk.f32.mxu1 %vm7899_vm0, %v7900_v15 }
0x14a3   : > { %7582 = vmatprep.subr.bf16.mxu1 %v7898_v3 }
0x14a6   : > { %7584 = vmatpush3.bf16.msra.mxu1 %v8248_v26  ;;  %v5020_v26 = vld [vmem:[#allocation2 + $0x7] sm:$0x1] }
0x14a7   : > { %7585 = vmatprep.subr.bf16.mxu1 %v7898_v3 }
0x14a9   : > { %7142 = vmatmul.mubr.f32.vlgmr.msra.gmra.mrb[24].mxu1 %v5093_v41 }
0x14aa   : > { %7587 = vmatpush3.bf16.msra.mxu1 %v8175_v32  ;;  %7152 = vmatprep.mubr.msk.f32.mxu1 %vm7899_vm0, %v7900_v15 }
0x14ab   : > { %7588 = vmatprep.subr.bf16.mxu1 %v7898_v3 }
0x14ae   : > { %7590 = vmatpush3.bf16.msra.mxu1 %v8189_v43 }
0x14af   : > { %7591 = vmatprep.subr.bf16.mxu1 %v7898_v3 }
0x14b1   : > { %7153 = vmatmul.mubr.f32.vlgmr.msra.gmra.mrb[24].mxu1 %v5094_v47 }
0x14b2   : > { %7593 = vmatpush3.bf16.msra.mxu1 %v8282_v21  ;;  %7163 = vmatprep.mubr.msk.f32.mxu1 %vm7899_vm0, %v7900_v15 }
0x14b3   : > { %7594 = vmatprep.subr.bf16.mxu1 %v7898_v3 }
0x14b6   : > { %7596 = vmatpush3.bf16.msra.mxu1 %v8294_v36 }
0x14b7   : > { %7597 = vmatprep.subr.bf16.mxu1 %v7898_v3 }
0x14b9   : > { %7164 = vmatmul.mubr.f32.vlgmr.msra.gmra.mrb[24].mxu1 %v5092_v37 }
0x14ba   : > { %7599 = vmatpush3.bf16.msra.mxu1 %v8175_v32  ;;  %7174 = vmatprep.mubr.msk.f32.mxu1 %vm7899_vm0, %v7900_v15 }
0x14bb   : > { %7600 = vmatprep.subr.bf16.mxu1 %v7898_v3 }
0x14be   : > { %7602 = vmatpush3.bf16.msra.mxu1 %v8189_v43 }
0x14c1   : > { %7175 = vmatmul.mubr.f32.vlgmr.msra.gmra.mrb[24].mxu1 %v5092_v37 }
0x1594   : > { %v5504_v53 = vpop.f32.mrb[24].mxu1 }
0x1595   : > { %v7646_v18 = vadd.f32 %v5504_v53, %v8338_v33  ;;  %v7176_v20 = vpop.f32.mrb[25].mxu1  ;;  %v5540_v33 = vld [vmem:[%s8782_s7] sm:$0xff] }
0x1596   : > { %v5555_v1 = vand.u32 4294901760, %v5540_v33 }
0x1597   : > { %5516 = vrot.lane.b32.xlu0 %v7646_v18, %s7901_s29  ;;  %v5508_v21 = vadd.f32 %v7646_v18, %v5020_v26 }
0x1598   : > { %v8688_v7 = vpack.c.bf16 %v5558_v2, %v5555_v1  ;;  %v5635_v8 = vsub.f32 %v5540_v33, %v5555_v1 }
0x1599   : > { %v6180_v36 = vmul.f32 -1.442695, %v5508_v21 }
0x159a   : > { %7605 = vmatpush3.bf16.msra.mxu0 %v8688_v7  ;;  %v5636_v29 = vand.u32 4294901760, %v5635_v8  ;;  %v7616_v30 = vpack.c.bf16 %v5642_v9, %v5635_v8 }
0x159b   : > { %7824 = vpow2.f32 %v6180_v36  ;;  %7606 = vmatprep.subr.bf16.mxu0 %v7898_v3 }
0x159c   : > { %v5637_v35 = vsub.f32 %v5635_v8, %v5636_v29  ;;  %v7628_v38 = vpack.c.bf16 %v5643_v34, %v5636_v29 }
0x159e   : > { %7608 = vmatpush3.bf16.msra.mxu0 %v8691_v12  ;;  %v5638_v44 = vand.u32 4294901760, %v5637_v35 }
0x159f   : > { %7609 = vmatprep.subr.bf16.mxu0 %v7898_v3 }
0x15a0   : > { %v7610_v51 = vpack.c.bf16 %v5645_v45, %v5638_v44 }
0x15a5   : > { %v7825_v57 = vpop.eup %7824 }
0x15a6   : > { %v5512_v32 = vadd.f32 1.0, %v7825_v57 }
0x15a8   : > { %7826 = vrcp.f32 %v5512_v32 }
0x15b2   : > { %v7827_v58 = vpop.eup %7826 }
0x15b3   : > { %v5526_v13 = vsub.f32 1.0, %v7827_v58  ;;  %v5532_v23 = vmul.f32 %v7827_v58, %v8636_v48 }
0x1609   : > { %v5517_v59 = vpop.permute.xlu0 %5516 }
0x160a   : > { %v5519_v60 = vmul.f32 %v7827_v58, %v5517_v59 }
0x160c   : > { %5521 = vrot.lane.b32.xlu1 %v5519_v60, %s7901_s29  ;;  %s7903_s29 = smov [#allocation3]  }
0x160d   : > { %s7838_s0 = sshll.u32 %s7903_s29, 4  ;;  %s7839_s0 = int_to_ptr.vmem [resolvable:$false] %s7838_s0 }
0x160e   : > { %s7840_s1 = scalar_lea.vmem %s7839_s0, 256  ;;  %p7841_p0 = scmp.lt.s32.totalorder %s6067_s12, %s7839_s0 }
0x160f   : > { %p7842_p1 = scmp.lt.s32.totalorder %s7840_s1, %s7834_s18 }
0x1611   : > { %p7843_p2 = por %p7842_p1, %p7841_p0 }
0x1613   : > { %p7844_p3 = pnand %p7843_p2, %p7837_p13 }
0x167e   : > { %v5522_v43 = vpop.permute.xlu1 %5521 }
0x167f   : > { %v5524_v61 = vadd.f32 %v5522_v43, %v5020_v26 }
0x1681   : > { %7828 = vtanh.f32 %v5524_v61 }
0x168b   : > { %v7829_v62 = vpop.eup %7828 }
0x168c   : > { %5528 = vrot.lane.b32.xlu0 %v7829_v62, %s7902_s30 }
0x16fe   : > { %v5529_v14 = vpop.permute.xlu0 %5528 }
0x16ff   : > { %v5531_v24 = vmul.f32 %v5529_v14, %v5526_v13 }
0x1701   : > { %v5533_v28 = vadd.f32 %v5532_v23, %v5531_v24 }
0x1703   : > { %5535 = vrot.lane.b32.xlu1 %v5533_v28, %s7902_s30  ;;  %s6184_s30 = sshll.u32 %s7980_s17, 7 }
0x1704   : > { %s8730_s26 = scalar_lea.hbm %s8784_s9, %s6184_s30 }
0x1775   : > { %v5536_v16 = vpop.permute.xlu1 %5535 }
0x1776   : > { %5538 = vst.msk [vmem:[%s8354_s20 + $0x7] sm:$0x1] %vm1904_vm3, %v5536_v16 }
0x177d   : > { %v5539_v40 = vld [vmem:[%s8354_s20] sm:$0xff] }
0x177e   : > { %v5552_v46 = vsel %vm393_vm1, %v5539_v40, 0 }
0x177f   : > { %v5623_v48 = vand.u32 4294901760, %v5552_v46 }
0x1781   : > { %v5624_v19 = vsub.f32 %v5552_v46, %v5623_v48 }
0x1783   : > { %v5625_v27 = vand.u32 4294901760, %v5624_v19 }
0x1785   : > { %v5626_v37 = vsub.f32 %v5624_v19, %v5625_v27 }
0x1787   : > { %v5627_v41 = vand.u32 4294901760, %v5626_v37 }
0x1789   : > { %7186 = vmatmul.mubr.f32.vlgmr.msra.gmra.mrb[14].mxu0 %v5627_v41 }
0x178a   : > { %7611 = vmatpush3.bf16.msra.mxu0 %v7610_v51  ;;  %7196 = vmatprep.mubr.msk.f32.mxu0 %vm7899_vm0, %v7900_v15 }
0x178b   : > { %7612 = vmatprep.subr.bf16.mxu0 %v7898_v3 }
0x178e   : > { %7614 = vmatpush3.bf16.msra.mxu0 %v7613_v25 }
0x178f   : > { %7615 = vmatprep.subr.bf16.mxu0 %v7898_v3 }
0x1791   : > { %7197 = vmatmul.mubr.f32.vlgmr.msra.gmra.mrb[14].mxu0 %v5623_v48 }
0x1792   : > { %7617 = vmatpush3.bf16.msra.mxu0 %v7616_v30  ;;  %7207 = vmatprep.mubr.msk.f32.mxu0 %vm7899_vm0, %v7900_v15 }
0x1793   : > { %7618 = vmatprep.subr.bf16.mxu0 %v7898_v3 }
0x1796   : > { %7620 = vmatpush3.bf16.msra.mxu0 %v7619_v31 }
0x1797   : > { %7621 = vmatprep.subr.bf16.mxu0 %v7898_v3 }
0x1799   : > { %7208 = vmatmul.mubr.f32.vlgmr.msra.gmra.mrb[14].mxu0 %v5624_v19 }
0x179a   : > { %7623 = vmatpush3.bf16.msra.mxu0 %v8688_v7  ;;  %7218 = vmatprep.mubr.msk.f32.mxu0 %vm7899_vm0, %v7900_v15 }
0x179b   : > { %7624 = vmatprep.subr.bf16.mxu0 %v7898_v3 }
0x179e   : > { %7626 = vmatpush3.bf16.msra.mxu0 %v8691_v12 }
0x179f   : > { %7627 = vmatprep.subr.bf16.mxu0 %v7898_v3 }
0x17a1   : > { %7219 = vmatmul.mubr.f32.vlgmr.msra.gmra.mrb[14].mxu0 %v5625_v27 }
0x17a2   : > { %7629 = vmatpush3.bf16.msra.mxu0 %v7628_v38  ;;  %7229 = vmatprep.mubr.msk.f32.mxu0 %vm7899_vm0, %v7900_v15 }
0x17a3   : > { %7630 = vmatprep.subr.bf16.mxu0 %v7898_v3 }
0x17a6   : > { %7632 = vmatpush3.bf16.msra.mxu0 %v7631_v39 }
0x17a7   : > { %7633 = vmatprep.subr.bf16.mxu0 %v7898_v3 }
0x17a9   : > { %7230 = vmatmul.mubr.f32.vlgmr.msra.gmra.mrb[14].mxu0 %v5623_v48 }
0x17aa   : > { %7635 = vmatpush3.bf16.msra.mxu0 %v8688_v7  ;;  %7240 = vmatprep.mubr.msk.f32.mxu0 %vm7899_vm0, %v7900_v15 }
0x17ab   : > { %7636 = vmatprep.subr.bf16.mxu0 %v7898_v3 }
0x17ae   : > { %7638 = vmatpush3.bf16.msra.mxu0 %v8691_v12 }
0x17b1   : > { %7241 = vmatmul.mubr.f32.vlgmr.msra.gmra.mrb[14].mxu0 %v5623_v48 }
0x17b2   : > { %7847 = shalt.err (!%p7844_p3)
}
0x17b3   : > { %s7848_s17 = scalar_lea.hbm %s8730_s26, 128  ;;  %s7852_s21 = scalar_lea.hbm %s8784_s9, 256 }
0x17b4   : > { %p7849_p4 = scmp.ne.s32.totalorder %s8730_s26, %s7848_s17  ;;  %p7853_p9 = scmp.lt.u32.totalorder %s8730_s26, %s8784_s9 }
0x17b5   : > { %p7854_p10 = scmp.lt.u32.totalorder %s7852_s21, %s7848_s17  ;;  %p7856_p12 = scmp.lt.u32.totalorder %s7848_s17, %s8730_s26 }
0x17b6   : > { %p7850_p7 = pnand %p7849_p4, %p7997_p5 }
0x17b7   : > { %p7855_p11 = por %p7854_p10, %p7853_p9 }
0x17b8   : > { %p7851_p8 = pneg %p7850_p7 }
0x17b9   : > { %p7857_p13 = por %p7856_p12, %p7855_p11 }
0x17bb   : > { %p7858_p0 = pnand %p7857_p13, %p7851_p8 }
0x17bd   : > { %7861 = shalt.err (!%p7858_p0)
}
0x17be   : > { %7738 = dma.vmem_to_hbm [thread:$0]  (%p7997_p5), %s6067_s12, 128, %s8730_s26, %s6049_s28   ;;  %v6181_v3 = vld [vmem:[%s8783_s8] ss:$0 sm:$0xff] }
0x17bf   : > { %s382_s23 = scalar_lea.vmem %s8785_s10, %s8056_s11 }
0x1884   : > { %v6035_v15 = vpop.f32.mrb[14].mxu0 }
0x1885   : > { %v7647_v47 = vadd.f32 %v6181_v3, %v6035_v15  ;;  %v7242_v52 = vpop.f32.mrb[15].mxu0 }
0x1887   : > { %v6182_v56 = vmul.f32 -1.442695, %v7647_v47 }
0x1889   : > { %7830 = vpow2.f32 %v6182_v56 }
0x1893   : > { %v7831_v53 = vpop.eup %7830 }
0x1894   : > { %v6042_v18 = vadd.f32 1.0, %v7831_v53 }
0x1896   : > { %7832 = vrcp.f32 %v6042_v18 }
0x18a0   : > { %v7833_v20 = vpop.eup %7832 }
0x18a1   : > { %v6045_v26 = vmul.f32 50.0, %v7833_v20 }
0x18a3   : > { %v6046_v21 = vadd.f32 -15.0, %v6045_v26 }
0x18a5   : > { %6047 = vst [vmem:[%s382_s23] sm:$0xff] %v6046_v21 }
0x18a6 PF: > { %p7744_p5 = scmp.ge.s32.totalorder %s7896_s16, 2  ;;  %s6081_s12 = sand.u32 1, %s7884_s13  }
0x18a7   : > { %s6082_s26 = scalar_lea.sflag [#allocation4], %s6081_s12 }
0x18a8   : > { %p7741_p1 = pnand %p7744_p5, %p8001_p6 }
0x18aa   : > { %7879 = dma.done.wait (!%p7741_p1), %s6082_s26, 128  }
0x18ab   : > { %7881 = vsyncadd (!%p7741_p1), %s6082_s26, 4294967168  ;;  %p21_p2 = scmp.ge.s32.totalorder %s7984_s19, 4   ;;  %s8794_s13 = smov %s7888_s14 }
0x18ac   : > { %s8795_s14 = smov %s7892_s15  ;;  %s8796_s15 = smov %s7995_s22 }
0x18ad   : > { %s8797_s16 = smov %s7984_s19  ;;  %23 = sbr.rel (!%p21_p2) target bundleno = 6 (0x6), region = 106 }
0x18b4   :  { %6094 = vsyncpa [#allocation4], 1 }
0x18b5   :  { %6096 = vsyncpa [#allocation4 + $0x1], 1 }

</bundles_post_ra>
